<compile_context>
chip_gen: v5e
topology: v5e:2x2
jax: 0.10.0
libtpu: 0.0.40
codegen_flags: <defaults>
</compile_context>

<pallas_src>
import functools
import math

import jax
import jax.numpy as jnp
from jax.experimental import pallas as pl
from jax.experimental.pallas import tpu as pltpu


# ---------------------------------------------------------------------------
# Fused Pallas kernel: one batch tile per grid step.
# ---------------------------------------------------------------------------

def _fused_self_attn_kernel(
    x_ref,        # (Bt, N, D)
    wqkv_ref,     # (D, 3*inner)   = (wq*scale) || wk || wv       (x.dtype)
    pos_ref,      # (N, 2*inner)   = (pos_tiled*scale) || pos_tiled (x.dtype)
    w_out_ref,    # (inner, Dout)                                   (x.dtype)
    b_out_ref,    # (1, Dout)
    o_ref,        # (Bt, N, Dout)
    qkv_s,        # VMEM scratch (Bt, N, 3*inner), x.dtype
    att_s,        # VMEM scratch (Bt, N, inner),   x.dtype
    *,
    heads,
    dim_head,
):
    bt, n, _ = x_ref.shape
    inner = heads * dim_head
    cdt = x_ref.dtype                       # MXU operand dtype (bf16-native)

    # ---- QKV projection: one wide MXU matmul over Bt*N rows, f32 accumulate.
    x2 = x_ref[...].reshape(bt * n, -1)
    qkv = jnp.dot(x2, wqkv_ref[...], preferred_element_type=jnp.float32)
    qkv = qkv.reshape(bt, n, 3 * inner)

    # ---- Positional embedding: one lane-aligned add over the full q||k slab.
    pos = pos_ref[...].astype(jnp.float32)[None]               # (1, N, 2*inner)
    qkv_s[:, :, : 2 * inner] = (qkv[:, :, : 2 * inner] + pos).astype(cdt)
    qkv_s[:, :, 2 * inner :] = qkv[:, :, 2 * inner :].astype(cdt)

    # ---- Per-head attention. Heads are read/written through VMEM scratch at
    # static lane offsets (no lane concat, bounded live ranges). Softmax stats
    # stay f32; MXU operands are cdt. Scale is already folded into q.
    for h in range(heads):                                      # static unroll
        lo = h * dim_head
        hi = lo + dim_head
        qh = qkv_s[:, :, lo:hi]                                 # (Bt, N, dh)
        kh = qkv_s[:, :, inner + lo:inner + hi]                 # (Bt, N, dh)
        vh = qkv_s[:, :, 2 * inner + lo:2 * inner + hi]         # (Bt, N, dh)

        s = jnp.einsum("bqd,bkd->bqk", qh, kh,
                       preferred_element_type=jnp.float32)      # (Bt, N, N)
        m = jnp.max(s, axis=-1, keepdims=True)
        p = jnp.exp(s - m)
        l = jnp.sum(p, axis=-1, keepdims=True)
        oh = jnp.einsum("bqk,bkd->bqd", p.astype(cdt), vh,
                        preferred_element_type=jnp.float32)     # (Bt, N, dh)
        oh = oh * pl.reciprocal(l, approx=True)                 # EUP slot
        att_s[:, :, lo:hi] = oh.astype(cdt)

    # ---- Fused output projection epilogue (Linear + bias; Dropout identity).
    out2 = att_s[...].reshape(bt * n, inner)
    y = jnp.dot(out2, w_out_ref[...], preferred_element_type=jnp.float32)
    y = y + b_out_ref[...].astype(jnp.float32)
    o_ref[...] = y.reshape(bt, n, -1).astype(o_ref.dtype)


# ---------------------------------------------------------------------------
# Wrapper
# ---------------------------------------------------------------------------

def _pick_batch_tile(b, n):
    divisors = [bt for bt in range(1, b + 1) if b % bt == 0]
    # First choice: >=128 MXU rows per step while keeping >=2 grid steps (v7x).
    for bt in divisors:
        if bt * n >= 128 and b // bt >= 2:
            return bt
    # Otherwise: just fill >=128 rows.
    for bt in divisors:
        if bt * n >= 128:
            return bt
    return divisors[-1]


def self_attention_with_pos_emb(params, x, *, heads, dim_head, batch_tile=None):
    """Forward pass of MemoryEfficientSelfAttentionWithPosEmb (eval mode)."""
    b, n, d = x.shape
    inner = heads * dim_head
    scale = 1.0 / math.sqrt(dim_head)
    cdt = x.dtype

    pos = params["pos"]                                  # (spatial_size, dh)
    assert n == pos.shape[0], "x.shape[1] must equal spatial_size"

    # Host-side (tiny, outside the kernel): fold the softmax scale into the q
    # projection and q pos-emb; pre-tile pos to the merged-head lane layout;
    # present all MXU weight operands in the compute dtype.
    wqkv = jnp.concatenate(
        [params["wq"] * scale, params["wk"], params["wv"]], axis=1).astype(cdt)
    pos_tiled = jnp.tile(pos, (1, heads))                         # (N, inner)
    pos_qk = jnp.concatenate([pos_tiled * scale, pos_tiled], axis=1).astype(cdt)
    w_out = params["w_out"].astype(cdt)
    b_out = params["b_out"].reshape(1, -1).astype(cdt)
    d_out = w_out.shape[1]

    if batch_tile is None:
        batch_tile = _pick_batch_tile(b, n)
    assert b % batch_tile == 0

    kern = functools.partial(_fused_self_attn_kernel,
                             heads=heads, dim_head=dim_head)
    return pl.pallas_call(
        kern,
        out_shape=jax.ShapeDtypeStruct((b, n, d_out), x.dtype),
        grid=(b // batch_tile,),
        in_specs=[
            pl.BlockSpec((batch_tile, n, d), lambda i: (i, 0, 0)),
            pl.BlockSpec((d, 3 * inner), lambda i: (0, 0)),
            pl.BlockSpec((n, 2 * inner), lambda i: (0, 0)),
            pl.BlockSpec((inner, d_out), lambda i: (0, 0)),
            pl.BlockSpec((1, d_out), lambda i: (0, 0)),
        ],
        out_specs=pl.BlockSpec((batch_tile, n, d_out), lambda i: (i, 0, 0)),
        scratch_shapes=[
            pltpu.VMEM((batch_tile, n, 3 * inner), cdt),   # q||k (+pos) || v
            pltpu.VMEM((batch_tile, n, inner), cdt),       # merged head output
        ],
        compiler_params=pltpu.CompilerParams(
            dimension_semantics=("parallel",),
            vmem_limit_bytes=64 * 1024 * 1024,
        ),
    )(x, wqkv, pos_qk, w_out, b_out)


# ---------------------------------------------------------------------------
# Parameters (weights stored as (in, out) for x @ W)
# ---------------------------------------------------------------------------

def init_params(key, query_dim, heads, dim_head, spatial_size):
    inner = heads * dim_head
    ks = jax.random.split(key, 6)

    def w(k, din, dout):
        return jax.random.normal(k, (din, dout), jnp.float32) / math.sqrt(din)

    return {
        "wq": w(ks[0], query_dim, inner),
        "wk": w(ks[1], query_dim, inner),   # context_dim defaults to query_dim
        "wv": w(ks[2], query_dim, inner),
        "w_out": w(ks[3], inner, query_dim),
        "b_out": 0.01 * jax.random.normal(ks[4], (query_dim,), jnp.float32),
        # PyTorch initializes position_emb to zeros; random here so the
        # pos-add path is actually exercised by the correctness check.
        "pos": 0.1 * jax.random.normal(ks[5], (spatial_size, dim_head),
                                       jnp.float32),
    }


# ---------------------------------------------------------------------------
# Pure-JAX reference (mirrors the PyTorch forward)
# ---------------------------------------------------------------------------

def reference_forward(params, x, *, heads, dim_head):
    b, n, d = x.shape
    inner = heads * dim_head
    pos_tiled = jnp.tile(params["pos"], (1, heads))       # repeat(..., heads)

    q = x @ params["wq"] + pos_tiled[None]
    k = x @ params["wk"] + pos_tiled[None]
    v = x @ params["wv"]

    def split(t):
        return (t.reshape(b, n, heads, dim_head)
                 .transpose(0, 2, 1, 3)
                 .reshape(b * heads, n, dim_head))

    qh, kh, vh = map(split, (q, k, v))
    s = jnp.einsum("bqd,bkd->bqk", qh, kh) / math.sqrt(dim_head)
    p = jax.nn.softmax(s, axis=-1)
    o = jnp.einsum("bqk,bkd->bqd", p, vh)
    o = (o.reshape(b, heads, n, dim_head)
          .transpose(0, 2, 1, 3)
          .reshape(b, n, inner))
    return o @ params["w_out"] + params["b_out"]


# ---------------------------------------------------------------------------
# Main
# ---------------------------------------------------------------------------

if __name__ == "__main__":
    B = 2
    SPATIAL = 64          # sequence length (== spatial_size)
    QUERY_DIM = 128       # lane-dense output (d_out multiple of 128)
    HEADS = 4
    DIM_HEAD = 64         # module default; inner_dim = 256

    key = jax.random.PRNGKey(0)
    kx, kp = jax.random.split(key, 2)

    x = jax.random.normal(kx, (B, SPATIAL, QUERY_DIM), jnp.float32)
    params = init_params(kp, QUERY_DIM, HEADS, DIM_HEAD, SPATIAL)

    fwd = jax.jit(
        functools.partial(self_attention_with_pos_emb,
                          heads=HEADS, dim_head=DIM_HEAD)
    )
    y = jax.block_until_ready(fwd(params, x))

    y_ref = jax.block_until_ready(
        reference_forward(params, x, heads=HEADS, dim_head=DIM_HEAD)
    )

    assert y.shape == (B, SPATIAL, QUERY_DIM), y.shape
    assert bool(jnp.all(jnp.isfinite(y)))
    # Tolerance slightly relaxed for the EUP approximate reciprocal in softmax.
    assert jnp.allclose(y, y_ref, atol=2e-3, rtol=2e-3), float(
        jnp.max(jnp.abs(y - y_ref))
    )

    print("KERNEL_OK")
</pallas_src>

<mosaic_0001>
module attributes {stable_mosaic.version = 11 : i64} {
  func.func @_fused_self_attn_kernel(%arg0: i32, %arg1: memref<2x64x128xf32, #tpu.memory_space<vmem>>, %arg2: memref<128x768xf32, #tpu.memory_space<vmem>>, %arg3: memref<64x512xf32, #tpu.memory_space<vmem>>, %arg4: memref<256x128xf32, #tpu.memory_space<vmem>>, %arg5: memref<1x128xf32, #tpu.memory_space<vmem>>, %arg6: memref<2x64x128xf32, #tpu.memory_space<vmem>>, %arg7: memref<2x64x768xf32, #tpu.memory_space<vmem>>, %arg8: memref<2x64x256xf32, #tpu.memory_space<vmem>>) attributes {dimension_semantics = [#tpu.dimension_semantics<parallel>], iteration_bounds = array<i64: 1>, scalar_prefetch = 0 : i64, scratch_operands = 2 : i64, tpu.core_type = #tpu.core_type<tc>, window_params = [{transform_indices = @transform_0, window_bounds = array<i64: 2, 64, 128>}, {pipeline_mode = #tpu.pipeline_mode<synchronous>, transform_indices = @transform_1, window_bounds = array<i64: 128, 768>}, {pipeline_mode = #tpu.pipeline_mode<synchronous>, transform_indices = @transform_2, window_bounds = array<i64: 64, 512>}, {pipeline_mode = #tpu.pipeline_mode<synchronous>, transform_indices = @transform_3, window_bounds = array<i64: 256, 128>}, {pipeline_mode = #tpu.pipeline_mode<synchronous>, transform_indices = @transform_4, window_bounds = array<i64: 1, 128>}, {transform_indices = @transform_5, window_bounds = array<i64: 2, 64, 128>}]} {
    %c0 = arith.constant 0 : index
    %c0_0 = arith.constant 0 : index
    %c0_1 = arith.constant 0 : index
    %0 = vector.load %arg1[%c0, %c0_0, %c0_1] : memref<2x64x128xf32, #tpu.memory_space<vmem>>, vector<2x64x128xf32>
    %1 = vector.shape_cast %0 : vector<2x64x128xf32> to vector<128x128xf32>
    %c0_2 = arith.constant 0 : index
    %c0_3 = arith.constant 0 : index
    %2 = vector.load %arg2[%c0_2, %c0_3] : memref<128x768xf32, #tpu.memory_space<vmem>>, vector<128x768xf32>
    %cst = arith.constant dense<0.000000e+00> : vector<128x768xf32>
    %3 = tpu.matmul %1, %2, %cst {dimension_numbers = #tpu.dot_dimension_numbers<[1], [0], [0], [1], [0, 0, 1, 1], [], []>} : vector<128x128xf32>, vector<128x768xf32>, vector<128x768xf32> -> vector<128x768xf32>
    %4 = vector.shape_cast %3 : vector<128x768xf32> to vector<2x64x768xf32>
    %c0_4 = arith.constant 0 : index
    %c0_5 = arith.constant 0 : index
    %5 = vector.load %arg3[%c0_4, %c0_5] : memref<64x512xf32, #tpu.memory_space<vmem>>, vector<64x512xf32>
    %6 = vector.shape_cast %5 : vector<64x512xf32> to vector<1x64x512xf32>
    %7 = vector.extract_strided_slice %4 {offsets = [0, 0, 0], sizes = [2, 64, 512], strides = [1, 1, 1]} : vector<2x64x768xf32> to vector<2x64x512xf32>
    %8 = vector.broadcast %6 : vector<1x64x512xf32> to vector<2x64x512xf32>
    %9 = arith.addf %7, %8 : vector<2x64x512xf32>
    %c0_6 = arith.constant 0 : index
    %c0_7 = arith.constant 0 : index
    %c0_8 = arith.constant 0 : index
    %10 = vector.load %arg7[%c0_6, %c0_7, %c0_8] : memref<2x64x768xf32, #tpu.memory_space<vmem>>, vector<2x64x512xf32>
    tpu.vector_store %arg7[%c0_6, %c0_7, %c0_8], %9 {strides = array<i32>} : memref<2x64x768xf32, #tpu.memory_space<vmem>>, vector<2x64x512xf32>,
    %11 = vector.extract_strided_slice %4 {offsets = [0, 0, 512], sizes = [2, 64, 256], strides = [1, 1, 1]} : vector<2x64x768xf32> to vector<2x64x256xf32>
    %c0_9 = arith.constant 0 : index
    %c0_10 = arith.constant 0 : index
    %c512 = arith.constant 512 : index
    %12 = vector.load %arg7[%c0_9, %c0_10, %c512] : memref<2x64x768xf32, #tpu.memory_space<vmem>>, vector<2x64x256xf32>
    tpu.vector_store %arg7[%c0_9, %c0_10, %c512], %11 {strides = array<i32>} : memref<2x64x768xf32, #tpu.memory_space<vmem>>, vector<2x64x256xf32>,
    %c0_11 = arith.constant 0 : index
    %c0_12 = arith.constant 0 : index
    %c0_13 = arith.constant 0 : index
    %13 = vector.load %arg7[%c0_11, %c0_12, %c0_13] : memref<2x64x768xf32, #tpu.memory_space<vmem>>, vector<2x64x64xf32>
    %c0_14 = arith.constant 0 : index
    %c0_15 = arith.constant 0 : index
    %c256 = arith.constant 256 : index
    %14 = vector.load %arg7[%c0_14, %c0_15, %c256] : memref<2x64x768xf32, #tpu.memory_space<vmem>>, vector<2x64x64xf32>
    %c0_16 = arith.constant 0 : index
    %c0_17 = arith.constant 0 : index
    %c512_18 = arith.constant 512 : index
    %15 = vector.load %arg7[%c0_16, %c0_17, %c512_18] : memref<2x64x768xf32, #tpu.memory_space<vmem>>, vector<2x64x64xf32>
    "tpu.trace_start"() <{level = 10 : i32, message = "bqd,bkd->bqk"}> : () -> ()
    %cst_19 = arith.constant dense<0.000000e+00> : vector<2x64x64xf32>
    %16 = tpu.matmul %13, %14, %cst_19 {dimension_numbers = #tpu.dot_dimension_numbers<[2], [2], [1], [1], [0, 0, 0, 1, 1, 1], [0], [0]>} : vector<2x64x64xf32>, vector<2x64x64xf32>, vector<2x64x64xf32> -> vector<2x64x64xf32>
    "tpu.trace_stop"() : () -> ()
    %cst_20 = arith.constant dense<0xFF800000> : vector<2x64xf32>
    %17 = vector.multi_reduction <maximumf>, %16, %cst_20 [2] : vector<2x64x64xf32> to vector<2x64xf32>
    %18 = vector.shape_cast %17 : vector<2x64xf32> to vector<2x64x1xf32>
    %19 = vector.broadcast %18 : vector<2x64x1xf32> to vector<2x64x64xf32>
    %20 = arith.subf %16, %19 : vector<2x64x64xf32>
    %21 = math.exp %20 : vector<2x64x64xf32>
    %cst_21 = arith.constant dense<0.000000e+00> : vector<2x64xf32>
    %22 = vector.multi_reduction <add>, %21, %cst_21 [2] : vector<2x64x64xf32> to vector<2x64xf32>
    %23 = vector.shape_cast %22 : vector<2x64xf32> to vector<2x64x1xf32>
    "tpu.trace_start"() <{level = 10 : i32, message = "bqk,bkd->bqd"}> : () -> ()
    %cst_22 = arith.constant dense<0.000000e+00> : vector<2x64x64xf32>
    %24 = tpu.matmul %21, %15, %cst_22 {dimension_numbers = #tpu.dot_dimension_numbers<[2], [1], [1], [2], [0, 0, 0, 1, 1, 2], [0], [0]>} : vector<2x64x64xf32>, vector<2x64x64xf32>, vector<2x64x64xf32> -> vector<2x64x64xf32>
    "tpu.trace_stop"() : () -> ()
    %25 = tpu.reciprocal %23 {approx = true} : vector<2x64x1xf32> -> vector<2x64x1xf32>
    %26 = vector.broadcast %25 : vector<2x64x1xf32> to vector<2x64x64xf32>
    %27 = arith.mulf %24, %26 : vector<2x64x64xf32>
    %c0_23 = arith.constant 0 : index
    %c0_24 = arith.constant 0 : index
    %c0_25 = arith.constant 0 : index
    %28 = vector.load %arg8[%c0_23, %c0_24, %c0_25] : memref<2x64x256xf32, #tpu.memory_space<vmem>>, vector<2x64x64xf32>
    tpu.vector_store %arg8[%c0_23, %c0_24, %c0_25], %27 {strides = array<i32>} : memref<2x64x256xf32, #tpu.memory_space<vmem>>, vector<2x64x64xf32>,
    %c0_26 = arith.constant 0 : index
    %c0_27 = arith.constant 0 : index
    %c64 = arith.constant 64 : index
    %29 = vector.load %arg7[%c0_26, %c0_27, %c64] : memref<2x64x768xf32, #tpu.memory_space<vmem>>, vector<2x64x64xf32>
    %c0_28 = arith.constant 0 : index
    %c0_29 = arith.constant 0 : index
    %c320 = arith.constant 320 : index
    %30 = vector.load %arg7[%c0_28, %c0_29, %c320] : memref<2x64x768xf32, #tpu.memory_space<vmem>>, vector<2x64x64xf32>
    %c0_30 = arith.constant 0 : index
    %c0_31 = arith.constant 0 : index
    %c576 = arith.constant 576 : index
    %31 = vector.load %arg7[%c0_30, %c0_31, %c576] : memref<2x64x768xf32, #tpu.memory_space<vmem>>, vector<2x64x64xf32>
    "tpu.trace_start"() <{level = 10 : i32, message = "bqd,bkd->bqk"}> : () -> ()
    %cst_32 = arith.constant dense<0.000000e+00> : vector<2x64x64xf32>
    %32 = tpu.matmul %29, %30, %cst_32 {dimension_numbers = #tpu.dot_dimension_numbers<[2], [2], [1], [1], [0, 0, 0, 1, 1, 1], [0], [0]>} : vector<2x64x64xf32>, vector<2x64x64xf32>, vector<2x64x64xf32> -> vector<2x64x64xf32>
    "tpu.trace_stop"() : () -> ()
    %cst_33 = arith.constant dense<0xFF800000> : vector<2x64xf32>
    %33 = vector.multi_reduction <maximumf>, %32, %cst_33 [2] : vector<2x64x64xf32> to vector<2x64xf32>
    %34 = vector.shape_cast %33 : vector<2x64xf32> to vector<2x64x1xf32>
    %35 = vector.broadcast %34 : vector<2x64x1xf32> to vector<2x64x64xf32>
    %36 = arith.subf %32, %35 : vector<2x64x64xf32>
    %37 = math.exp %36 : vector<2x64x64xf32>
    %cst_34 = arith.constant dense<0.000000e+00> : vector<2x64xf32>
    %38 = vector.multi_reduction <add>, %37, %cst_34 [2] : vector<2x64x64xf32> to vector<2x64xf32>
    %39 = vector.shape_cast %38 : vector<2x64xf32> to vector<2x64x1xf32>
    "tpu.trace_start"() <{level = 10 : i32, message = "bqk,bkd->bqd"}> : () -> ()
    %cst_35 = arith.constant dense<0.000000e+00> : vector<2x64x64xf32>
    %40 = tpu.matmul %37, %31, %cst_35 {dimension_numbers = #tpu.dot_dimension_numbers<[2], [1], [1], [2], [0, 0, 0, 1, 1, 2], [0], [0]>} : vector<2x64x64xf32>, vector<2x64x64xf32>, vector<2x64x64xf32> -> vector<2x64x64xf32>
    "tpu.trace_stop"() : () -> ()
    %41 = tpu.reciprocal %39 {approx = true} : vector<2x64x1xf32> -> vector<2x64x1xf32>
    %42 = vector.broadcast %41 : vector<2x64x1xf32> to vector<2x64x64xf32>
    %43 = arith.mulf %40, %42 : vector<2x64x64xf32>
    %c0_36 = arith.constant 0 : index
    %c0_37 = arith.constant 0 : index
    %c64_38 = arith.constant 64 : index
    %44 = vector.load %arg8[%c0_36, %c0_37, %c64_38] : memref<2x64x256xf32, #tpu.memory_space<vmem>>, vector<2x64x64xf32>
    tpu.vector_store %arg8[%c0_36, %c0_37, %c64_38], %43 {strides = array<i32>} : memref<2x64x256xf32, #tpu.memory_space<vmem>>, vector<2x64x64xf32>,
    %c0_39 = arith.constant 0 : index
    %c0_40 = arith.constant 0 : index
    %c128 = arith.constant 128 : index
    %45 = vector.load %arg7[%c0_39, %c0_40, %c128] : memref<2x64x768xf32, #tpu.memory_space<vmem>>, vector<2x64x64xf32>
    %c0_41 = arith.constant 0 : index
    %c0_42 = arith.constant 0 : index
    %c384 = arith.constant 384 : index
    %46 = vector.load %arg7[%c0_41, %c0_42, %c384] : memref<2x64x768xf32, #tpu.memory_space<vmem>>, vector<2x64x64xf32>
    %c0_43 = arith.constant 0 : index
    %c0_44 = arith.constant 0 : index
    %c640 = arith.constant 640 : index
    %47 = vector.load %arg7[%c0_43, %c0_44, %c640] : memref<2x64x768xf32, #tpu.memory_space<vmem>>, vector<2x64x64xf32>
    "tpu.trace_start"() <{level = 10 : i32, message = "bqd,bkd->bqk"}> : () -> ()
    %cst_45 = arith.constant dense<0.000000e+00> : vector<2x64x64xf32>
    %48 = tpu.matmul %45, %46, %cst_45 {dimension_numbers = #tpu.dot_dimension_numbers<[2], [2], [1], [1], [0, 0, 0, 1, 1, 1], [0], [0]>} : vector<2x64x64xf32>, vector<2x64x64xf32>, vector<2x64x64xf32> -> vector<2x64x64xf32>
    "tpu.trace_stop"() : () -> ()
    %cst_46 = arith.constant dense<0xFF800000> : vector<2x64xf32>
    %49 = vector.multi_reduction <maximumf>, %48, %cst_46 [2] : vector<2x64x64xf32> to vector<2x64xf32>
    %50 = vector.shape_cast %49 : vector<2x64xf32> to vector<2x64x1xf32>
    %51 = vector.broadcast %50 : vector<2x64x1xf32> to vector<2x64x64xf32>
    %52 = arith.subf %48, %51 : vector<2x64x64xf32>
    %53 = math.exp %52 : vector<2x64x64xf32>
    %cst_47 = arith.constant dense<0.000000e+00> : vector<2x64xf32>
    %54 = vector.multi_reduction <add>, %53, %cst_47 [2] : vector<2x64x64xf32> to vector<2x64xf32>
    %55 = vector.shape_cast %54 : vector<2x64xf32> to vector<2x64x1xf32>
    "tpu.trace_start"() <{level = 10 : i32, message = "bqk,bkd->bqd"}> : () -> ()
    %cst_48 = arith.constant dense<0.000000e+00> : vector<2x64x64xf32>
    %56 = tpu.matmul %53, %47, %cst_48 {dimension_numbers = #tpu.dot_dimension_numbers<[2], [1], [1], [2], [0, 0, 0, 1, 1, 2], [0], [0]>} : vector<2x64x64xf32>, vector<2x64x64xf32>, vector<2x64x64xf32> -> vector<2x64x64xf32>
    "tpu.trace_stop"() : () -> ()
    %57 = tpu.reciprocal %55 {approx = true} : vector<2x64x1xf32> -> vector<2x64x1xf32>
    %58 = vector.broadcast %57 : vector<2x64x1xf32> to vector<2x64x64xf32>
    %59 = arith.mulf %56, %58 : vector<2x64x64xf32>
    %c0_49 = arith.constant 0 : index
    %c0_50 = arith.constant 0 : index
    %c128_51 = arith.constant 128 : index
    %60 = vector.load %arg8[%c0_49, %c0_50, %c128_51] : memref<2x64x256xf32, #tpu.memory_space<vmem>>, vector<2x64x64xf32>
    tpu.vector_store %arg8[%c0_49, %c0_50, %c128_51], %59 {strides = array<i32>} : memref<2x64x256xf32, #tpu.memory_space<vmem>>, vector<2x64x64xf32>,
    %c0_52 = arith.constant 0 : index
    %c0_53 = arith.constant 0 : index
    %c192 = arith.constant 192 : index
    %61 = vector.load %arg7[%c0_52, %c0_53, %c192] : memref<2x64x768xf32, #tpu.memory_space<vmem>>, vector<2x64x64xf32>
    %c0_54 = arith.constant 0 : index
    %c0_55 = arith.constant 0 : index
    %c448 = arith.constant 448 : index
    %62 = vector.load %arg7[%c0_54, %c0_55, %c448] : memref<2x64x768xf32, #tpu.memory_space<vmem>>, vector<2x64x64xf32>
    %c0_56 = arith.constant 0 : index
    %c0_57 = arith.constant 0 : index
    %c704 = arith.constant 704 : index
    %63 = vector.load %arg7[%c0_56, %c0_57, %c704] : memref<2x64x768xf32, #tpu.memory_space<vmem>>, vector<2x64x64xf32>
    "tpu.trace_start"() <{level = 10 : i32, message = "bqd,bkd->bqk"}> : () -> ()
    %cst_58 = arith.constant dense<0.000000e+00> : vector<2x64x64xf32>
    %64 = tpu.matmul %61, %62, %cst_58 {dimension_numbers = #tpu.dot_dimension_numbers<[2], [2], [1], [1], [0, 0, 0, 1, 1, 1], [0], [0]>} : vector<2x64x64xf32>, vector<2x64x64xf32>, vector<2x64x64xf32> -> vector<2x64x64xf32>
    "tpu.trace_stop"() : () -> ()
    %cst_59 = arith.constant dense<0xFF800000> : vector<2x64xf32>
    %65 = vector.multi_reduction <maximumf>, %64, %cst_59 [2] : vector<2x64x64xf32> to vector<2x64xf32>
    %66 = vector.shape_cast %65 : vector<2x64xf32> to vector<2x64x1xf32>
    %67 = vector.broadcast %66 : vector<2x64x1xf32> to vector<2x64x64xf32>
    %68 = arith.subf %64, %67 : vector<2x64x64xf32>
    %69 = math.exp %68 : vector<2x64x64xf32>
    %cst_60 = arith.constant dense<0.000000e+00> : vector<2x64xf32>
    %70 = vector.multi_reduction <add>, %69, %cst_60 [2] : vector<2x64x64xf32> to vector<2x64xf32>
    %71 = vector.shape_cast %70 : vector<2x64xf32> to vector<2x64x1xf32>
    "tpu.trace_start"() <{level = 10 : i32, message = "bqk,bkd->bqd"}> : () -> ()
    %cst_61 = arith.constant dense<0.000000e+00> : vector<2x64x64xf32>
    %72 = tpu.matmul %69, %63, %cst_61 {dimension_numbers = #tpu.dot_dimension_numbers<[2], [1], [1], [2], [0, 0, 0, 1, 1, 2], [0], [0]>} : vector<2x64x64xf32>, vector<2x64x64xf32>, vector<2x64x64xf32> -> vector<2x64x64xf32>
    "tpu.trace_stop"() : () -> ()
    %73 = tpu.reciprocal %71 {approx = true} : vector<2x64x1xf32> -> vector<2x64x1xf32>
    %74 = vector.broadcast %73 : vector<2x64x1xf32> to vector<2x64x64xf32>
    %75 = arith.mulf %72, %74 : vector<2x64x64xf32>
    %c0_62 = arith.constant 0 : index
    %c0_63 = arith.constant 0 : index
    %c192_64 = arith.constant 192 : index
    %76 = vector.load %arg8[%c0_62, %c0_63, %c192_64] : memref<2x64x256xf32, #tpu.memory_space<vmem>>, vector<2x64x64xf32>
    tpu.vector_store %arg8[%c0_62, %c0_63, %c192_64], %75 {strides = array<i32>} : memref<2x64x256xf32, #tpu.memory_space<vmem>>, vector<2x64x64xf32>,
    %c0_65 = arith.constant 0 : index
    %c0_66 = arith.constant 0 : index
    %c0_67 = arith.constant 0 : index
    %77 = vector.load %arg8[%c0_65, %c0_66, %c0_67] : memref<2x64x256xf32, #tpu.memory_space<vmem>>, vector<2x64x256xf32>
    %78 = vector.shape_cast %77 : vector<2x64x256xf32> to vector<128x256xf32>
    %c0_68 = arith.constant 0 : index
    %c0_69 = arith.constant 0 : index
    %79 = vector.load %arg4[%c0_68, %c0_69] : memref<256x128xf32, #tpu.memory_space<vmem>>, vector<256x128xf32>
    %cst_70 = arith.constant dense<0.000000e+00> : vector<128x128xf32>
    %80 = tpu.matmul %78, %79, %cst_70 {dimension_numbers = #tpu.dot_dimension_numbers<[1], [0], [0], [1], [0, 0, 1, 1], [], []>} : vector<128x256xf32>, vector<256x128xf32>, vector<128x128xf32> -> vector<128x128xf32>
    %c0_71 = arith.constant 0 : index
    %c0_72 = arith.constant 0 : index
    %81 = vector.load %arg5[%c0_71, %c0_72] : memref<1x128xf32, #tpu.memory_space<vmem>>, vector<1x128xf32>
    %82 = vector.broadcast %81 : vector<1x128xf32> to vector<128x128xf32>
    %83 = arith.addf %80, %82 : vector<128x128xf32>
    %84 = vector.shape_cast %83 : vector<128x128xf32> to vector<2x64x128xf32>
    %c0_73 = arith.constant 0 : index
    %c0_74 = arith.constant 0 : index
    %c0_75 = arith.constant 0 : index
    %85 = vector.load %arg6[%c0_73, %c0_74, %c0_75] : memref<2x64x128xf32, #tpu.memory_space<vmem>>, vector<2x64x128xf32>
    tpu.vector_store %arg6[%c0_73, %c0_74, %c0_75], %84 {strides = array<i32>} : memref<2x64x128xf32, #tpu.memory_space<vmem>>, vector<2x64x128xf32>,
    return
  }
  func.func @transform_0(%arg0: i32) -> (i32, i32, i32) {
    %c0_i32 = arith.constant 0 : i32
    %c0_i32_0 = arith.constant 0 : i32
    %c0_i32_1 = arith.constant 0 : i32
    return %arg0, %c0_i32, %c0_i32_0 : i32, i32, i32
  }
  func.func @transform_1(%arg0: i32) -> (i32, i32) {
    %c0_i32 = arith.constant 0 : i32
    %c0_i32_0 = arith.constant 0 : i32
    %c0_i32_1 = arith.constant 0 : i32
    return %c0_i32, %c0_i32_0 : i32, i32
  }
  func.func @transform_2(%arg0: i32) -> (i32, i32) {
    %c0_i32 = arith.constant 0 : i32
    %c0_i32_0 = arith.constant 0 : i32
    %c0_i32_1 = arith.constant 0 : i32
    return %c0_i32, %c0_i32_0 : i32, i32
  }
  func.func @transform_3(%arg0: i32) -> (i32, i32) {
    %c0_i32 = arith.constant 0 : i32
    %c0_i32_0 = arith.constant 0 : i32
    %c0_i32_1 = arith.constant 0 : i32
    return %c0_i32, %c0_i32_0 : i32, i32
  }
  func.func @transform_4(%arg0: i32) -> (i32, i32) {
    %c0_i32 = arith.constant 0 : i32
    %c0_i32_0 = arith.constant 0 : i32
    %c0_i32_1 = arith.constant 0 : i32
    return %c0_i32, %c0_i32_0 : i32, i32
  }
  func.func @transform_5(%arg0: i32) -> (i32, i32, i32) {
    %c0_i32 = arith.constant 0 : i32
    %c0_i32_0 = arith.constant 0 : i32
    %c0_i32_1 = arith.constant 0 : i32
    return %arg0, %c0_i32, %c0_i32_0 : i32, i32, i32
  }
}

</mosaic_0001>

<bundles_post_ra>
// kernel: tile.9
= control target key start
LH: loop header
LB: loop body
LE: loop exit
PB: predicated region body
PF: predicated region fallthrough
CT: control target
= control target key end

     0   :  { %vm644_vm0 = vcmask 1047556   ;;  %s389_s9 = smov 3  ;;  %s383_s12 = smov 3  ;;  %vm260_vm1 = vcmask 523264   ;;  %vm648_vm2 = vcmask 1048064   ;;  %s1512_s0 = inlined_call_operand.vmem [shape: f32[64,4,64], index: 0, kind: input, shape index: {}]   ;;  %s1513_s1 = inlined_call_operand.vmem [shape: f32[64,256], index: 1, kind: output, shape index: {}]  }
   0x1   :  { %v871_v0 = vld [vmem:[%s1512_s0 + $0x1c] sm:$0xf]  ;;  %v872_v1 = vld [vmem:[%s1512_s0 + $0x18] sm:$0xf]  ;;  %v873_v2 = vld [vmem:[%s1512_s0 + $0x14] sm:$0xf] }
   0x2   :  { %231 = vst [vmem:[#allocation0 + $0x38] sm:$0xf] %v871_v0  ;;  %v874_v3 = vld [vmem:[%s1512_s0 + $0x10] sm:$0xf]  ;;  %v875_v4 = vld [vmem:[%s1512_s0 + $0xc] sm:$0xf] }
   0x3   :  { %235 = vst [vmem:[#allocation0 + $0x30] sm:$0xf] %v872_v1  ;;  %v876_v5 = vld [vmem:[%s1512_s0 + $0x8] sm:$0xf]  ;;  %v877_v6 = vld [vmem:[%s1512_s0 + $0x4] sm:$0xf] }
   0x4   :  { %239 = vst [vmem:[#allocation0 + $0x28] sm:$0xf] %v873_v2  ;;  %v256_v7 = vld [vmem:[%s1512_s0] sm:$0xf]  ;;  %v855_v8 = vld [vmem:[%s1512_s0 + $0x5c] sm:$0xf] }
   0x5   :  { %243 = vst [vmem:[#allocation0 + $0x20] sm:$0xf] %v874_v3  ;;  %v856_v9 = vld [vmem:[%s1512_s0 + $0x58] sm:$0xf]  ;;  %v857_v10 = vld [vmem:[%s1512_s0 + $0x54] sm:$0xf] }
   0x6   :  { %247 = vst [vmem:[#allocation0 + $0x18] sm:$0xf] %v875_v4  ;;  %v858_v11 = vld [vmem:[%s1512_s0 + $0x50] sm:$0xf]  ;;  %v859_v12 = vld [vmem:[%s1512_s0 + $0x4c] sm:$0xf] }
   0x7   :  { %251 = vst [vmem:[#allocation0 + $0x10] sm:$0xf] %v876_v5  ;;  %v860_v13 = vld [vmem:[%s1512_s0 + $0x48] sm:$0xf]  ;;  %v861_v14 = vld [vmem:[%s1512_s0 + $0x44] sm:$0xf] }
   0x8   :  { %255 = vst [vmem:[#allocation0 + $0x8] sm:$0xf] %v877_v6  ;;  %v862_v15 = vld [vmem:[%s1512_s0 + $0x40] sm:$0xf]  ;;  %v839_v17 = vld [vmem:[%s1512_s0 + $0x9c] sm:$0xf] }
   0x9   :  { %257 = vst [vmem:[#allocation0] sm:$0xf] %v256_v7  ;;  %s377_s13 = smov 3  ;;  %s957_s14 = smov 64   ;;  %v840_v24 = vld [vmem:[%s1512_s0 + $0x98] sm:$0xf] }
   0xa   :  { %167 = vst [vmem:[#allocation0 + $0xb8] sm:$0xf] %v855_v8  ;;  %s371_s15 = smov 3  ;;  %s365_s16 = smov 3  ;;  %v841_v26 = vld [vmem:[%s1512_s0 + $0x94] sm:$0xf] }
   0xb   :  { %171 = vst [vmem:[#allocation0 + $0xb0] sm:$0xf] %v856_v9  ;;  %s359_s19 = smov 3  ;;  %s353_s22 = smov 3  ;;  %v842_v28 = vld [vmem:[%s1512_s0 + $0x90] sm:$0xf] }
   0xc   :  { %175 = vst [vmem:[#allocation0 + $0xa8] sm:$0xf] %v857_v10  ;;  %v643_v16 = vld [vmem:[#allocation0 + $0x1] ss:$8 sm:$0xf0]   ;;  %s479_s21 = smov 3 }
   0xd   :  { %179 = vst [vmem:[#allocation0 + $0xa0] sm:$0xf] %v858_v11  ;;  %v843_v30 = vld [vmem:[%s1512_s0 + $0x8c] sm:$0xf]  ;;  %v844_v34 = vld [vmem:[%s1512_s0 + $0x88] sm:$0xf] }
   0xe   :  { %183 = vst [vmem:[#allocation0 + $0x98] sm:$0xf] %v859_v12  ;;  %v845_v35 = vld [vmem:[%s1512_s0 + $0x84] sm:$0xf]  ;;  %v846_v36 = vld [vmem:[%s1512_s0 + $0x80] sm:$0xf] }
   0xf   :  { %187 = vst [vmem:[#allocation0 + $0x90] sm:$0xf] %v860_v13  ;;  %v847_v37 = vld [vmem:[%s1512_s0 + $0x7c] sm:$0xf]  ;;  %v838_v38 = vld [vmem:[%s1512_s0 + $0xa0] sm:$0xf] }
  0x10   :  { %v641_v18 = vld [vmem:[#allocation0 + $0x1] ss:$8 sm:$0xf]   ;;  %191 = vst [vmem:[#allocation0 + $0x88] sm:$0xf] %v861_v14  ;;  %s473_s24 = smov 3 }
  0x11   :  { %v645_v19 = vsel %vm644_vm0, %v643_v16, %v641_v18  ;;  %195 = vst [vmem:[#allocation0 + $0x80] sm:$0xf] %v862_v15  ;;  %s467_s25 = smov 3  ;;  %s461_s26 = smov 3  ;;  %v823_v47 = vld [vmem:[%s1512_s0 + $0xdc] sm:$0xf] }
  0x12   :  { %646 = vrot.lane.b32.xlu0 %v645_v19, %s957_s14  ;;  %v390_v20 = vld [vmem:[#allocation0 + $0xb0] ss:$2 sm:%s389_s9]   ;;  %103 = vst [vmem:[#allocation0 + $0x138] sm:$0xf] %v839_v17  ;;  %s485_s27 = smov 3  ;;  %s455_s28 = smov 3 }
  0x13   :  { %v384_v21 = vld [vmem:[#allocation0 + $0xa8] ss:$2 sm:%s383_s12]   ;;  %899 = vst.msk [vmem:[%s1513_s1 + $0x26] ss:$8 sm:$0x3] %vm260_vm1, %v390_v20   ;;  %s449_s2 = smov 3 }
  0x14   :  { %v378_v22 = vld [vmem:[#allocation0 + $0xa0] ss:$2 sm:%s377_s13]   ;;  %898 = vst.msk [vmem:[%s1513_s1 + $0x25] ss:$8 sm:$0x3] %vm260_vm1, %v384_v21   ;;  %s443_s5 = smov 3 }
  0x15   :  { %v372_v23 = vld [vmem:[#allocation0 + $0x98] ss:$2 sm:%s371_s15]   ;;  %897 = vst.msk [vmem:[%s1513_s1 + $0x24] ss:$8 sm:$0x3] %vm260_vm1, %v378_v22   ;;  %s491_s15 = smov 3 }
  0x16   :  { %v366_v25 = vld [vmem:[#allocation0 + $0x90] ss:$2 sm:%s365_s16]   ;;  %896 = vst.msk [vmem:[%s1513_s1 + $0x23] ss:$8 sm:$0x3] %vm260_vm1, %v372_v23   ;;  %s581_s9 = smov 3 }
  0x17   :  { %v360_v27 = vld [vmem:[#allocation0 + $0x88] ss:$2 sm:%s359_s19]   ;;  %895 = vst.msk [vmem:[%s1513_s1 + $0x22] ss:$8 sm:$0x3] %vm260_vm1, %v366_v25   ;;  %s575_s12 = smov 3 }
  0x18   :  { %v354_v29 = vld [vmem:[#allocation0 + $0x80] ss:$2 sm:%s353_s22]   ;;  %894 = vst.msk [vmem:[%s1513_s1 + $0x21] ss:$8 sm:$0x3] %vm260_vm1, %v360_v27   ;;  %s569_s13 = smov 3 }
  0x19   :  { %893 = vst.msk [vmem:[%s1513_s1 + $0x20] ss:$8 sm:$0x3] %vm260_vm1, %v354_v29   ;;  %v651_v31 = vld [vmem:[#allocation0 + $0x81] ss:$8 sm:$0xf]  }
  0x1a   :  { %v653_v32 = vld [vmem:[#allocation0 + $0x81] ss:$8 sm:$0xf0]   ;;  %107 = vst [vmem:[#allocation0 + $0x130] sm:$0xf] %v840_v24  ;;  %s557_s16 = smov 3 }
  0x1b   :  { %v655_v33 = vsel %vm644_vm0, %v653_v32, %v651_v31  ;;  %111 = vst [vmem:[#allocation0 + $0x128] sm:$0xf] %v841_v26  ;;  %v824_v49 = vld [vmem:[%s1512_s0 + $0xd8] sm:$0xf]  ;;  %v825_v51 = vld [vmem:[%s1512_s0 + $0xd4] sm:$0xf] }
  0x1c   :  { %656 = vrot.lane.b32.xlu0 %v655_v33, %s957_s14  ;;  %115 = vst [vmem:[#allocation0 + $0x120] sm:$0xf] %v842_v28  ;;  %v826_v57 = vld [vmem:[%s1512_s0 + $0xd0] sm:$0xf]  ;;  %v827_v58 = vld [vmem:[%s1512_s0 + $0xcc] sm:$0xf] }
  0x1d   :  { %119 = vst [vmem:[#allocation0 + $0x118] sm:$0xf] %v843_v30  ;;  %v828_v59 = vld [vmem:[%s1512_s0 + $0xc8] sm:$0xf]  ;;  %v829_v60 = vld [vmem:[%s1512_s0 + $0xc4] sm:$0xf] }
  0x1e   :  { %123 = vst [vmem:[#allocation0 + $0x110] sm:$0xf] %v844_v34  ;;  %v830_v61 = vld [vmem:[%s1512_s0 + $0xc0] sm:$0xf]  ;;  %s551_s19 = smov 3  ;;  %s545_s22 = smov 3 }
  0x1f   :  { %127 = vst [vmem:[#allocation0 + $0x108] sm:$0xf] %v845_v35  ;;  %v822_v62 = vld [vmem:[%s1512_s0 + $0xe0] sm:$0xf]  ;;  %s587_s29 = smov 3  ;;  %s347_s3 = smov 3 }
  0x20   :  { %131 = vst [vmem:[#allocation0 + $0x100] sm:$0xf] %v846_v36  ;;  %v684_v63 = vld [vmem:[#allocation0 + $0x3] ss:$8 sm:$0xf]   ;;  %s341_s4 = smov 3 }
  0x21   :  { %135 = vst [vmem:[#allocation0 + $0xf8] sm:$0xf] %v847_v37  ;;  %v486_v43 = vld [vmem:[#allocation0 + $0x130] ss:$2 sm:%s485_s27]   ;;  %v851_v16 = vld [vmem:[%s1512_s0 + $0x6c] sm:$0xf] }
  0x22   :  { %v480_v39 = vld [vmem:[#allocation0 + $0x128] ss:$2 sm:%s479_s21]   ;;  %99 = vst [vmem:[#allocation0 + $0x140] sm:$0xf] %v838_v38  ;;  %v848_v8 = vld [vmem:[%s1512_s0 + $0x78] sm:$0xf] }
  0x23   :  { %v474_v40 = vld [vmem:[#allocation0 + $0x120] ss:$2 sm:%s473_s24]   ;;  %914 = vst.msk [vmem:[%s1513_s1 + $0x45] ss:$8 sm:$0x3] %vm260_vm1, %v480_v39   ;;  %s263_s21 = smov 3 }
  0x24   :  { %v468_v41 = vld [vmem:[#allocation0 + $0x118] ss:$2 sm:%s467_s25]   ;;  %913 = vst.msk [vmem:[%s1513_s1 + $0x44] ss:$8 sm:$0x3] %vm260_vm1, %v474_v40   ;;  %s275_s25 = smov 3 }
  0x25   :  { %v462_v42 = vld [vmem:[#allocation0 + $0x110] ss:$2 sm:%s461_s26]   ;;  %912 = vst.msk [vmem:[%s1513_s1 + $0x43] ss:$8 sm:$0x3] %vm260_vm1, %v468_v41   ;;  %s281_s26 = smov 3 }
  0x26   :  { %v456_v44 = vld [vmem:[#allocation0 + $0x108] ss:$2 sm:%s455_s28]   ;;  %911 = vst.msk [vmem:[%s1513_s1 + $0x42] ss:$8 sm:$0x3] %vm260_vm1, %v462_v42   ;;  %s287_s27 = smov 3 }
  0x27   :  { %v450_v45 = vld [vmem:[#allocation0 + $0x100] ss:$2 sm:%s449_s2]   ;;  %910 = vst.msk [vmem:[%s1513_s1 + $0x41] ss:$8 sm:$0x3] %vm260_vm1, %v456_v44   ;;  %s293_s28 = smov 3 }
  0x28   :  { %v444_v46 = vld [vmem:[#allocation0 + $0xf8] ss:$2 sm:%s443_s5]   ;;  %909 = vst.msk [vmem:[%s1513_s1 + $0x40] ss:$8 sm:$0x3] %vm260_vm1, %v450_v45   ;;  %s335_s7 = smov 3 }
  0x29   :  { %908 = vst.msk [vmem:[%s1513_s1 + $0x37] ss:$8 sm:$0x3] %vm260_vm1, %v444_v46   ;;  %v662_v48 = vld [vmem:[#allocation0 + $0x101] ss:$8 sm:$0xf]  }
  0x2a   :  { %v664_v50 = vld [vmem:[#allocation0 + $0x101] ss:$8 sm:$0xf0]   ;;  %915 = vst.msk [vmem:[%s1513_s1 + $0x46] ss:$8 sm:$0x3] %vm260_vm1, %v486_v43  }
  0x2b   :  { %v666_v52 = vsel %vm644_vm0, %v664_v50, %v662_v48  ;;  %v492_v53 = vld [vmem:[#allocation0 + $0x138] ss:$2 sm:%s491_s15]   ;;  %v706_v54 = vld [vmem:[#allocation0 + $0x103] ss:$8 sm:$0xf]   ;;  %s563_s15 = smov 3 }
  0x2c   :  { %667 = vrot.lane.b32.xlu1 %v666_v52, %s957_s14  ;;  %916 = vst.msk [vmem:[%s1513_s1 + $0x47] ss:$8 sm:$0x3] %vm260_vm1, %v492_v53   ;;  %v708_v55 = vld [vmem:[#allocation0 + $0x103] ss:$8 sm:$0xf0]  }
  0x2d   :  { %v710_v56 = vsel %vm644_vm0, %v708_v55, %v706_v54  ;;  %39 = vst [vmem:[#allocation0 + $0x1b8] sm:$0xf] %v823_v47  ;;  %v686_v0 = vld [vmem:[#allocation0 + $0x3] ss:$8 sm:$0xf0]   ;;  %s329_s8 = smov 3 }
  0x2e   :  { %711 = vrot.lane.b32.xlu0 %v710_v56, %s957_s14  ;;  %43 = vst [vmem:[#allocation0 + $0x1b0] sm:$0xf] %v824_v49  ;;  %v688_v2 = vsel %vm644_vm0, %v686_v0, %v684_v63  ;;  %v849_v10 = vld [vmem:[%s1512_s0 + $0x74] sm:$0xf]  ;;  %v850_v12 = vld [vmem:[%s1512_s0 + $0x70] sm:$0xf] }
  0x2f   :  { %47 = vst [vmem:[#allocation0 + $0x1a8] sm:$0xf] %v825_v51  ;;  %689 = vrot.lane.b32.xlu2 %v688_v2, %s957_s14  ;;  %v852_v17 = vld [vmem:[%s1512_s0 + $0x68] sm:$0xf]  ;;  %v853_v18 = vld [vmem:[%s1512_s0 + $0x64] sm:$0xf] }
  0x30   :  { %51 = vst [vmem:[#allocation0 + $0x1a0] sm:$0xf] %v826_v57  ;;  %v854_v21 = vld [vmem:[%s1512_s0 + $0x60] sm:$0xf]  ;;  %v264_v24 = vld [vmem:[#allocation0 + $0x8] ss:$2 sm:%s263_s21]  }
  0x31   :  { %55 = vst [vmem:[#allocation0 + $0x198] sm:$0xf] %v827_v58  ;;  %v276_v26 = vld [vmem:[#allocation0 + $0x18] ss:$2 sm:%s275_s25]   ;;  %v288_v28 = vld [vmem:[#allocation0 + $0x28] ss:$2 sm:%s287_s27]  }
  0x32   :  { %59 = vst [vmem:[#allocation0 + $0x190] sm:$0xf] %v828_v59  ;;  %v282_v27 = vld [vmem:[#allocation0 + $0x20] ss:$2 sm:%s281_s26]   ;;  %v294_v30 = vld [vmem:[#allocation0 + $0x30] ss:$2 sm:%s293_s28]  }
  0x33   :  { %63 = vst [vmem:[#allocation0 + $0x188] sm:$0xf] %v829_v60  ;;  %v870_v29 = vld [vmem:[%s1512_s0 + $0x20] sm:$0xf]  ;;  %v863_v31 = vld [vmem:[%s1512_s0 + $0x3c] sm:$0xf] }
  0x34   :  { %67 = vst [vmem:[#allocation0 + $0x180] sm:$0xf] %v830_v61  ;;  %v864_v33 = vld [vmem:[%s1512_s0 + $0x38] sm:$0xf]  ;;  %v865_v34 = vld [vmem:[%s1512_s0 + $0x34] sm:$0xf] }
  0x35   :  { %35 = vst [vmem:[#allocation0 + $0x1c0] sm:$0xf] %v822_v62  ;;  %v582_v1 = vld [vmem:[#allocation0 + $0x1b0] ss:$2 sm:%s581_s9]   ;;  %v867_v40 = vld [vmem:[%s1512_s0 + $0x2c] sm:$0xf] }
  0x36   :  { %v576_v3 = vld [vmem:[#allocation0 + $0x1a8] ss:$2 sm:%s575_s12]   ;;  %931 = vst.msk [vmem:[%s1513_s1 + $0x66] ss:$8 sm:$0x3] %vm260_vm1, %v582_v1   ;;  %s299_s27 = smov 3 }
  0x37   :  { %v570_v4 = vld [vmem:[#allocation0 + $0x1a0] ss:$2 sm:%s569_s13]   ;;  %930 = vst.msk [vmem:[%s1513_s1 + $0x65] ss:$8 sm:$0x3] %vm260_vm1, %v576_v3   ;;  %s323_s9 = smov 3 }
  0x38   :  { %v564_v5 = vld [vmem:[#allocation0 + $0x198] ss:$2 sm:%s563_s15]   ;;  %929 = vst.msk [vmem:[%s1513_s1 + $0x64] ss:$8 sm:$0x3] %vm260_vm1, %v570_v4   ;;  %s317_s12 = smov 3 }
  0x39   :  { %v558_v6 = vld [vmem:[#allocation0 + $0x190] ss:$2 sm:%s557_s16]   ;;  %928 = vst.msk [vmem:[%s1513_s1 + $0x63] ss:$8 sm:$0x3] %vm260_vm1, %v564_v5   ;;  %s258_s16 = smov 3 }
  0x3a   :  { %v552_v7 = vld [vmem:[#allocation0 + $0x188] ss:$2 sm:%s551_s19]   ;;  %927 = vst.msk [vmem:[%s1513_s1 + $0x62] ss:$8 sm:$0x3] %vm260_vm1, %v558_v6   ;;  %s305_s18 = smov 3 }
  0x3b   :  { %v546_v9 = vld [vmem:[#allocation0 + $0x180] ss:$2 sm:%s545_s22]   ;;  %926 = vst.msk [vmem:[%s1513_s1 + $0x61] ss:$8 sm:$0x3] %vm260_vm1, %v552_v7   ;;  %s269_s22 = smov 3 }
  0x3c   :  { %925 = vst.msk [vmem:[%s1513_s1 + $0x60] ss:$8 sm:$0x3] %vm260_vm1, %v546_v9   ;;  %v673_v11 = vld [vmem:[#allocation0 + $0x181] ss:$8 sm:$0xf]  }
  0x3d   :  { %v675_v13 = vld [vmem:[#allocation0 + $0x181] ss:$8 sm:$0xf0]   ;;  %v588_v14 = vld [vmem:[#allocation0 + $0x1b8] ss:$2 sm:%s587_s29]   ;;  %s311_s21 = smov 3 }
  0x3e   :  { %v677_v15 = vsel %vm644_vm0, %v675_v13, %v673_v11  ;;  %932 = vst.msk [vmem:[%s1513_s1 + $0x67] ss:$8 sm:$0x3] %vm260_vm1, %v588_v14   ;;  %v717_v19 = vld [vmem:[#allocation0 + $0x183] ss:$8 sm:$0xf]  }
  0x3f   :  { %678 = vrot.lane.b32.xlu1 %v677_v15, %s957_s14  ;;  %139 = vst [vmem:[#allocation0 + $0xf0] sm:$0xf] %v848_v8  ;;  %v719_v20 = vld [vmem:[#allocation0 + $0x183] ss:$8 sm:$0xf0]   ;;  %s395_s28 = smov 3 }
  0x40   :  { %143 = vst [vmem:[#allocation0 + $0xe8] sm:$0xf] %v849_v10  ;;  %v259_v22 = vld [vmem:[#allocation0] ss:$2 sm:%s258_s16]   ;;  %v721_v23 = vsel %vm644_vm0, %v719_v20, %v717_v19  ;;  %v270_v25 = vld [vmem:[#allocation0 + $0x10] ss:$2 sm:%s269_s22]  }
  0x41   :  { %147 = vst [vmem:[#allocation0 + $0xe0] sm:$0xf] %v850_v12  ;;  %v866_v36 = vld [vmem:[%s1512_s0 + $0x30] sm:$0xf]  ;;  %v868_v42 = vld [vmem:[%s1512_s0 + $0x28] sm:$0xf] }
  0x42   :  { %151 = vst [vmem:[#allocation0 + $0xd8] sm:$0xf] %v851_v16  ;;  %v695_v38 = vld [vmem:[#allocation0 + $0x83] ss:$8 sm:$0xf]   ;;  %s401_s15 = smov 3 }
  0x43   :  { %155 = vst [vmem:[#allocation0 + $0xd0] sm:$0xf] %v852_v17  ;;  %v697_v39 = vld [vmem:[#allocation0 + $0x83] ss:$8 sm:$0xf0]   ;;  %s407_s16 = smov 3 }
  0x44   :  { %159 = vst [vmem:[#allocation0 + $0xc8] sm:$0xf] %v853_v18  ;;  %v699_v41 = vsel %vm644_vm0, %v697_v39, %v695_v38  ;;  %v869_v43 = vld [vmem:[%s1512_s0 + $0x24] sm:$0xf]  ;;  %v831_v48 = vld [vmem:[%s1512_s0 + $0xbc] sm:$0xf] }
  0x45   :  { %163 = vst [vmem:[#allocation0 + $0xc0] sm:$0xf] %v854_v21  ;;  %700 = vrot.lane.b32.xlu2 %v699_v41, %s957_s14  ;;  %v832_v52 = vld [vmem:[%s1512_s0 + $0xb8] sm:$0xf]  ;;  %v833_v54 = vld [vmem:[%s1512_s0 + $0xb4] sm:$0xf] }
  0x46   :  { %261 = vst.msk [vmem:[%s1513_s1] ss:$8 sm:$0x3] %vm260_vm1, %v259_v22   ;;  %v834_v57 = vld [vmem:[%s1512_s0 + $0xb0] sm:$0xf]  ;;  %s413_s19 = smov 3 }
  0x47   :  { %722 = vrot.lane.b32.xlu1 %v721_v23, %s957_s14  ;;  %878 = vst.msk [vmem:[%s1513_s1 + $0x1] ss:$8 sm:$0x3] %vm260_vm1, %v264_v24   ;;  %v835_v60 = vld [vmem:[%s1512_s0 + $0xac] sm:$0xf]  ;;  %s419_s20 = smov 3 }
  0x48   :  { %879 = vst.msk [vmem:[%s1513_s1 + $0x2] ss:$8 sm:$0x3] %vm260_vm1, %v270_v25   ;;  %v741_v32 = vld [vmem:[#allocation0 + $0xc1] ss:$8 sm:$0xf0]  }
  0x49   :  { %880 = vst.msk [vmem:[%s1513_s1 + $0x3] ss:$8 sm:$0x3] %vm260_vm1, %v276_v26   ;;  %v836_v61 = vld [vmem:[%s1512_s0 + $0xa8] sm:$0xf]  ;;  %s431_s22 = smov 3 }
  0x4a   :  { %881 = vst.msk [vmem:[%s1513_s1 + $0x4] ss:$8 sm:$0x3] %vm260_vm1, %v282_v27   ;;  %v837_v62 = vld [vmem:[%s1512_s0 + $0xa4] sm:$0xf]  ;;  %s437_s25 = smov 3 }
  0x4b   :  { %882 = vst.msk [vmem:[%s1513_s1 + $0x5] ss:$8 sm:$0x3] %vm260_vm1, %v288_v28   ;;  %v408_v4 = vld [vmem:[#allocation0 + $0xc8] ss:$2 sm:%s407_s16]   ;;  %s599_s29 = smov 3 }
  0x4c   :  { %v739_v35 = vld [vmem:[#allocation0 + $0xc1] ss:$8 sm:$0xf]   ;;  %227 = vst [vmem:[#allocation0 + $0x40] sm:$0xf] %v870_v29  ;;  %s605_s30 = smov 3 }
  0x4d   :  { %v743_v37 = vsel %vm644_vm0, %v741_v32, %v739_v35  ;;  %883 = vst.msk [vmem:[%s1513_s1 + $0x6] ss:$8 sm:$0x3] %vm260_vm1, %v294_v30   ;;  %v396_v63 = vld [vmem:[#allocation0 + $0xb8] ss:$2 sm:%s395_s28]   ;;  %s629_s28 = smov 3 }
  0x4e   :  { %744 = vrot.lane.b32.xlu0 %v743_v37, %s957_s14  ;;  %199 = vst [vmem:[#allocation0 + $0x78] sm:$0xf] %v863_v31  ;;  %v402_v2 = vld [vmem:[#allocation0 + $0xc0] ss:$2 sm:%s401_s15]   ;;  %v414_v5 = vld [vmem:[#allocation0 + $0xd0] ss:$2 sm:%s413_s19]  }
  0x4f   :  { %203 = vst [vmem:[#allocation0 + $0x70] sm:$0xf] %v864_v33  ;;  %v420_v6 = vld [vmem:[#allocation0 + $0xd8] ss:$2 sm:%s419_s20]   ;;  %v432_v8 = vld [vmem:[#allocation0 + $0xe8] ss:$2 sm:%s431_s22]  }
  0x50   :  { %207 = vst [vmem:[#allocation0 + $0x68] sm:$0xf] %v865_v34  ;;  %v438_v9 = vld [vmem:[#allocation0 + $0xf0] ss:$2 sm:%s437_s25]   ;;  %v819_v19 = vld [vmem:[%s1512_s0 + $0xec] sm:$0xf] }
  0x51   :  { %211 = vst [vmem:[#allocation0 + $0x60] sm:$0xf] %v866_v36  ;;  %v815_v10 = vld [vmem:[%s1512_s0 + $0xfc] sm:$0xf]  ;;  %v816_v12 = vld [vmem:[%s1512_s0 + $0xf8] sm:$0xf] }
  0x52   :  { %215 = vst [vmem:[#allocation0 + $0x58] sm:$0xf] %v867_v40  ;;  %v817_v15 = vld [vmem:[%s1512_s0 + $0xf4] sm:$0xf]  ;;  %v818_v18 = vld [vmem:[%s1512_s0 + $0xf0] sm:$0xf] }
  0x53   :  { %v300_v44 = vld [vmem:[#allocation0 + $0x38] ss:$2 sm:%s299_s27]   ;;  %219 = vst [vmem:[#allocation0 + $0x50] sm:$0xf] %v868_v42  ;;  %s497_s22 = smov 3  ;;  %s593_s27 = smov 3 }
  0x54   :  { %884 = vst.msk [vmem:[%s1513_s1 + $0x7] ss:$8 sm:$0x3] %vm260_vm1, %v300_v44   ;;  %v783_v16 = vld [vmem:[#allocation0 + $0xc3] ss:$8 sm:$0xf]  }
  0x55   :  { %223 = vst [vmem:[#allocation0 + $0x48] sm:$0xf] %v869_v43  ;;  %v348_v45 = vld [vmem:[#allocation0 + $0x78] ss:$2 sm:%s347_s3]   ;;  %v820_v20 = vld [vmem:[%s1512_s0 + $0xe8] sm:$0xf] }
  0x56   :  { %v342_v46 = vld [vmem:[#allocation0 + $0x70] ss:$2 sm:%s341_s4]   ;;  %892 = vst.msk [vmem:[%s1513_s1 + $0x17] ss:$8 sm:$0x3] %vm260_vm1, %v348_v45   ;;  %s617_s2 = smov 3 }
  0x57   :  { %v336_v47 = vld [vmem:[#allocation0 + $0x68] ss:$2 sm:%s335_s7]   ;;  %891 = vst.msk [vmem:[%s1513_s1 + $0x16] ss:$8 sm:$0x3] %vm260_vm1, %v342_v46   ;;  %s611_s5 = smov 3 }
  0x58   :  { %v330_v49 = vld [vmem:[#allocation0 + $0x60] ss:$2 sm:%s329_s8]   ;;  %890 = vst.msk [vmem:[%s1513_s1 + $0x15] ss:$8 sm:$0x3] %vm260_vm1, %v336_v47   ;;  %s623_s8 = smov 3 }
  0x59   :  { %v324_v50 = vld [vmem:[#allocation0 + $0x58] ss:$2 sm:%s323_s9]   ;;  %889 = vst.msk [vmem:[%s1513_s1 + $0x14] ss:$8 sm:$0x3] %vm260_vm1, %v330_v49   ;;  %s503_s11 = smov 3 }
  0x5a   :  { %v318_v51 = vld [vmem:[#allocation0 + $0x50] ss:$2 sm:%s317_s12]   ;;  %888 = vst.msk [vmem:[%s1513_s1 + $0x13] ss:$8 sm:$0x3] %vm260_vm1, %v324_v50   ;;  %s509_s12 = smov 3 }
  0x5b   :  { %887 = vst.msk [vmem:[%s1513_s1 + $0x12] ss:$8 sm:$0x3] %vm260_vm1, %v318_v51   ;;  %v774_v53 = vld [vmem:[#allocation0 + $0x43] ss:$8 sm:$0xf0]  }
  0x5c   :  { %v306_v55 = vld [vmem:[#allocation0 + $0x40] ss:$2 sm:%s305_s18]   ;;  %71 = vst [vmem:[#allocation0 + $0x178] sm:$0xf] %v831_v48  ;;  %s515_s16 = smov 3  ;;  %s521_s19 = smov 3 }
  0x5d   :  { %v312_v56 = vld [vmem:[#allocation0 + $0x48] ss:$2 sm:%s311_s21]   ;;  %885 = vst.msk [vmem:[%s1513_s1 + $0x10] ss:$8 sm:$0x3] %vm260_vm1, %v306_v55   ;;  %s425_s21 = smov 3 }
  0x5e   :  { %v772_v58 = vld [vmem:[#allocation0 + $0x43] ss:$8 sm:$0xf]   ;;  %886 = vst.msk [vmem:[%s1513_s1 + $0x11] ss:$8 sm:$0x3] %vm260_vm1, %v312_v56  }
  0x5f   :  { %v776_v59 = vsel %vm644_vm0, %v774_v53, %v772_v58  ;;  %75 = vst [vmem:[#allocation0 + $0x170] sm:$0xf] %v832_v52  ;;  %v728_v0 = vld [vmem:[#allocation0 + $0x41] ss:$8 sm:$0xf]   ;;  %s527_s20 = smov 3 }
  0x60   :  { %777 = vrot.lane.b32.xlu0 %v776_v59, %s957_s14  ;;  %79 = vst [vmem:[#allocation0 + $0x168] sm:$0xf] %v833_v54  ;;  %v730_v1 = vld [vmem:[#allocation0 + $0x41] ss:$8 sm:$0xf0]   ;;  %s533_s23 = smov 3 }
  0x61   :  { %83 = vst [vmem:[#allocation0 + $0x160] sm:$0xf] %v834_v57  ;;  %v732_v3 = vsel %vm644_vm0, %v730_v1, %v728_v0  ;;  %v426_v7 = vld [vmem:[#allocation0 + $0xe0] ss:$2 sm:%s425_s21]  }
  0x62   :  { %87 = vst [vmem:[#allocation0 + $0x158] sm:$0xf] %v835_v60  ;;  %733 = vrot.lane.b32.xlu2 %v732_v3, %s957_s14  ;;  %v785_v17 = vld [vmem:[#allocation0 + $0xc3] ss:$8 sm:$0xf0]  }
  0x63   :  { %91 = vst [vmem:[#allocation0 + $0x150] sm:$0xf] %v836_v61  ;;  %v821_v21 = vld [vmem:[%s1512_s0 + $0xe4] sm:$0xf]  ;;  %s635_s0 = smov 3  ;;  %v787_v23 = vsel %vm644_vm0, %v785_v17, %v783_v16 }
  0x64   :  { %95 = vst [vmem:[#allocation0 + $0x148] sm:$0xf] %v837_v62 }
  0x65   :  { %900 = vst.msk [vmem:[%s1513_s1 + $0x27] ss:$8 sm:$0x3] %vm260_vm1, %v396_v63  }
  0x66   :  { %901 = vst.msk [vmem:[%s1513_s1 + $0x30] ss:$8 sm:$0x3] %vm260_vm1, %v402_v2   ;;  %v534_v43 = vld [vmem:[#allocation0 + $0x170] ss:$2 sm:%s533_s23]  }
  0x67   :  { %902 = vst.msk [vmem:[%s1513_s1 + $0x31] ss:$8 sm:$0x3] %vm260_vm1, %v408_v4   ;;  %v528_v41 = vld [vmem:[#allocation0 + $0x168] ss:$2 sm:%s527_s20]  }
  0x68   :  { %903 = vst.msk [vmem:[%s1513_s1 + $0x32] ss:$8 sm:$0x3] %vm260_vm1, %v414_v5   ;;  %v752_v11 = vld [vmem:[#allocation0 + $0x141] ss:$8 sm:$0xf0]  }
  0x69   :  { %904 = vst.msk [vmem:[%s1513_s1 + $0x33] ss:$8 sm:$0x3] %vm260_vm1, %v420_v6   ;;  %v516_v40 = vld [vmem:[#allocation0 + $0x158] ss:$2 sm:%s515_s16]  }
  0x6a   :  { %905 = vst.msk [vmem:[%s1513_s1 + $0x34] ss:$8 sm:$0x3] %vm260_vm1, %v426_v7   ;;  %v510_v36 = vld [vmem:[#allocation0 + $0x150] ss:$2 sm:%s509_s12]  }
  0x6b   :  { %v750_v13 = vld [vmem:[#allocation0 + $0x141] ss:$8 sm:$0xf]   ;;  %906 = vst.msk [vmem:[%s1513_s1 + $0x35] ss:$8 sm:$0x3] %vm260_vm1, %v432_v8  }
  0x6c   :  { %v754_v14 = vsel %vm644_vm0, %v752_v11, %v750_v13  ;;  %907 = vst.msk [vmem:[%s1513_s1 + $0x36] ss:$8 sm:$0x3] %vm260_vm1, %v438_v9   ;;  %v498_v22 = vld [vmem:[#allocation0 + $0x140] ss:$2 sm:%s497_s22]  }
  0x6d   :  { %755 = vrot.lane.b32.xlu1 %v754_v14, %s957_s14  ;;  %7 = vst [vmem:[#allocation0 + $0x1f8] sm:$0xf] %v815_v10  ;;  %v504_v33 = vld [vmem:[#allocation0 + $0x148] ss:$2 sm:%s503_s11]  }
  0x6e   :  { %11 = vst [vmem:[#allocation0 + $0x1f0] sm:$0xf] %v816_v12  ;;  %v522_v42 = vld [vmem:[#allocation0 + $0x160] ss:$2 sm:%s521_s19]  }
  0x6f   :  { %15 = vst [vmem:[#allocation0 + $0x1e8] sm:$0xf] %v817_v15  ;;  %v794_v44 = vld [vmem:[#allocation0 + $0x143] ss:$8 sm:$0xf]  }
  0x70   :  { %19 = vst [vmem:[#allocation0 + $0x1e0] sm:$0xf] %v818_v18  ;;  %v796_v45 = vld [vmem:[#allocation0 + $0x143] ss:$8 sm:$0xf0]  }
  0x71   :  { %23 = vst [vmem:[#allocation0 + $0x1d8] sm:$0xf] %v819_v19  ;;  %v798_v47 = vsel %vm644_vm0, %v796_v45, %v794_v44 }
  0x72   :  { %27 = vst [vmem:[#allocation0 + $0x1d0] sm:$0xf] %v820_v20 }
  0x73   :  { %31 = vst [vmem:[#allocation0 + $0x1c8] sm:$0xf] %v821_v21 }
  0x74   :  { %v636_v24 = vld [vmem:[#allocation0 + $0x1f8] ss:$2 sm:%s635_s0]   ;;  %917 = vst.msk [vmem:[%s1513_s1 + $0x50] ss:$8 sm:$0x3] %vm260_vm1, %v498_v22  }
  0x75   :  { %788 = vrot.lane.b32.xlu1 %v787_v23, %s957_s14  ;;  %v630_v25 = vld [vmem:[#allocation0 + $0x1f0] ss:$2 sm:%s629_s28]   ;;  %940 = vst.msk [vmem:[%s1513_s1 + $0x77] ss:$8 sm:$0x3] %vm260_vm1, %v636_v24  }
  0x76   :  { %939 = vst.msk [vmem:[%s1513_s1 + $0x76] ss:$8 sm:$0x3] %vm260_vm1, %v630_v25   ;;  %v624_v30 = vld [vmem:[#allocation0 + $0x1e8] ss:$2 sm:%s623_s8]  }
  0x77   :  { %v807_v26 = vld [vmem:[#allocation0 + $0x1c3] ss:$8 sm:$0xf0]   ;;  %v618_v27 = vld [vmem:[#allocation0 + $0x1e0] ss:$2 sm:%s617_s2]   ;;  %s539_s2 = smov 3 }
  0x78   :  { %v612_v28 = vld [vmem:[#allocation0 + $0x1d8] ss:$2 sm:%s611_s5]   ;;  %937 = vst.msk [vmem:[%s1513_s1 + $0x74] ss:$8 sm:$0x3] %vm260_vm1, %v618_v27  }
  0x79   :  { %v606_v29 = vld [vmem:[#allocation0 + $0x1d0] ss:$2 sm:%s605_s30]   ;;  %936 = vst.msk [vmem:[%s1513_s1 + $0x73] ss:$8 sm:$0x3] %vm260_vm1, %v612_v28  }
  0x7a   :  { %v805_v31 = vld [vmem:[#allocation0 + $0x1c3] ss:$8 sm:$0xf]   ;;  %v594_v32 = vld [vmem:[#allocation0 + $0x1c0] ss:$2 sm:%s593_s27]  }
  0x7b   :  { %v809_v34 = vsel %vm644_vm0, %v807_v26, %v805_v31  ;;  %933 = vst.msk [vmem:[%s1513_s1 + $0x70] ss:$8 sm:$0x3] %vm260_vm1, %v594_v32   ;;  %v600_v35 = vld [vmem:[#allocation0 + $0x1c8] ss:$2 sm:%s599_s29]  }
  0x7c   :  { %810 = vrot.lane.b32.xlu0 %v809_v34, %s957_s14  ;;  %934 = vst.msk [vmem:[%s1513_s1 + $0x71] ss:$8 sm:$0x3] %vm260_vm1, %v600_v35   ;;  %v761_v37 = vld [vmem:[#allocation0 + $0x1c1] ss:$8 sm:$0xf]  }
  0x7d   :  { %935 = vst.msk [vmem:[%s1513_s1 + $0x72] ss:$8 sm:$0x3] %vm260_vm1, %v606_v29   ;;  %v763_v38 = vld [vmem:[#allocation0 + $0x1c1] ss:$8 sm:$0xf0]  }
  0x7e   :  { %938 = vst.msk [vmem:[%s1513_s1 + $0x75] ss:$8 sm:$0x3] %vm260_vm1, %v624_v30   ;;  %v765_v39 = vsel %vm644_vm0, %v763_v38, %v761_v37  ;;  %v540_v46 = vld [vmem:[#allocation0 + $0x178] ss:$2 sm:%s539_s2]  }
  0x7f   :  { %766 = vrot.lane.b32.xlu2 %v765_v39, %s957_s14  ;;  %918 = vst.msk [vmem:[%s1513_s1 + $0x51] ss:$8 sm:$0x3] %vm260_vm1, %v504_v33  }
  0x80   :  { %919 = vst.msk [vmem:[%s1513_s1 + $0x52] ss:$8 sm:$0x3] %vm260_vm1, %v510_v36  }
  0x81   :  { %920 = vst.msk [vmem:[%s1513_s1 + $0x53] ss:$8 sm:$0x3] %vm260_vm1, %v516_v40  }
  0x82   :  { %921 = vst.msk [vmem:[%s1513_s1 + $0x54] ss:$8 sm:$0x3] %vm260_vm1, %v522_v42  }
  0x83   :  { %922 = vst.msk [vmem:[%s1513_s1 + $0x55] ss:$8 sm:$0x3] %vm260_vm1, %v528_v41  }
  0x84   :  { %923 = vst.msk [vmem:[%s1513_s1 + $0x56] ss:$8 sm:$0x3] %vm260_vm1, %v534_v43   ;;  %v647_v48 = vpop.permute.xlu0 %646  }
  0x85   :  { %924 = vst.msk [vmem:[%s1513_s1 + $0x57] ss:$8 sm:$0x3] %vm260_vm1, %v540_v46  }
  0x86   :  { %649 = vst.msk [vmem:[%s1513_s1] sm:$0xff] %vm648_vm2, %v647_v48  }
  0x87   :  { %799 = vrot.lane.b32.xlu2 %v798_v47, %s957_s14 }
  0x89   :  { %v690_v50 = vpop.permute.xlu2 %689  }
  0x8a   :  { %944 = vst.msk [vmem:[%s1513_s1 + $0x8] sm:$0xff] %vm648_vm2, %v690_v50  }
  0x8e   :  { %v657_v49 = vpop.permute.xlu0 %656  }
  0x8f   :  { %941 = vst.msk [vmem:[%s1513_s1 + $0x20] sm:$0xff] %vm648_vm2, %v657_v49  }
  0x9e   :  { %v668_v51 = vpop.permute.xlu1 %667  }
  0x9f   :  { %942 = vst.msk [vmem:[%s1513_s1 + $0x40] sm:$0xff] %vm648_vm2, %v668_v51   ;;  %v701_v53 = vpop.permute.xlu2 %700  }
  0xa0   :  { %v712_v52 = vpop.permute.xlu0 %711   ;;  %945 = vst.msk [vmem:[%s1513_s1 + $0x28] sm:$0xff] %vm648_vm2, %v701_v53  }
  0xa1   :  { %946 = vst.msk [vmem:[%s1513_s1 + $0x48] sm:$0xff] %vm648_vm2, %v712_v52  }
  0xb1   :  { %v679_v54 = vpop.permute.xlu1 %678  }
  0xb2   :  { %943 = vst.msk [vmem:[%s1513_s1 + $0x60] sm:$0xff] %vm648_vm2, %v679_v54  }
  0xb9   :  { %v723_v55 = vpop.permute.xlu1 %722  }
  0xba   :  { %947 = vst.msk [vmem:[%s1513_s1 + $0x68] sm:$0xff] %vm648_vm2, %v723_v55  }
  0xbc   :  { %v734_v56 = vpop.permute.xlu2 %733  }
  0xbd   :  { %948 = vst.msk [vmem:[%s1513_s1 + $0x10] sm:$0xff] %vm648_vm2, %v734_v56  }
  0xc0   :  { %v745_v57 = vpop.permute.xlu0 %744  }
  0xc1   :  { %949 = vst.msk [vmem:[%s1513_s1 + $0x30] sm:$0xff] %vm648_vm2, %v745_v57  }
  0xd2   :  { %v778_v58 = vpop.permute.xlu0 %777  }
  0xd3   :  { %952 = vst.msk [vmem:[%s1513_s1 + $0x18] sm:$0xff] %vm648_vm2, %v778_v58  }
  0xd9   :  { %v767_v59 = vpop.permute.xlu2 %766  }
  0xda   :  { %951 = vst.msk [vmem:[%s1513_s1 + $0x70] sm:$0xff] %vm648_vm2, %v767_v59  }
  0xdf   :  { %v756_v60 = vpop.permute.xlu1 %755  }
  0xe0   :  { %950 = vst.msk [vmem:[%s1513_s1 + $0x50] sm:$0xff] %vm648_vm2, %v756_v60  }
  0xe1   :  { %v800_v61 = vpop.permute.xlu2 %799  }
  0xe2   :  { %954 = vst.msk [vmem:[%s1513_s1 + $0x58] sm:$0xff] %vm648_vm2, %v800_v61  }
  0xe7   :  { %v789_v62 = vpop.permute.xlu1 %788  }
  0xe8   :  { %953 = vst.msk [vmem:[%s1513_s1 + $0x38] sm:$0xff] %vm648_vm2, %v789_v62  }
  0xee   :  { %v811_v63 = vpop.permute.xlu0 %810  }
  0xef   :  { %955 = vst.msk [vmem:[%s1513_s1 + $0x78] sm:$0xff] %vm648_vm2, %v811_v63  }

// kernel: self_attention_with_pos_emb.1
= control target key start
LH: loop header
LB: loop body
LE: loop exit
PB: predicated region body
PF: predicated region fallthrough
CT: control target
= control target key end

     0   :  { %s6633_s0 = inlined_call_operand.vmem [shape: f32[2,64,128], index: 0, kind: input, shape index: {}]   ;;  %s6634_s1 = inlined_call_operand.vmem [shape: f32[128,768], index: 1, kind: input, shape index: {}]   ;;  %s6635_s2 = inlined_call_operand.vmem [shape: f32[64,512], index: 2, kind: input, shape index: {}]   ;;  %s6636_s3 = inlined_call_operand.vmem [shape: f32[256,128], index: 3, kind: input, shape index: {}]   ;;  %s6637_s4 = inlined_call_operand.vmem [shape: f32[1,128], index: 4, kind: input, shape index: {}]   ;;  %s6638_s5 = inlined_call_operand.hbm [shape: f32[2,64,128], index: 5, kind: output, shape index: {}]  }
   0x1   :  { %v127_v0 = vld [vmem:[%s6634_s1 + $0x2d0] sm:$0xff]  ;;  %v128_v1 = vld [vmem:[%s6634_s1 + $0x2d8] sm:$0xff]  ;;  %v121_v2 = vld [vmem:[%s6634_s1 + $0x2a0] sm:$0xff] }
   0x2   :  { %3717 = vmatpush.msra.mxu2 %v127_v0  ;;  %198 = vmatpush.msra.mxu1 %v128_v1  ;;  %v122_v3 = vld [vmem:[%s6634_s1 + $0x2a8] sm:$0xff]  ;;  %v115_v4 = vld [vmem:[%s6634_s1 + $0x270] sm:$0xff]  ;;  %v116_v5 = vld [vmem:[%s6634_s1 + $0x278] sm:$0xff] }
   0x3   :  { %3733 = vmatpush.msra.mxu3 %v128_v1  ;;  %133 = vmatpush.msra.mxu0 %v127_v0  ;;  %v109_v6 = vld [vmem:[%s6634_s1 + $0x240] sm:$0xff]  ;;  %v110_v7 = vld [vmem:[%s6634_s1 + $0x248] sm:$0xff]  ;;  %v103_v8 = vld [vmem:[%s6634_s1 + $0x210] sm:$0xff] }
   0x4   :  { %3718 = vmatpush.msra.mxu2 %v121_v2  ;;  %199 = vmatpush.msra.mxu1 %v122_v3  ;;  %v104_v9 = vld [vmem:[%s6634_s1 + $0x218] sm:$0xff]  ;;  %v97_v10 = vld [vmem:[%s6634_s1 + $0x1e0] sm:$0xff]  ;;  %v98_v11 = vld [vmem:[%s6634_s1 + $0x1e8] sm:$0xff] }
   0x5   :  { %3734 = vmatpush.msra.mxu3 %v122_v3  ;;  %134 = vmatpush.msra.mxu0 %v121_v2  ;;  %v91_v12 = vld [vmem:[%s6634_s1 + $0x1b0] sm:$0xff]  ;;  %v92_v13 = vld [vmem:[%s6634_s1 + $0x1b8] sm:$0xff]  ;;  %v85_v14 = vld [vmem:[%s6634_s1 + $0x180] sm:$0xff] }
   0x6   :  { %3719 = vmatpush.msra.mxu2 %v115_v4  ;;  %200 = vmatpush.msra.mxu1 %v116_v5  ;;  %v86_v15 = vld [vmem:[%s6634_s1 + $0x188] sm:$0xff] }
   0x7   :  { %3735 = vmatpush.msra.mxu3 %v116_v5  ;;  %135 = vmatpush.msra.mxu0 %v115_v4 }
   0x8   :  { %3720 = vmatpush.msra.mxu2 %v109_v6  ;;  %201 = vmatpush.msra.mxu1 %v110_v7 }
   0x9   :  { %3736 = vmatpush.msra.mxu3 %v110_v7  ;;  %136 = vmatpush.msra.mxu0 %v109_v6 }
   0xa   :  { %3721 = vmatpush.msra.mxu2 %v103_v8  ;;  %202 = vmatpush.msra.mxu1 %v104_v9 }
   0xb   :  { %3737 = vmatpush.msra.mxu3 %v104_v9  ;;  %137 = vmatpush.msra.mxu0 %v103_v8 }
   0xc   :  { %3722 = vmatpush.msra.mxu2 %v97_v10  ;;  %203 = vmatpush.msra.mxu1 %v98_v11 }
   0xd   :  { %3738 = vmatpush.msra.mxu3 %v98_v11  ;;  %138 = vmatpush.msra.mxu0 %v97_v10 }
   0xe   :  { %10 = vsyncpa [#allocation5], 0  ;;  %3723 = vmatpush.msra.mxu2 %v91_v12  ;;  %204 = vmatpush.msra.mxu1 %v92_v13  ;;  %v79_v16 = vld [vmem:[%s6634_s1 + $0x150] sm:$0xff]  ;;  %v80_v17 = vld [vmem:[%s6634_s1 + $0x158] sm:$0xff]  ;;  %s4116_s13 = smov 64   ;;  %vm763_vm0 = vcmask 523264  }
   0xf   :  { %3739 = vmatpush.msra.mxu3 %v92_v13  ;;  %139 = vmatpush.msra.mxu0 %v91_v12  ;;  %v73_v18 = vld [vmem:[%s6634_s1 + $0x120] sm:$0xff]  ;;  %v74_v19 = vld [vmem:[%s6634_s1 + $0x128] sm:$0xff]  ;;  %v67_v20 = vld [vmem:[%s6634_s1 + $0xf0] sm:$0xff]  ;;  %vm1988_vm1 = vcmask 1048064   ;;  %s3513_s15 = sshll.u32 %s6638_s5, 4  ;;  %s4118_s16 = smov 128   ;;  %s3514_s15 = int_to_ptr.hbm [resolvable:$true] %s3513_s15 }
  0x10   :  { %3724 = vmatpush.msra.mxu2 %v85_v14  ;;  %205 = vmatpush.msra.mxu1 %v86_v15  ;;  %v68_v21 = vld [vmem:[%s6634_s1 + $0xf8] sm:$0xff]  ;;  %v61_v22 = vld [vmem:[%s6634_s1 + $0xc0] sm:$0xff]  ;;  %v62_v23 = vld [vmem:[%s6634_s1 + $0xc8] sm:$0xff]  ;;  %s4119_s17 = smov 8  }
  0x11   :  { %3740 = vmatpush.msra.mxu3 %v86_v15  ;;  %140 = vmatpush.msra.mxu0 %v85_v14  ;;  %v55_v24 = vld [vmem:[%s6634_s1 + $0x90] sm:$0xff]  ;;  %v56_v25 = vld [vmem:[%s6634_s1 + $0x98] sm:$0xff]  ;;  %v49_v26 = vld [vmem:[%s6634_s1 + $0x60] sm:$0xff] }
  0x12   :  { %3725 = vmatpush.msra.mxu2 %v79_v16  ;;  %206 = vmatpush.msra.mxu1 %v80_v17  ;;  %v50_v27 = vld [vmem:[%s6634_s1 + $0x68] sm:$0xff]  ;;  %v43_v28 = vld [vmem:[%s6634_s1 + $0x30] sm:$0xff]  ;;  %v44_v29 = vld [vmem:[%s6634_s1 + $0x38] sm:$0xff] }
  0x13   :  { %3741 = vmatpush.msra.mxu3 %v80_v17  ;;  %141 = vmatpush.msra.mxu0 %v79_v16  ;;  %v37_v30 = vld [vmem:[%s6634_s1] sm:$0xff]  ;;  %v38_v31 = vld [vmem:[%s6634_s1 + $0x8] sm:$0xff]  ;;  %v123_v35 = vld [vmem:[%s6634_s1 + $0x2b0] sm:$0xff] }
  0x14   :  { %3726 = vmatpush.msra.mxu2 %v73_v18  ;;  %207 = vmatpush.msra.mxu1 %v74_v19  ;;  %v4249_v32 = vld [vmem:[%s6633_s0 + $0x40] sm:$0xff]  ;;  %v4272_v37 = vld [vmem:[%s6633_s0 + $0x48] sm:$0xff]  ;;  %v111_v39 = vld [vmem:[%s6634_s1 + $0x250] sm:$0xff] }
  0x15   :  { %3742 = vmatpush.msra.mxu3 %v74_v19  ;;  %142 = vmatpush.msra.mxu0 %v73_v18  ;;  %v4254_v33 = vld [vmem:[%s6633_s0] sm:$0xff]  ;;  %v4277_v38 = vld [vmem:[%s6633_s0 + $0x8] sm:$0xff]  ;;  %v99_v41 = vld [vmem:[%s6634_s1 + $0x1f0] sm:$0xff] }
  0x16   :  { %3727 = vmatpush.msra.mxu2 %v67_v20  ;;  %208 = vmatpush.msra.mxu1 %v68_v21  ;;  %v129_v34 = vld [vmem:[%s6634_s1 + $0x2e0] sm:$0xff]  ;;  %v4298_v43 = vld [vmem:[%s6633_s0 + $0x50] sm:$0xff]  ;;  %v4324_v49 = vld [vmem:[%s6633_s0 + $0x58] sm:$0xff] }
  0x17   :  { %3743 = vmatpush.msra.mxu3 %v68_v21  ;;  %143 = vmatpush.msra.mxu0 %v67_v20  ;;  %v117_v36 = vld [vmem:[%s6634_s1 + $0x280] sm:$0xff]  ;;  %v4303_v44 = vld [vmem:[%s6633_s0 + $0x10] sm:$0xff]  ;;  %v4332_v51 = vld [vmem:[%s6633_s0 + $0x18] sm:$0xff] }
  0x18   :  { %3728 = vmatpush.msra.mxu2 %v61_v22  ;;  %209 = vmatpush.msra.mxu1 %v62_v23  ;;  %v105_v40 = vld [vmem:[%s6634_s1 + $0x220] sm:$0xff]  ;;  %v87_v45 = vld [vmem:[%s6634_s1 + $0x190] sm:$0xff]  ;;  %v130_v53 = vld [vmem:[%s6634_s1 + $0x2e8] sm:$0xff] }
  0x19   :  { %3744 = vmatpush.msra.mxu3 %v62_v23  ;;  %144 = vmatpush.msra.mxu0 %v61_v22  ;;  %v93_v42 = vld [vmem:[%s6634_s1 + $0x1c0] sm:$0xff]  ;;  %v75_v47 = vld [vmem:[%s6634_s1 + $0x130] sm:$0xff]  ;;  %v124_v59 = vld [vmem:[%s6634_s1 + $0x2b8] sm:$0xff] }
  0x1a   :  { %3729 = vmatpush.msra.mxu2 %v55_v24  ;;  %210 = vmatpush.msra.mxu1 %v56_v25  ;;  %v81_v46 = vld [vmem:[%s6634_s1 + $0x160] sm:$0xff]  ;;  %v63_v50 = vld [vmem:[%s6634_s1 + $0xd0] sm:$0xff]  ;;  %v118_v61 = vld [vmem:[%s6634_s1 + $0x288] sm:$0xff] }
  0x1b   :  { %3745 = vmatpush.msra.mxu3 %v56_v25  ;;  %145 = vmatpush.msra.mxu0 %v55_v24  ;;  %v69_v48 = vld [vmem:[%s6634_s1 + $0x100] sm:$0xff]  ;;  %v51_v54 = vld [vmem:[%s6634_s1 + $0x70] sm:$0xff]  ;;  %v112_v63 = vld [vmem:[%s6634_s1 + $0x258] sm:$0xff] }
  0x1c   :  { %3730 = vmatpush.msra.mxu2 %v49_v26  ;;  %211 = vmatpush.msra.mxu1 %v50_v27  ;;  %v57_v52 = vld [vmem:[%s6634_s1 + $0xa0] sm:$0xff]  ;;  %v39_v58 = vld [vmem:[%s6634_s1 + $0x10] sm:$0xff]  ;;  %v106_v1 = vld [vmem:[%s6634_s1 + $0x228] sm:$0xff] }
  0x1d   :  { %3746 = vmatpush.msra.mxu3 %v50_v27  ;;  %146 = vmatpush.msra.mxu0 %v49_v26  ;;  %v45_v55 = vld [vmem:[%s6634_s1 + $0x40] sm:$0xff]  ;;  %v131_v60 = vld [vmem:[%s6634_s1 + $0x2f0] sm:$0xff]  ;;  %v4391_v2 = vld [vmem:[%s6633_s0 + $0x68] sm:$0xff] }
  0x1e   :  { %3731 = vmatpush.msra.mxu2 %v43_v28  ;;  %212 = vmatpush.msra.mxu1 %v44_v29  ;;  %v4353_v56 = vld [vmem:[%s6633_s0 + $0x60] sm:$0xff]  ;;  %v119_v0 = vld [vmem:[%s6634_s1 + $0x290] sm:$0xff]  ;;  %v4396_v3 = vld [vmem:[%s6633_s0 + $0x28] sm:$0xff] }
  0x1f   :  { %3747 = vmatpush.msra.mxu3 %v44_v29  ;;  %147 = vmatpush.msra.mxu0 %v43_v28  ;;  %v4358_v57 = vld [vmem:[%s6633_s0 + $0x20] sm:$0xff]  ;;  %v100_v5 = vld [vmem:[%s6634_s1 + $0x1f8] sm:$0xff]  ;;  %v107_v6 = vld [vmem:[%s6634_s1 + $0x230] sm:$0xff] }
  0x20   :  { %3732 = vmatpush.msra.mxu2 %v37_v30  ;;  %213 = vmatpush.msra.mxu1 %v38_v31  ;;  %v125_v62 = vld [vmem:[%s6634_s1 + $0x2c0] sm:$0xff]  ;;  %v94_v7 = vld [vmem:[%s6634_s1 + $0x1c8] sm:$0xff]  ;;  %v88_v9 = vld [vmem:[%s6634_s1 + $0x198] sm:$0xff] }
  0x21   :  { %173 = vmatmul.f32.vlgmr.msra.gmra.mxu2 %v4249_v32  ;;  %214 = vmatmul.f32.vlgmr.msra.gmra.mxu1 %v4254_v33  ;;  %v113_v4 = vld [vmem:[%s6634_s1 + $0x260] sm:$0xff]  ;;  %v95_v10 = vld [vmem:[%s6634_s1 + $0x1d0] sm:$0xff]  ;;  %v82_v11 = vld [vmem:[%s6634_s1 + $0x168] sm:$0xff] }
  0x22   :  { %3748 = vmatpush.msra.mxu3 %v38_v31  ;;  %148 = vmatpush.msra.mxu0 %v37_v30  ;;  %v101_v8 = vld [vmem:[%s6634_s1 + $0x200] sm:$0xff]  ;;  %v4429_v12 = vld [vmem:[%s6633_s0 + $0x70] sm:$0xff]  ;;  %v76_v15 = vld [vmem:[%s6634_s1 + $0x138] sm:$0xff] }
  0x23   :  { %238 = vmatmul.f32.vlgmr.msra.gmra.mxu3 %v4249_v32  ;;  %149 = vmatmul.f32.vlgmr.msra.gmra.mxu0 %v4254_v33  ;;  %v89_v13 = vld [vmem:[%s6634_s1 + $0x1a0] sm:$0xff]  ;;  %v4437_v14 = vld [vmem:[%s6633_s0 + $0x30] sm:$0xff]  ;;  %v70_v17 = vld [vmem:[%s6634_s1 + $0x108] sm:$0xff] }
  0x24   :  { %263 = vmatpush.msrb.mxu2 %v129_v34  ;;  %328 = vmatpush.msrb.mxu3 %v130_v53  ;;  %v83_v16 = vld [vmem:[%s6634_s1 + $0x170] sm:$0xff]  ;;  %v77_v18 = vld [vmem:[%s6634_s1 + $0x140] sm:$0xff]  ;;  %v64_v19 = vld [vmem:[%s6634_s1 + $0xd8] sm:$0xff] }
  0x25   :  { %393 = vmatpush.msrb.mxu0 %v131_v60  ;;  %v71_v20 = vld [vmem:[%s6634_s1 + $0x110] sm:$0xff]  ;;  %v58_v21 = vld [vmem:[%s6634_s1 + $0xa8] sm:$0xff]  ;;  %v4467_v22 = vld [vmem:[%s6633_s0 + $0x78] sm:$0xff] }
  0x26   :  { %264 = vmatpush.msrb.mxu2 %v123_v35  ;;  %329 = vmatpush.msrb.mxu3 %v124_v59  ;;  %v65_v23 = vld [vmem:[%s6634_s1 + $0xe0] sm:$0xff]  ;;  %v4475_v24 = vld [vmem:[%s6633_s0 + $0x38] sm:$0xff]  ;;  %v59_v26 = vld [vmem:[%s6634_s1 + $0xb0] sm:$0xff] }
  0x27   :  { %394 = vmatpush.msrb.mxu0 %v125_v62  ;;  %v52_v25 = vld [vmem:[%s6634_s1 + $0x78] sm:$0xff]  ;;  %v46_v27 = vld [vmem:[%s6634_s1 + $0x48] sm:$0xff]  ;;  %v53_v28 = vld [vmem:[%s6634_s1 + $0x80] sm:$0xff] }
  0x28   :  { %265 = vmatpush.msrb.mxu2 %v117_v36  ;;  %330 = vmatpush.msrb.mxu3 %v118_v61  ;;  %v40_v29 = vld [vmem:[%s6634_s1 + $0x18] sm:$0xff]  ;;  %v47_v30 = vld [vmem:[%s6634_s1 + $0x50] sm:$0xff]  ;;  %v41_v31 = vld [vmem:[%s6634_s1 + $0x20] sm:$0xff] }
  0x29   :  { %176 = vmatmul.f32.gmra.mxu2 %v4272_v37  ;;  %217 = vmatmul.f32.gmra.mxu1 %v4277_v38  ;;  %v524_v34 = vld [vmem:[%s6635_s2 + $0x8] sm:$0xff]  ;;  %v531_v59 = vld [vmem:[%s6635_s2 + $0x40] sm:$0xff] }
  0x2a   :  { %266 = vmatpush.msrb.mxu2 %v111_v39  ;;  %331 = vmatpush.msrb.mxu3 %v112_v63  ;;  %v523_v39 = vld [vmem:[%s6635_s2] sm:$0xff] }
  0x2b   :  { %152 = vmatmul.f32.gmra.mxu0 %v4277_v38  ;;  %241 = vmatmul.f32.gmra.mxu3 %v4272_v37 }
  0x2c   :  { %267 = vmatpush.msrb.mxu2 %v105_v40  ;;  %395 = vmatpush.msrb.mxu0 %v119_v0  ;;  %v132_v0 = vld [vmem:[%s6634_s1 + $0x2f8] sm:$0xff] }
  0x2d   :  { %332 = vmatpush.msrb.mxu3 %v106_v1  ;;  %458 = vmatpush.msrb.mxu1 %v132_v0  ;;  %v48_v0 = vld [vmem:[%s6634_s1 + $0x58] sm:$0xff] }
  0x2e   :  { %268 = vmatpush.msrb.mxu2 %v99_v41  ;;  %396 = vmatpush.msrb.mxu0 %v113_v4  ;;  %v126_v4 = vld [vmem:[%s6634_s1 + $0x2c8] sm:$0xff] }
  0x2f   :  { %333 = vmatpush.msrb.mxu3 %v100_v5  ;;  %459 = vmatpush.msrb.mxu1 %v126_v4  ;;  %v42_v4 = vld [vmem:[%s6634_s1 + $0x28] sm:$0xff] }
  0x30   :  { %269 = vmatpush.msrb.mxu2 %v93_v42  ;;  %397 = vmatpush.msrb.mxu0 %v107_v6 }
  0x31   :  { %179 = vmatmul.f32.gmra.mxu2 %v4298_v43  ;;  %220 = vmatmul.f32.gmra.mxu1 %v4303_v44 }
  0x32   :  { %270 = vmatpush.msrb.mxu2 %v87_v45  ;;  %334 = vmatpush.msrb.mxu3 %v94_v7  ;;  %v528_v45 = vld [vmem:[%s6635_s2 + $0x28] sm:$0xff]  ;;  %v120_v7 = vld [vmem:[%s6634_s1 + $0x298] sm:$0xff] }
  0x33   :  { %155 = vmatmul.f32.gmra.mxu0 %v4303_v44  ;;  %244 = vmatmul.f32.gmra.mxu3 %v4298_v43 }
  0x34   :  { %271 = vmatpush.msrb.mxu2 %v81_v46  ;;  %398 = vmatpush.msrb.mxu0 %v101_v8  ;;  %v114_v8 = vld [vmem:[%s6634_s1 + $0x268] sm:$0xff] }
  0x35   :  { %335 = vmatpush.msrb.mxu3 %v88_v9  ;;  %460 = vmatpush.msrb.mxu1 %v120_v7 }
  0x36   :  { %272 = vmatpush.msrb.mxu2 %v75_v47  ;;  %399 = vmatpush.msrb.mxu0 %v95_v10 }
  0x37   :  { %336 = vmatpush.msrb.mxu3 %v82_v11  ;;  %461 = vmatpush.msrb.mxu1 %v114_v8 }
  0x38   :  { %273 = vmatpush.msrb.mxu2 %v69_v48  ;;  %400 = vmatpush.msrb.mxu0 %v89_v13 }
  0x39   :  { %182 = vmatmul.f32.gmra.mxu2 %v4324_v49  ;;  %223 = vmatmul.f32.gmra.mxu1 %v4332_v51 }
  0x3a   :  { %274 = vmatpush.msrb.mxu2 %v63_v50  ;;  %337 = vmatpush.msrb.mxu3 %v76_v15  ;;  %v108_v15 = vld [vmem:[%s6634_s1 + $0x238] sm:$0xff] }
  0x3b   :  { %158 = vmatmul.f32.gmra.mxu0 %v4332_v51  ;;  %247 = vmatmul.f32.gmra.mxu3 %v4324_v49 }
  0x3c   :  { %275 = vmatpush.msrb.mxu2 %v57_v52  ;;  %401 = vmatpush.msrb.mxu0 %v83_v16  ;;  %v532_v16 = vld [vmem:[%s6635_s2 + $0x48] sm:$0xff] }
  0x3d   :  { %338 = vmatpush.msrb.mxu3 %v70_v17  ;;  %462 = vmatpush.msrb.mxu1 %v108_v15  ;;  %v102_v17 = vld [vmem:[%s6634_s1 + $0x208] sm:$0xff] }
  0x3e   :  { %276 = vmatpush.msrb.mxu2 %v51_v54  ;;  %402 = vmatpush.msrb.mxu0 %v77_v18  ;;  %v527_v54 = vld [vmem:[%s6635_s2 + $0x20] sm:$0xff] }
  0x3f   :  { %339 = vmatpush.msrb.mxu3 %v64_v19  ;;  %463 = vmatpush.msrb.mxu1 %v102_v17 }
  0x40   :  { %277 = vmatpush.msrb.mxu2 %v45_v55  ;;  %403 = vmatpush.msrb.mxu0 %v71_v20  ;;  %v96_v20 = vld [vmem:[%s6634_s1 + $0x1d8] sm:$0xff] }
  0x41   :  { %185 = vmatmul.f32.gmra.mxu2 %v4353_v56  ;;  %226 = vmatmul.f32.gmra.mxu1 %v4358_v57 }
  0x42   :  { %278 = vmatpush.msrb.mxu2 %v39_v58  ;;  %340 = vmatpush.msrb.mxu3 %v58_v21  ;;  %v90_v21 = vld [vmem:[%s6634_s1 + $0x1a8] sm:$0xff] }
  0x43   :  { %250 = vmatmul.f32.gmra.mxu3 %v4353_v56  ;;  %161 = vmatmul.f32.gmra.mxu0 %v4358_v57 }
  0x44   :  { %404 = vmatpush.msrb.mxu0 %v65_v23  ;;  %341 = vmatpush.msrb.mxu3 %v52_v25 }
  0x45   :  { %464 = vmatpush.msrb.mxu1 %v96_v20 }
  0x46   :  { %405 = vmatpush.msrb.mxu0 %v59_v26  ;;  %342 = vmatpush.msrb.mxu3 %v46_v27 }
  0x47   :  { %465 = vmatpush.msrb.mxu1 %v90_v21  ;;  %v548_v21 = vld [vmem:[%s6635_s2 + $0xc8] sm:$0xff] }
  0x48   :  { %406 = vmatpush.msrb.mxu0 %v53_v28  ;;  %343 = vmatpush.msrb.mxu3 %v40_v29  ;;  %v84_v28 = vld [vmem:[%s6634_s1 + $0x178] sm:$0xff]  ;;  %v535_v29 = vld [vmem:[%s6635_s2 + $0x60] sm:$0xff] }
  0x49   :  { %188 = vmatmul.f32.gmra.mxu2 %v4391_v2  ;;  %229 = vmatmul.f32.gmra.mxu1 %v4396_v3 }
  0x4a   :  { %407 = vmatpush.msrb.mxu0 %v47_v30  ;;  %466 = vmatpush.msrb.mxu1 %v84_v28  ;;  %v78_v30 = vld [vmem:[%s6634_s1 + $0x148] sm:$0xff] }
  0x4b   :  { %253 = vmatmul.f32.gmra.mxu3 %v4391_v2  ;;  %164 = vmatmul.f32.gmra.mxu0 %v4396_v3 }
  0x4c   :  { %408 = vmatpush.msrb.mxu0 %v41_v31  ;;  %467 = vmatpush.msrb.mxu1 %v78_v30 }
  0x51   :  { %191 = vmatmul.f32.gmra.mxu2 %v4429_v12  ;;  %232 = vmatmul.f32.gmra.mxu1 %v4437_v14 }
  0x53   :  { %256 = vmatmul.f32.gmra.mxu3 %v4429_v12  ;;  %167 = vmatmul.f32.gmra.mxu0 %v4437_v14 }
  0x59   :  { %194 = vmatmul.f32.gmra.mxu2 %v4467_v22  ;;  %235 = vmatmul.f32.gmra.mxu1 %v4475_v24 }
  0x5b   :  { %259 = vmatmul.f32.gmra.mxu3 %v4467_v22  ;;  %170 = vmatmul.f32.gmra.mxu0 %v4475_v24 }
  0x61   :  { %279 = vmatmul.f32.vlgmr.msrb.gmra.mxu2 %v4254_v33 }
  0x63   :  { %344 = vmatmul.f32.vlgmr.msrb.gmra.mxu3 %v4254_v33  ;;  %409 = vmatmul.f32.vlgmr.msrb.gmra.mxu0 %v4254_v33 }
  0x69   :  { %282 = vmatmul.f32.gmra.mxu2 %v4277_v38 }
  0x6b   :  { %347 = vmatmul.f32.gmra.mxu3 %v4277_v38  ;;  %412 = vmatmul.f32.gmra.mxu0 %v4277_v38 }
  0x71   :  { %285 = vmatmul.f32.gmra.mxu2 %v4303_v44 }
  0x73   :  { %350 = vmatmul.f32.gmra.mxu3 %v4303_v44  ;;  %415 = vmatmul.f32.gmra.mxu0 %v4303_v44 }
  0x79   :  { %288 = vmatmul.f32.gmra.mxu2 %v4332_v51 }
  0x7b   :  { %353 = vmatmul.f32.gmra.mxu3 %v4332_v51  ;;  %418 = vmatmul.f32.gmra.mxu0 %v4332_v51 }
  0x81   :  { %291 = vmatmul.f32.gmra.mxu2 %v4358_v57 }
  0x83   :  { %356 = vmatmul.f32.gmra.mxu3 %v4358_v57  ;;  %421 = vmatmul.f32.gmra.mxu0 %v4358_v57 }
  0x89   :  { %294 = vmatmul.f32.gmra.mxu2 %v4396_v3 }
  0x8b   :  { %359 = vmatmul.f32.gmra.mxu3 %v4396_v3  ;;  %424 = vmatmul.f32.gmra.mxu0 %v4396_v3 }
  0x91   :  { %297 = vmatmul.f32.gmra.mxu2 %v4437_v14 }
  0x93   :  { %362 = vmatmul.f32.gmra.mxu3 %v4437_v14  ;;  %427 = vmatmul.f32.gmra.mxu0 %v4437_v14 }
  0x99   :  { %300 = vmatmul.f32.gmra.mxu2 %v4475_v24 }
  0x9b   :  { %430 = vmatmul.f32.gmra.mxu0 %v4475_v24  ;;  %365 = vmatmul.f32.gmra.mxu3 %v4475_v24 }
  0x9e   :  { %v215_v35 = vpop.f32.mrf.mxu1 }
  0x9f   :  { %v4529_v36 = vadd.f32 %v524_v34, %v215_v35  ;;  %v540_v35 = vld [vmem:[%s6635_s2 + $0x88] sm:$0xff] }
  0xa0   :  { %v150_v40 = vpop.f32.mrf.mxu0 }
  0xa1   :  { %6679 = vst [vmem:[#allocation7_spill] sm:$0xff] %v4529_v36  ;;  %303 = vmatmul.f32.gmra.mxu2 %v4249_v32  ;;  %2609 = vrot.lane.b32.xlu1 %v4529_v36, %s4116_s13  ;;  %v4537_v41 = vadd.f32 %v523_v39, %v150_v40  ;;  %v72_v40 = vld [vmem:[%s6634_s1 + $0x118] sm:$0xff] }
  0xa2   :  { %468 = vmatpush.msrb.mxu1 %v72_v40 }
  0xa3   :  { %1320 = vrot.lane.b32.xlu0 %v4537_v41, %s4116_s13  ;;  %433 = vmatmul.f32.gmra.mxu0 %v4249_v32 }
  0xa4   :  { %v174_v42 = vpop.f32.mrf.mxu2  ;;  %368 = vmatmul.f32.gmra.mxu3 %v4249_v32 }
  0xa5   :  { %v4546_v46 = vadd.f32 %v523_v39, %v174_v42  ;;  %v66_v42 = vld [vmem:[%s6634_s1 + $0xe8] sm:$0xff] }
  0xa6   :  { %v239_v47 = vpop.f32.mrf.mxu3  ;;  %v218_v48 = vpop.f32.mrf.mxu1  ;;  %469 = vmatpush.msrb.mxu1 %v66_v42 }
  0xa7   :  { %v4548_v50 = vadd.f32 %v528_v45, %v218_v48  ;;  %v4560_v55 = vadd.f32 %v524_v34, %v239_v47  ;;  %v536_v34 = vld [vmem:[%s6635_s2 + $0x68] sm:$0xff] }
  0xa8   :  { %v153_v52 = vpop.f32.mrf.mxu0 }
  0xa9   :  { %6680 = vst [vmem:[#allocation8_spill] sm:$0xff] %v4548_v50  ;;  %306 = vmatmul.f32.gmra.mxu2 %v4272_v37  ;;  %1441 = vrot.lane.b32.xlu1 %v4546_v46, %s4116_s13  ;;  %v4586_v6 = vadd.f32 %v527_v54, %v153_v52 }
  0xaa   :  { %6681 = vst [vmem:[#allocation9_spill] sm:$0xff] %v4560_v55 }
  0xab   :  { %2611 = vrot.lane.b32.xlu0 %v4548_v50, %s4116_s13  ;;  %436 = vmatmul.f32.gmra.mxu0 %v4272_v37 }
  0xac   :  { %v177_v53 = vpop.f32.mrf.mxu2  ;;  %371 = vmatmul.f32.gmra.mxu3 %v4272_v37 }
  0xad   :  { %v4562_v58 = vadd.f32 %v527_v54, %v177_v53  ;;  %v60_v53 = vld [vmem:[%s6634_s1 + $0xb8] sm:$0xff] }
  0xae   :  { %v242_v60 = vpop.f32.mrf.mxu3  ;;  %v221_v61 = vpop.f32.mrf.mxu1  ;;  %470 = vmatpush.msrb.mxu1 %v60_v53 }
  0xaf   :  { %1443 = vrot.lane.b32.xlu2 %v4562_v58, %s4116_s13  ;;  %v4579_v1 = vadd.f32 %v528_v45, %v242_v60  ;;  %v4614_v19 = vadd.f32 %v532_v16, %v221_v61  ;;  %v54_v60 = vld [vmem:[%s6634_s1 + $0x88] sm:$0xff] }
  0xb0   :  { %v156_v62 = vpop.f32.mrf.mxu0  ;;  %471 = vmatpush.msrb.mxu1 %v54_v60 }
  0xb1   :  { %309 = vmatmul.f32.gmra.mxu2 %v4298_v43  ;;  %2730 = vrot.lane.b32.xlu1 %v4560_v55, %s4116_s13  ;;  %v4572_v63 = vadd.f32 %v531_v59, %v156_v62  ;;  %6682 = vst [vmem:[#allocation10_spill] sm:$0xff] %v4579_v1  ;;  %v4889_v55 = vld [vmem:[%s6635_s2 + $0xb8] sm:$0xff] }
  0xb2   :  { %6683 = vst [vmem:[#allocation11_spill] sm:$0xff] %v4614_v19  ;;  %472 = vmatpush.msrb.mxu1 %v48_v0 }
  0xb3   :  { %1324 = vrot.lane.b32.xlu0 %v4572_v63, %s4116_s13  ;;  %439 = vmatmul.f32.gmra.mxu0 %v4298_v43 }
  0xb4   :  { %v180_v5 = vpop.f32.mrf.mxu2  ;;  %374 = vmatmul.f32.gmra.mxu3 %v4298_v43  ;;  %473 = vmatpush.msrb.mxu1 %v42_v4 }
  0xb5   :  { %v4594_v10 = vadd.f32 %v531_v59, %v180_v5  ;;  %v4673_v59 = vld [vmem:[%s6635_s2 + $0xa8] sm:$0xff]  ;;  %474 = vmatmul.f32.vlgmr.msrb.gmra.mxu1 %v4254_v33 }
  0xb6   :  { %v245_v9 = vpop.f32.mrf.mxu3  ;;  %v224_v11 = vpop.f32.mrf.mxu1 }
  0xb7   :  { %2732 = vrot.lane.b32.xlu2 %v4579_v1, %s4116_s13  ;;  %v4622_v25 = vadd.f32 %v532_v16, %v245_v9  ;;  %v4656_v47 = vadd.f32 %v536_v34, %v224_v11  ;;  %v547_v11 = vld [vmem:[%s6635_s2 + $0xc0] sm:$0xff] }
  0xb8   :  { %v159_v13 = vpop.f32.mrf.mxu0  ;;  %v539_v16 = vld [vmem:[%s6635_s2 + $0x80] sm:$0xff] }
  0xb9   :  { %312 = vmatmul.f32.gmra.mxu2 %v4324_v49  ;;  %1322 = vrot.lane.b32.xlu1 %v4586_v6, %s4116_s13  ;;  %6684 = vst [vmem:[#allocation12_spill] sm:$0xff] %v4622_v25  ;;  %v4648_v39 = vadd.f32 %v535_v29, %v159_v13 }
  0xba   :  { %6685 = vst [vmem:[#allocation13_spill] sm:$0xff] %v4656_v47 }
  0xbb   :  { %1445 = vrot.lane.b32.xlu0 %v4594_v10, %s4116_s13  ;;  %442 = vmatmul.f32.gmra.mxu0 %v4324_v49 }
  0xbc   :  { %v183_v18 = vpop.f32.mrf.mxu2  ;;  %377 = vmatmul.f32.gmra.mxu3 %v4324_v49 }
  0xbd   :  { %v4680_v62 = vadd.f32 %v535_v29, %v183_v18  ;;  %477 = vmatmul.f32.gmra.mxu1 %v4277_v38 }
  0xbe   :  { %v248_v23 = vpop.f32.mrf.mxu3  ;;  %v227_v27 = vpop.f32.mrf.mxu1 }
  0xbf   :  { %v4693_v8 = vadd.f32 %v540_v35, %v227_v27  ;;  %v4708_v15 = vadd.f32 %v536_v34, %v248_v23  ;;  %v543_v34 = vld [vmem:[%s6635_s2 + $0xa0] sm:$0xff] }
  0xc0   :  { %v4624_v26 = vpop.f32.mrf.mxu0 }
  0xc1   :  { %315 = vmatmul.f32.gmra.mxu2 %v4353_v56  ;;  %2613 = vrot.lane.b32.xlu1 %v4614_v19, %s4116_s13  ;;  %6688 = vst [vmem:[#allocation16_spill] sm:$0xff] %v4693_v8  ;;  %v4733_v27 = vadd.f32 %v539_v16, %v4624_v26  ;;  %v551_v26 = vld [vmem:[%s6635_s2 + $0xe0] sm:$0xff] }
  0xc2   :  { %6689 = vst [vmem:[#allocation17_spill] sm:$0xff] %v4708_v15 }
  0xc3   :  { %2734 = vrot.lane.b32.xlu0 %v4622_v25, %s4116_s13  ;;  %445 = vmatmul.f32.gmra.mxu0 %v4353_v56 }
  0xc4   :  { %v186_v31 = vpop.f32.mrf.mxu2  ;;  %380 = vmatmul.f32.gmra.mxu3 %v4353_v56 }
  0xc5   :  { %v4715_v18 = vadd.f32 %v539_v16, %v186_v31  ;;  %480 = vmatmul.f32.gmra.mxu1 %v4303_v44  ;;  %v4767_v44 = vld [vmem:[%s6635_s2 + $0x30] sm:$0xff] }
  0xc6   :  { %v251_v45 = vpop.f32.mrf.mxu3  ;;  %v230_v54 = vpop.f32.mrf.mxu1 }
  0xc7   :  { %v4658_v48 = vadd.f32 %v540_v35, %v251_v45  ;;  %v4689_v5 = vadd.f32 %v4673_v59, %v230_v54 }
  0xc8   :  { %v165_v52 = vpop.f32.mrf.mxu0 }
  0xc9   :  { %6686 = vst [vmem:[#allocation14_spill] sm:$0xff] %v4658_v48  ;;  %318 = vmatmul.f32.gmra.mxu2 %v4391_v2  ;;  %1326 = vrot.lane.b32.xlu1 %v4648_v39, %s4116_s13  ;;  %v4756_v40 = vadd.f32 %v543_v34, %v165_v52  ;;  %v4775_v52 = vld [vmem:[%s6635_s2 + $0xe8] sm:$0xff] }
  0xca   :  { %2738 = vrot.lane.b32.xlu2 %v4658_v48, %s4116_s13  ;;  %6687 = vst [vmem:[#allocation15_spill] sm:$0xff] %v4689_v5 }
  0xcb   :  { %2615 = vrot.lane.b32.xlu0 %v4656_v47, %s4116_s13  ;;  %448 = vmatmul.f32.gmra.mxu0 %v4391_v2 }
  0xcc   :  { %v189_v61 = vpop.f32.mrf.mxu2  ;;  %383 = vmatmul.f32.gmra.mxu3 %v4391_v2 }
  0xcd   :  { %483 = vmatmul.f32.gmra.mxu1 %v4332_v51  ;;  %v4777_v0 = vadd.f32 %v543_v34, %v189_v61  ;;  %v4790_v51 = vld [vmem:[%s6635_s2 + $0x38] sm:$0xff] }
  0xce   :  { %v4691_v7 = vpop.f32.mrf.mxu3  ;;  %v233_v31 = vpop.f32.mrf.mxu1  ;;  %v4802_v61 = vld [vmem:[%s6635_s2 + $0x18] sm:$0xff] }
  0xd0   :  { %v168_v9 = vpop.f32.mrf.mxu0 }
  0xd1   :  { %321 = vmatmul.f32.gmra.mxu2 %v4429_v12  ;;  %1447 = vrot.lane.b32.xlu1 %v4680_v62, %s4116_s13  ;;  %v4713_v17 = vadd.f32 %v547_v11, %v168_v9 }
  0xd2   :  { %2619 = vrot.lane.b32.xlu2 %v4689_v5, %s4116_s13 }
  0xd3   :  { %2617 = vrot.lane.b32.xlu0 %v4693_v8, %s4116_s13  ;;  %451 = vmatmul.f32.gmra.mxu0 %v4429_v12 }
  0xd4   :  { %v192_v13 = vpop.f32.mrf.mxu2  ;;  %386 = vmatmul.f32.gmra.mxu3 %v4429_v12 }
  0xd5   :  { %v4739_v38 = vadd.f32 %v547_v11, %v192_v13  ;;  %486 = vmatmul.f32.gmra.mxu1 %v4358_v57  ;;  %v4819_v57 = vld [vmem:[%s6635_s2 + $0x58] sm:$0xff] }
  0xd6   :  { %v257_v33 = vpop.f32.mrf.mxu3  ;;  %v236_v54 = vpop.f32.mrf.mxu1 }
  0xd7   :  { %v4735_v28 = vadd.f32 %v548_v21, %v257_v33  ;;  %v4783_v9 = vadd.f32 %v4775_v52, %v236_v54 }
  0xd8   :  { %v171_v20 = vpop.f32.mrf.mxu0 }
  0xd9   :  { %324 = vmatmul.f32.gmra.mxu2 %v4467_v22  ;;  %2736 = vrot.lane.b32.xlu1 %v4708_v15, %s4116_s13  ;;  %6690 = vst [vmem:[#allocation18_spill] sm:$0xff] %v4735_v28  ;;  %v4758_v42 = vadd.f32 %v551_v26, %v171_v20  ;;  %v4809_v20 = vadd.f32 %v4673_v59, %v4691_v7  ;;  %v4831_v59 = vld [vmem:[%s6635_s2 + $0x50] sm:$0xff] }
  0xda   :  { %1332 = vrot.lane.b32.xlu2 %v4713_v17, %s4116_s13  ;;  %6691 = vst [vmem:[#allocation19_spill] sm:$0xff] %v4783_v9 }
  0xdb   :  { %1449 = vrot.lane.b32.xlu0 %v4715_v18, %s4116_s13  ;;  %454 = vmatmul.f32.gmra.mxu0 %v4467_v22  ;;  %6693 = vst [vmem:[#allocation21_spill] sm:$0xff] %v4809_v20 }
  0xdc   :  { %v4729_v23 = vpop.f32.mrf.mxu2  ;;  %389 = vmatmul.f32.gmra.mxu3 %v4467_v22 }
  0xdd   :  { %489 = vmatmul.f32.gmra.mxu1 %v4396_v3  ;;  %v4865_v48 = vadd.f32 %v551_v26, %v4729_v23  ;;  %v525_v23 = vld [vmem:[%s6635_s2 + $0x10] sm:$0xff] }
  0xde   :  { %v4737_v29 = vpop.f32.mrf.mxu3 }
  0xe0   :  { %v4741_v30 = vpop.f32.mrf.mxu0 }
  0xe1   :  { %1328 = vrot.lane.b32.xlu1 %v4733_v27, %s4116_s13 }
  0xe2   :  { %2742 = vrot.lane.b32.xlu2 %v4735_v28, %s4116_s13 }
  0xe3   :  { %1453 = vrot.lane.b32.xlu0 %v4739_v38, %s4116_s13 }
  0xe4   :  { %v280_v35 = vpop.f32.mrf.mxu2 }
  0xe5   :  { %492 = vmatmul.f32.gmra.mxu1 %v4437_v14  ;;  %v4874_v14 = vld [vmem:[%s6635_s2 + $0xb0] sm:$0xff]  ;;  %v4883_v1 = vadd.f32 %v525_v23, %v280_v35 }
  0xe6   :  { %v345_v45 = vpop.f32.mrf.mxu3 }
  0xe7   :  { %v4812_v34 = vadd.f32 %v4802_v61, %v345_v45 }
  0xe8   :  { %v4760_v53 = vpop.f32.mrf.mxu0 }
  0xe9   :  { %1330 = vrot.lane.b32.xlu1 %v4756_v40, %s4116_s13  ;;  %6694 = vst [vmem:[#allocation22_spill] sm:$0xff] %v4812_v34  ;;  %v3753_v19 = vpack.i.bf16 %v4741_v30, %v4760_v53 }
  0xea   :  { %1334 = vrot.lane.b32.xlu2 %v4758_v42, %s4116_s13 }
  0xec   :  { %v283_v60 = vpop.f32.mrf.mxu2 }
  0xed   :  { %v4780_v4 = vadd.f32 %v4767_v44, %v283_v60  ;;  %495 = vmatmul.f32.gmra.mxu1 %v4475_v24 }
  0xee   :  { %v348_v11 = vpop.f32.mrf.mxu3 }
  0xef   :  { %1346 = vrot.lane.b32.xlu0 %v4780_v4, %s4116_s13  ;;  %v4805_v16 = vadd.f32 %v4790_v51, %v348_v11  ;;  %v4836_v11 = vadd.f32 %v548_v21, %v233_v31  ;;  %v4855_v21 = vld [vmem:[%s6635_s2 + $0x70] sm:$0xff] }
  0xf0   :  { %v4792_v13 = vpop.f32.mrf.mxu0 }
  0xf1   :  { %1451 = vrot.lane.b32.xlu1 %v4777_v0, %s4116_s13  ;;  %6692 = vst [vmem:[#allocation20_spill] sm:$0xff] %v4805_v16 }
  0xf2   :  { %2623 = vrot.lane.b32.xlu2 %v4783_v9, %s4116_s13  ;;  %6696 = vst [vmem:[#allocation24_spill] sm:$0xff] %v4836_v11  ;;  %v4898_v9 = vld [vmem:[%s6635_s2 + $0xd0] sm:$0xff] }
  0xf4   :  { %v286_v33 = vpop.f32.mrf.mxu2 }
  0xf5   :  { %v4839_v28 = vadd.f32 %v4831_v59, %v286_v33  ;;  %498 = vmatmul.f32.gmra.mxu1 %v4249_v32  ;;  %v4919_v32 = vld [vmem:[%s6635_s2 + $0xd8] sm:$0xff] }
  0xf6   :  { %v351_v54 = vpop.f32.mrf.mxu3 }
  0xf7   :  { %2635 = vrot.lane.b32.xlu0 %v4805_v16, %s4116_s13  ;;  %v4834_v7 = vadd.f32 %v4819_v57, %v351_v54 }
  0xf8   :  { %v4823_v60 = vpop.f32.mrf.mxu0 }
  0xf9   :  { %2740 = vrot.lane.b32.xlu1 %v4809_v20, %s4116_s13  ;;  %6695 = vst [vmem:[#allocation23_spill] sm:$0xff] %v4834_v7 }
  0xfa   :  { %2633 = vrot.lane.b32.xlu2 %v4812_v34, %s4116_s13 }
  0xfc   :  { %v289_v45 = vpop.f32.mrf.mxu2 }
  0xfd   :  { %v4860_v33 = vadd.f32 %v4855_v21, %v289_v45  ;;  %501 = vmatmul.f32.gmra.mxu1 %v4272_v37 }
  0xfe   :  { %v4841_v20 = vpop.f32.mrf.mxu3 }
  0xff   :  { %2637 = vrot.lane.b32.xlu0 %v4834_v7, %s4116_s13  ;;  %v3758_v7 = vpack.i.bf16 %v4792_v13, %v4823_v60 }
 0x100   :  { %v4847_v3 = vpop.f32.mrf.mxu0 }
 0x101   :  { %2621 = vrot.lane.b32.xlu1 %v4836_v11, %s4116_s13 }
 0x102   :  { %1348 = vrot.lane.b32.xlu2 %v4839_v28, %s4116_s13 }
 0x104   :  { %v4857_v31 = vpop.f32.mrf.mxu2 }
 0x105   :  { %504 = vmatmul.f32.gmra.mxu1 %v4298_v43  ;;  %v4975_v43 = vld [vmem:[%s6635_s2 + $0x90] sm:$0xff] }
 0x106   :  { %v4862_v54 = vpop.f32.mrf.mxu3 }
 0x108   :  { %v4869_v15 = vpop.f32.mrf.mxu0 }
 0x109   :  { %1455 = vrot.lane.b32.xlu1 %v4865_v48, %s4116_s13 }
 0x10a   :  { %1350 = vrot.lane.b32.xlu2 %v4860_v33, %s4116_s13 }
 0x10c   :  { %v295_v26 = vpop.f32.mrf.mxu2 }
 0x10d   :  { %v577_v45 = vadd.f32 %v4874_v14, %v295_v26  ;;  %v4900_v26 = vpop.permute.xlu2 %1443  ;;  %507 = vmatmul.f32.gmra.mxu1 %v4324_v49 }
 0x10e   :  { %v360_v25 = vpop.f32.mrf.mxu3  ;;  %6697 = vst [vmem:[#allocation25_spill] sm:$0xff] %v4900_v26 }
 0x10f   :  { %1354 = vrot.lane.b32.xlu0 %v577_v45, %s4116_s13  ;;  %v4906_v11 = vadd.f32 %v4889_v55, %v360_v25 }
 0x110   :  { %v4893_v24 = vpop.f32.mrf.mxu0 }
 0x111   :  { %1344 = vrot.lane.b32.xlu1 %v4883_v1, %s4116_s13  ;;  %6699 = vst [vmem:[#allocation27_spill] sm:$0xff] %v4906_v11 }
 0x113   :  { %v4903_v35 = vpop.permute.xlu1 %2609 }
 0x114   :  { %6698 = vst [vmem:[#allocation26_spill] sm:$0xff] %v4903_v35  ;;  %v298_v5 = vpop.f32.mrf.mxu2 }
 0x115   :  { %v581_v8 = vadd.f32 %v4898_v9, %v298_v5  ;;  %v4909_v47 = vpop.permute.xlu0 %1320  ;;  %v4927_v5 = vld [vmem:[%s6635_s2 + $0xf0] sm:$0xff]  ;;  %v4935_v34 = vpop.permute.xlu2 %2732  ;;  %510 = vmatmul.f32.gmra.mxu1 %v4353_v56 }
 0x116   :  { %v363_v26 = vpop.f32.mrf.mxu3  ;;  %6702 = vst [vmem:[#allocation30_spill] sm:$0xff] %v4935_v34 }
 0x117   :  { %2643 = vrot.lane.b32.xlu0 %v4906_v11, %s4116_s13  ;;  %1356 = vrot.lane.b32.xlu2 %v581_v8, %s4116_s13  ;;  %v4933_v50 = vadd.f32 %v4919_v32, %v363_v26 }
 0x118   :  { %v4922_v25 = vpop.f32.mrf.mxu0 }
 0x119   :  { %3754 = vrot.lane.b32.xlu1 %v3753_v19, %s4116_s13  ;;  %6701 = vst [vmem:[#allocation29_spill] sm:$0xff] %v4933_v50 }
 0x11b   :  { %v4930_v35 = vpop.permute.xlu1 %1441 }
 0x11c   :  { %6700 = vst [vmem:[#allocation28_spill] sm:$0xff] %v4930_v35  ;;  %v301_v36 = vpop.f32.mrf.mxu2 }
 0x11d   :  { %v585_v19 = vadd.f32 %v4927_v5, %v301_v36  ;;  %v4938_v16 = vpop.permute.xlu0 %2611  ;;  %v4954_v36 = vld [vmem:[%s6635_s2 + $0x78] sm:$0xff]  ;;  %513 = vmatmul.f32.gmra.mxu1 %v4391_v2  ;;  %v3763_v2 = vpack.i.bf16 %v4847_v3, %v4869_v15 }
 0x11e   :  { %6703 = vst [vmem:[#allocation31_spill] sm:$0xff] %v4938_v16  ;;  %v4947_v37 = vpop.f32.mrf.mxu3  ;;  %v4966_v35 = vadd.f32 %v4954_v36, %v4841_v20 }
 0x11f   :  { %3525 = vmatpush.xpose.msk.msra.mxu2 %vm763_vm0, %v585_v19  ;;  %2645 = vrot.lane.b32.xlu0 %v4933_v50, %s4116_s13 }
 0x120   :  { %1358 = vrot.lane.b32.xlu2 %v585_v19, %s4116_s13  ;;  %v4949_v26 = vpop.f32.mrf.mxu0  ;;  %v3768_v19 = vpack.i.bf16 %v4893_v24, %v4922_v25 }
 0x121   :  { %3759 = vrot.lane.b32.xlu1 %v3758_v7, %s4116_s13 }
 0x123   :  { %3526 = vmatpush.xpose.msk.msra.mxu2 %vm763_vm0, %v581_v8  ;;  %v4958_v34 = vpop.permute.xlu1 %2730  ;;  %v573_v8 = vadd.f32 %v4975_v43, %v4857_v31 }
 0x124   :  { %6704 = vst [vmem:[#allocation32_spill] sm:$0xff] %v4958_v34  ;;  %v304_v16 = vpop.f32.mrf.mxu2  ;;  %v4962_v7 = vpop.permute.xlu2 %2738 }
 0x125   :  { %6705 = vst [vmem:[#allocation33_spill] sm:$0xff] %v4962_v7  ;;  %v4968_v11 = vadd.f32 %v525_v23, %v304_v16  ;;  %v4970_v50 = vpop.permute.xlu0 %1324  ;;  %516 = vmatmul.f32.gmra.mxu1 %v4429_v12 }
 0x126   :  { %6706 = vst [vmem:[#allocation34_spill] sm:$0xff] %v4970_v50 }
 0x127   :  { %3527 = vmatpush.xpose.msk.msra.mxu2 %vm763_vm0, %v577_v45  ;;  %3769 = vrot.lane.b32.xlu0 %v3768_v19, %s4116_s13  ;;  %v369_v16 = vpop.f32.mrf.mxu3 }
 0x128   :  { %1465 = vrot.lane.b32.xlu2 %v4968_v11, %s4116_s13  ;;  %v4985_v20 = vpop.f32.mrf.mxu0  ;;  %v4996_v31 = vadd.f32 %v4802_v61, %v369_v16 }
 0x129   :  { %2639 = vrot.lane.b32.xlu1 %v4966_v35, %s4116_s13  ;;  %v3773_v45 = vpack.i.bf16 %v4949_v26, %v4985_v20 }
 0x12a   :  { %6708 = vst [vmem:[#allocation36_spill] sm:$0xff] %v4996_v31 }
 0x12b   :  { %3528 = vmatpush.xpose.msk.msra.mxu2 %vm763_vm0, %v573_v8  ;;  %v4989_v23 = vpop.permute.xlu1 %1322 }
 0x12c   :  { %v307_v19 = vpop.f32.mrf.mxu2  ;;  %v4993_v7 = vpop.permute.xlu2 %2619 }
 0x12d   :  { %6707 = vst [vmem:[#allocation35_spill] sm:$0xff] %v4993_v7  ;;  %v4998_v34 = vpop.permute.xlu0 %1445  ;;  %519 = vmatmul.f32.gmra.mxu1 %v4467_v22 }
 0x12f   :  { %3529 = vmatpush.xpose.msk.msra.mxu2 %vm763_vm0, %v4860_v33  ;;  %3774 = vrot.lane.b32.xlu0 %v3773_v45, %s4116_s13  ;;  %v372_v49 = vpop.f32.mrf.mxu3  ;;  %v5019_v33 = vld [vmem:[%s6635_s2 + $0x98] sm:$0xff] }
 0x130   :  { %2754 = vrot.lane.b32.xlu2 %v4996_v31, %s4116_s13  ;;  %v5006_v50 = vpop.f32.mrf.mxu0  ;;  %v5014_v16 = vadd.f32 %v4790_v51, %v372_v49  ;;  %v5027_v56 = vadd.f32 %v5019_v33, %v4862_v54 }
 0x131   :  { %1352 = vrot.lane.b32.xlu1 %v573_v8, %s4116_s13 }
 0x133   :  { %3530 = vmatpush.xpose.msk.msra.mxu2 %vm763_vm0, %v4839_v28  ;;  %v5011_v61 = vpop.permute.xlu1 %2613 }
 0x134   :  { %6709 = vst [vmem:[#allocation37_spill] sm:$0xff] %v5011_v61  ;;  %v310_v45 = vpop.f32.mrf.mxu2  ;;  %v5021_v8 = vpop.permute.xlu2 %1332 }
 0x135   :  { %v5023_v7 = vpop.permute.xlu0 %2734 }
 0x136   :  { %6710 = vst [vmem:[#allocation38_spill] sm:$0xff] %v5023_v7 }
 0x137   :  { %3531 = vmatpush.xpose.msk.msra.mxu2 %vm763_vm0, %v4780_v4  ;;  %2756 = vrot.lane.b32.xlu0 %v5014_v16, %s4116_s13  ;;  %v5035_v28 = vpop.f32.mrf.mxu3 }
 0x138   :  { %v5037_v51 = vpop.f32.mrf.mxu0 }
 0x139   :  { %2641 = vrot.lane.b32.xlu1 %v5027_v56, %s4116_s13  ;;  %v3778_v49 = vpack.i.bf16 %v5006_v50, %v5037_v51 }
 0x13b   :  { %3532 = vmatpush.xpose.msk.msra.mxu2 %vm763_vm0, %v4883_v1  ;;  %v5044_v54 = vpop.permute.xlu1 %1326  ;;  %3779 = vrot.lane.b32.xlu2 %v3778_v49, %s4116_s13 }
 0x13c   :  { %v313_v4 = vpop.f32.mrf.mxu2  ;;  %v5047_v7 = vpop.permute.xlu2 %2742 }
 0x13d   :  { %6711 = vst [vmem:[#allocation39_spill] sm:$0xff] %v5047_v7  ;;  %v5051_v61 = vadd.f32 %v4855_v21, %v313_v4  ;;  %v5055_v31 = vpop.permute.xlu0 %2615 }
 0x13e   :  { %3533 = vmatmul.msk.f32.vlgmr.msra.gmra.mxu2 %vm763_vm0, %v4537_v41  ;;  %6712 = vst [vmem:[#allocation40_spill] sm:$0xff] %v5055_v31  ;;  %v5069_v41 = vld [vmem:[%s6635_s2 + $0xf8] sm:$0xff] }
 0x13f   :  { %1118 = vmatpush.msrb.mxu2 %v4922_v25  ;;  %1471 = vrot.lane.b32.xlu0 %v5051_v61, %s4116_s13  ;;  %v378_v1 = vpop.f32.mrf.mxu3 }
 0x140   :  { %v5064_v21 = vpop.f32.mrf.mxu0 }
 0x141   :  { %1119 = vmatpush.msrb.mxu2 %v4893_v24  ;;  %3764 = vrot.lane.b32.xlu1 %v3763_v2, %s4116_s13 }
 0x143   :  { %1120 = vmatpush.msrb.mxu2 %v4869_v15  ;;  %v5073_v24 = vpop.permute.xlu1 %1447  ;;  %v5079_v15 = vadd.f32 %v5069_v41, %v4947_v37 }
 0x144   :  { %v316_v25 = vpop.f32.mrf.mxu2  ;;  %v5075_v49 = vpop.permute.xlu2 %1334 }
 0x145   :  { %1121 = vmatpush.msrb.mxu2 %v4847_v3  ;;  %v5085_v4 = vpop.permute.xlu0 %2617 }
 0x146   :  { %3534 = vmatmul.msk.f32.gmra.mxu2 %vm763_vm0, %v4586_v6  ;;  %6713 = vst [vmem:[#allocation41_spill] sm:$0xff] %v5085_v4 }
 0x147   :  { %1122 = vmatpush.msrb.mxu2 %v4823_v60  ;;  %v381_v12 = vpop.f32.mrf.mxu3 }
 0x148   :  { %v5090_v3 = vpop.f32.mrf.mxu0 }
 0x149   :  { %1123 = vmatpush.msrb.mxu2 %v4792_v13  ;;  %2647 = vrot.lane.b32.xlu1 %v5079_v15, %s4116_s13  ;;  %v593_v13 = vadd.f32 %v4767_v44, %v307_v19  ;;  %v597_v44 = vadd.f32 %v4831_v59, %v310_v45 }
 0x14b   :  { %1124 = vmatpush.msrb.mxu2 %v4760_v53  ;;  %v5094_v60 = vpop.permute.xlu1 %2736  ;;  %v5101_v53 = vpop.f32.mrf.mxu1 }
 0x14c   :  { %6714 = vst [vmem:[#allocation42_spill] sm:$0xff] %v5094_v60  ;;  %v319_v37 = vpop.f32.mrf.mxu2  ;;  %v5096_v6 = vpop.permute.xlu2 %2623 }
 0x14d   :  { %1125 = vmatpush.msrb.mxu2 %v4741_v30  ;;  %6715 = vst [vmem:[#allocation43_spill] sm:$0xff] %v5096_v6  ;;  %v5109_v60 = vpop.permute.xlu0 %1449 }
 0x14e   :  { %3535 = vmatmul.msk.f32.gmra.mxu2 %vm763_vm0, %v4572_v63  ;;  %6716 = vst [vmem:[#allocation44_spill] sm:$0xff] %v5101_v53 }
 0x14f   :  { %v384_v2 = vpop.f32.mrf.mxu3 }
 0x150   :  { %v452_v7 = vpop.f32.mrf.mxu0  ;;  %v5105_v22 = vadd.f32 %v4889_v55, %v384_v2 }
 0x151   :  { %1467 = vrot.lane.b32.xlu1 %v593_v13, %s4116_s13 }
 0x152   :  { %2764 = vrot.lane.b32.xlu0 %v5105_v22, %s4116_s13 }
 0x153   :  { %v5107_v30 = vpop.permute.xlu1 %1328  ;;  %v5119_v6 = vpop.f32.mrf.mxu1 }
 0x154   :  { %v322_v4 = vpop.f32.mrf.mxu2  ;;  %v5115_v19 = vpop.permute.xlu2 %2633 }
 0x155   :  { %v613_v63 = vadd.f32 %v4898_v9, %v322_v4  ;;  %v5125_v31 = vpop.permute.xlu0 %1453  ;;  %v5130_v9 = vadd.f32 %v4819_v57, %v5035_v28  ;;  %v605_v28 = vadd.f32 %v4975_v43, %v316_v25  ;;  %v5180_v25 = vadd.f32 %v5019_v33, %v381_v12 }
 0x156   :  { %3536 = vmatmul.msk.f32.gmra.mxu2 %vm763_vm0, %v4648_v39 }
 0x157   :  { %1477 = vrot.lane.b32.xlu2 %v613_v63, %s4116_s13 }
 0x158   :  { %v455_v55 = vpop.f32.mrf.mxu0 }
 0x159   :  { %1469 = vrot.lane.b32.xlu1 %v597_v44, %s4116_s13  ;;  %v3788_v2 = vpack.i.bf16 %v452_v7, %v455_v55 }
 0x15b   :  { %v5123_v53 = vpop.permute.xlu1 %1330  ;;  %3789 = vrot.lane.b32.xlu0 %v3788_v2, %s4116_s13  ;;  %v5141_v4 = vpop.f32.mrf.mxu1  ;;  %v609_v2 = vadd.f32 %v4874_v14, %v319_v37 }
 0x15c   :  { %v325_v59 = vpop.f32.mrf.mxu2  ;;  %v5139_v45 = vpop.permute.xlu2 %1348 }
 0x15d   :  { %v5133_v39 = vadd.f32 %v4927_v5, %v325_v59 }
 0x15e   :  { %3537 = vmatmul.msk.f32.gmra.mxu2 %vm763_vm0, %v4733_v27  ;;  %v5152_v27 = vadd.f32 %v4954_v36, %v378_v1 }
 0x15f   :  { %3541 = vmatpush.xpose.msk.msra.mxu3 %vm763_vm0, %v5133_v39 }
 0x161   :  { %2758 = vrot.lane.b32.xlu1 %v5130_v9, %s4116_s13  ;;  %v5149_v5 = vpop.permute.xlu0 %1346 }
 0x163   :  { %3542 = vmatpush.xpose.msk.msra.mxu3 %vm763_vm0, %v613_v63  ;;  %v5147_v57 = vpop.permute.xlu1 %1451  ;;  %v5158_v59 = vpop.f32.mrf.mxu1 }
 0x164   :  { %v5162_v14 = vpop.permute.xlu2 %1350 }
 0x166   :  { %3538 = vmatmul.msk.f32.gmra.mxu2 %vm763_vm0, %v4756_v40 }
 0x167   :  { %3543 = vmatpush.xpose.msk.msra.mxu3 %vm763_vm0, %v609_v2 }
 0x169   :  { %2760 = vrot.lane.b32.xlu1 %v5152_v27, %s4116_s13  ;;  %v5167_v36 = vpop.permute.xlu0 %2635 }
 0x16b   :  { %3544 = vmatpush.xpose.msk.msra.mxu3 %vm763_vm0, %v605_v28  ;;  %v5165_v37 = vpop.permute.xlu1 %2740  ;;  %v5173_v40 = vpop.f32.mrf.mxu1 }
 0x16e   :  { %3539 = vmatmul.msk.f32.gmra.mxu2 %vm763_vm0, %v4713_v17 }
 0x16f   :  { %3545 = vmatpush.xpose.msk.msra.mxu3 %vm763_vm0, %v5051_v61 }
 0x171   :  { %1473 = vrot.lane.b32.xlu1 %v605_v28, %s4116_s13  ;;  %v1357_v43 = vpop.permute.xlu2 %1356  ;;  %v5185_v17 = vpop.permute.xlu0 %2637 }
 0x173   :  { %3546 = vmatpush.xpose.msk.msra.mxu3 %vm763_vm0, %v597_v44  ;;  %v5177_v1 = vpop.permute.xlu1 %2621  ;;  %v5187_v61 = vpop.f32.mrf.mxu1 }
 0x174   :  { %v3798_v63 = vpack.i.bf16 %v5173_v40, %v5187_v61 }
 0x176   :  { %3540 = vmatmul.msk.f32.gmra.mxu2 %vm763_vm0, %v4758_v42  ;;  %3799 = vrot.lane.b32.xlu0 %v3798_v63, %s4116_s13  ;;  %v3783_v42 = vpack.i.bf16 %v5064_v21, %v5090_v3 }
 0x177   :  { %3547 = vmatpush.xpose.msk.msra.mxu3 %vm763_vm0, %v593_v13 }
 0x179   :  { %2762 = vrot.lane.b32.xlu1 %v5180_v25, %s4116_s13 }
 0x17a   :  { %v1359_v44 = vpop.permute.xlu2 %1358 }
 0x17b   :  { %3548 = vmatpush.xpose.msk.msra.mxu3 %vm763_vm0, %v4968_v11  ;;  %v5196_v33 = vpop.permute.xlu1 %1455  ;;  %3573 = vmatpush.xpose.msk.msra.mxu0 %vm763_vm0, %v1359_v44  ;;  %v5211_v13 = vpop.f32.mrf.mxu1 }
 0x17e   :  { %3549 = vmatmul.msk.f32.vlgmr.msra.gmra.mxu3 %vm763_vm0, %v4546_v46  ;;  %v387_v46 = vpop.f32.mrf.mxu3 }
 0x17f   :  { %1183 = vmatpush.msrb.mxu3 %v455_v55  ;;  %3574 = vmatpush.xpose.msk.msra.mxu0 %vm763_vm0, %v1357_v43 }
 0x181   :  { %1184 = vmatpush.msrb.mxu3 %v452_v7  ;;  %3784 = vrot.lane.b32.xlu1 %v3783_v42, %s4116_s13  ;;  %v1355_v12 = vpop.permute.xlu0 %1354  ;;  %v5215_v7 = vadd.f32 %v4919_v32, %v387_v46 }
 0x183   :  { %1185 = vmatpush.msrb.mxu3 %v5090_v3  ;;  %v1345_v11 = vpop.permute.xlu1 %1344  ;;  %3575 = vmatpush.xpose.msk.msra.mxu0 %vm763_vm0, %v1355_v12 }
 0x184   :  { %2766 = vrot.lane.b32.xlu2 %v5215_v7, %s4116_s13 }
 0x185   :  { %1186 = vmatpush.msrb.mxu3 %v5064_v21 }
 0x186   :  { %3550 = vmatmul.msk.f32.gmra.mxu3 %vm763_vm0, %v4562_v58 }
 0x187   :  { %1187 = vmatpush.msrb.mxu3 %v5037_v51  ;;  %v5226_v51 = vpop.f32.mrf.mxu1 }
 0x189   :  { %1188 = vmatpush.msrb.mxu3 %v5006_v50  ;;  %1475 = vrot.lane.b32.xlu1 %v609_v2, %s4116_s13  ;;  %v5219_v21 = vpop.permute.xlu0 %2643  ;;  %v3793_v50 = vpack.i.bf16 %v5211_v13, %v5226_v51 }
 0x18b   :  { %1189 = vmatpush.msrb.mxu3 %v4985_v20  ;;  %v3755_v58 = vpop.permute.xlu1 %3754 }
 0x18c   :  { %3794 = vrot.lane.b32.xlu2 %v3793_v50, %s4116_s13  ;;  %v3756_v63 = vunpack.i.l.bf16 %v3755_v58 }
 0x18d   :  { %1190 = vmatpush.msrb.mxu3 %v4949_v26  ;;  %v390_v26 = vpop.f32.mrf.mxu3 }
 0x18e   :  { %3551 = vmatmul.msk.f32.gmra.mxu3 %vm763_vm0, %v4594_v10  ;;  %v5239_v10 = vadd.f32 %v4775_v52, %v4737_v29  ;;  %v5242_v3 = vadd.f32 %v5069_v41, %v390_v26 }
 0x191   :  { %1479 = vrot.lane.b32.xlu1 %v5133_v39, %s4116_s13  ;;  %v5232_v32 = vpop.permute.xlu0 %2645 }
 0x193   :  { %v3760_v20 = vpop.permute.xlu1 %3759 }
 0x194   :  { %2768 = vrot.lane.b32.xlu2 %v5242_v3, %s4116_s13 }
 0x196   :  { %3552 = vmatmul.msk.f32.gmra.mxu3 %vm763_vm0, %v4680_v62 }
 0x199   :  { %2744 = vrot.lane.b32.xlu1 %v5239_v10, %s4116_s13  ;;  %v3770_v55 = vpop.permute.xlu0 %3769 }
 0x19a   :  { %v3772_v39 = vunpack.i.h.bf16 %v3770_v55  ;;  %v3771_v2 = vunpack.i.l.bf16 %v3770_v55 }
 0x19b   :  { %v5248_v28 = vpop.permute.xlu1 %2639 }
 0x19c   :  { %1762 = vmatpush.msra.mxu2 %v3771_v2  ;;  %v6722_v2 = vld [vmem:[#allocation22_spill] sm:$0xff] }
 0x19e   :  { %3553 = vmatmul.msk.f32.gmra.mxu3 %vm763_vm0, %v4715_v18  ;;  %1763 = vmatpush.msra.mxu2 %v3772_v39 }
 0x1a1   :  { %v5259_v52 = vpop.permute.xlu0 %3774 }
 0x1a3   :  { %v1353_v62 = vpop.permute.xlu1 %1352 }
 0x1a4   :  { %3576 = vmatpush.xpose.msk.msra.mxu0 %vm763_vm0, %v1353_v62 }
 0x1a6   :  { %3554 = vmatmul.msk.f32.gmra.mxu3 %vm763_vm0, %v4777_v0 }
 0x1a8   :  { %3577 = vmatpush.xpose.msk.msra.mxu0 %vm763_vm0, %v5162_v14  ;;  %v3762_v14 = vunpack.i.h.bf16 %v3760_v20 }
 0x1ab   :  { %v2642_v29 = vpop.permute.xlu1 %2641 }
 0x1ac   :  { %3578 = vmatpush.xpose.msk.msra.mxu0 %vm763_vm0, %v5139_v45  ;;  %v5272_v45 = vpop.permute.xlu0 %2756 }
 0x1ae   :  { %3555 = vmatmul.msk.f32.gmra.mxu3 %vm763_vm0, %v4739_v38  ;;  %v3761_v38 = vunpack.i.l.bf16 %v3760_v20  ;;  %v6721_v20 = vld [vmem:[#allocation20_spill] sm:$0xff] }
 0x1b0   :  { %3579 = vmatpush.xpose.msk.msra.mxu0 %vm763_vm0, %v5149_v5  ;;  %v6717_v5 = vld [vmem:[#allocation29_spill] sm:$0xff] }
 0x1b3   :  { %v3765_v18 = vpop.permute.xlu1 %3764 }
 0x1b4   :  { %v3766_v41 = vunpack.i.l.bf16 %v3765_v18  ;;  %3580 = vmatpush.xpose.msk.msra.mxu0 %vm763_vm0, %v1345_v11  ;;  %v3767_v0 = vunpack.i.h.bf16 %v3765_v18  ;;  %v6719_v11 = vld [vmem:[#allocation34_spill] sm:$0xff] }
 0x1b6   :  { %3556 = vmatmul.msk.f32.gmra.mxu3 %vm763_vm0, %v4865_v48  ;;  %1764 = vmatpush.msra.mxu2 %v3766_v41  ;;  %v3757_v48 = vunpack.i.h.bf16 %v3755_v58  ;;  %v6720_v58 = vld [vmem:[#allocation23_spill] sm:$0xff] }
 0x1b7   :  { %3581 = vmatmul.msk.f32.vlgmr.msra.gmra.mxu0 %vm763_vm0, %v4909_v47  ;;  %v5280_v47 = vpop.permute.xlu0 %1471 }
 0x1b8   :  { %3621 = vmatpush.xpose.msk.msrb.mxu0 %vm763_vm0, %v5079_v15  ;;  %1765 = vmatpush.msra.mxu2 %v3767_v0  ;;  %v6718_v15 = vld [vmem:[#allocation27_spill] sm:$0xff] }
 0x1ba   :  { %1766 = vmatpush.msra.mxu2 %v3761_v38 }
 0x1bb   :  { %v2648_v43 = vpop.permute.xlu1 %2647 }
 0x1bc   :  { %3622 = vmatpush.xpose.msk.msrb.mxu0 %vm763_vm0, %v6717_v5  ;;  %1767 = vmatpush.msra.mxu2 %v3762_v14 }
 0x1be   :  { %1768 = vmatpush.msra.mxu2 %v3756_v63 }
 0x1bf   :  { %3582 = vmatmul.msk.f32.gmra.mxu0 %vm763_vm0, %v4989_v23 }
 0x1c0   :  { %3623 = vmatpush.xpose.msk.msrb.mxu0 %vm763_vm0, %v6718_v15  ;;  %1769 = vmatpush.msra.mxu2 %v3757_v48  ;;  %v6723_v15 = vld [vmem:[#allocation7_spill] sm:$0xff] }
 0x1c1   :  { %v5282_v44 = vpop.f32.mrf.mxu2 }
 0x1c2   :  { %v942_v42 = vsel %vm763_vm0, %v5282_v44, -inf }
 0x1c3   :  { %v5288_v12 = vpop.permute.xlu1 %1467  ;;  %943 = vmax.xlane.f32.xlu0 %v942_v42 }
 0x1c4   :  { %3624 = vmatpush.xpose.msk.msrb.mxu0 %vm763_vm0, %v5027_v56  ;;  %v5294_v23 = vpop.permute.xlu0 %2764 }
 0x1c7   :  { %3583 = vmatmul.msk.f32.gmra.mxu0 %vm763_vm0, %v6719_v11 }
 0x1c8   :  { %3625 = vmatpush.xpose.msk.msrb.mxu0 %vm763_vm0, %v4966_v35 }
 0x1c9   :  { %v5296_v46 = vpop.f32.mrf.mxu2 }
 0x1ca   :  { %v945_v56 = vsel %vm763_vm0, %v5296_v46, -inf }
 0x1cb   :  { %v5302_v50 = vpop.permute.xlu1 %1469  ;;  %946 = vmax.xlane.f32.xlu0 %v945_v56  ;;  %v3777_v56 = vunpack.i.h.bf16 %v5259_v52 }
 0x1cc   :  { %3626 = vmatpush.xpose.msk.msrb.mxu0 %vm763_vm0, %v6720_v58  ;;  %v3776_v58 = vunpack.i.l.bf16 %v5259_v52 }
 0x1cd   :  { %v3790_v35 = vpop.permute.xlu0 %3789 }
 0x1ce   :  { %v3792_v26 = vunpack.i.h.bf16 %v3790_v35  ;;  %v3791_v55 = vunpack.i.l.bf16 %v3790_v35 }
 0x1cf   :  { %3584 = vmatmul.msk.f32.gmra.mxu0 %vm763_vm0, %v5044_v54 }
 0x1d0   :  { %3627 = vmatpush.xpose.msk.msrb.mxu0 %vm763_vm0, %v6721_v20  ;;  %1859 = vmatpush.msra.mxu3 %v3791_v55  ;;  %v6724_v20 = vld [vmem:[#allocation8_spill] sm:$0xff] }
 0x1d1   :  { %v5308_v39 = vpop.f32.mrf.mxu2 }
 0x1d2   :  { %v948_v62 = vsel %vm763_vm0, %v5308_v39, -inf  ;;  %1860 = vmatpush.msra.mxu3 %v3792_v26 }
 0x1d3   :  { %v5315_v18 = vpop.permute.xlu1 %2758  ;;  %949 = vmax.xlane.f32.xlu1 %v948_v62  ;;  %v6725_v62 = vld [vmem:[#allocation11_spill] sm:$0xff] }
 0x1d4   :  { %3628 = vmatpush.xpose.msk.msrb.mxu0 %vm763_vm0, %v6722_v2 }
 0x1d7   :  { %3585 = vmatmul.msk.f32.gmra.mxu0 %vm763_vm0, %v5107_v30 }
 0x1d8   :  { %3669 = vmatpush.xpose.msk.msra.mxu0 %vm763_vm0, %v2648_v43 }
 0x1d9   :  { %v5321_v54 = vpop.f32.mrf.mxu2 }
 0x1da   :  { %v951_v41 = vsel %vm763_vm0, %v5321_v54, -inf }
 0x1db   :  { %v5327_v0 = vpop.permute.xlu1 %2760  ;;  %952 = vmax.xlane.f32.xlu1 %v951_v41 }
 0x1dc   :  { %3670 = vmatpush.xpose.msk.msra.mxu0 %vm763_vm0, %v5232_v32 }
 0x1df   :  { %3586 = vmatmul.msk.f32.gmra.mxu0 %vm763_vm0, %v5123_v53 }
 0x1e0   :  { %3671 = vmatpush.xpose.msk.msra.mxu0 %vm763_vm0, %v5219_v21  ;;  %v1466_v21 = vpop.permute.xlu2 %1465 }
 0x1e1   :  { %v5332_v32 = vpop.f32.mrf.mxu2 }
 0x1e2   :  { %v954_v30 = vsel %vm763_vm0, %v5332_v32, -inf }
 0x1e3   :  { %v1474_v38 = vpop.permute.xlu1 %1473  ;;  %955 = vmax.xlane.f32.xlu2 %v954_v30  ;;  %v6726_v30 = vld [vmem:[#allocation13_spill] sm:$0xff] }
 0x1e4   :  { %3672 = vmatpush.xpose.msk.msra.mxu0 %vm763_vm0, %v2642_v29 }
 0x1e7   :  { %3587 = vmatmul.msk.f32.gmra.mxu0 %vm763_vm0, %v5021_v8 }
 0x1e8   :  { %3673 = vmatpush.xpose.msk.msra.mxu0 %vm763_vm0, %v5248_v28  ;;  %v5350_v5 = vpop.permute.xlu2 %2754 }
 0x1e9   :  { %v5342_v29 = vpop.f32.mrf.mxu2 }
 0x1ea   :  { %v957_v53 = vsel %vm763_vm0, %v5342_v29, -inf }
 0x1eb   :  { %v5348_v28 = vpop.permute.xlu1 %2762  ;;  %958 = vmax.xlane.f32.xlu0 %v957_v53 }
 0x1ec   :  { %3674 = vmatpush.xpose.msk.msra.mxu0 %vm763_vm0, %v5185_v17 }
 0x1ef   :  { %3588 = vmatmul.msk.f32.gmra.mxu0 %vm763_vm0, %v5075_v49 }
 0x1f0   :  { %3675 = vmatpush.xpose.msk.msra.mxu0 %vm763_vm0, %v5167_v36  ;;  %v3780_v43 = vpop.permute.xlu2 %3779 }
 0x1f1   :  { %v5356_v8 = vpop.f32.mrf.mxu2  ;;  %v3781_v48 = vunpack.i.l.bf16 %v3780_v43  ;;  %v3782_v42 = vunpack.i.h.bf16 %v3780_v43  ;;  %v6728_v43 = vld [vmem:[#allocation15_spill] sm:$0xff] }
 0x1f2   :  { %v960_v17 = vsel %vm763_vm0, %v5356_v8, -inf }
 0x1f3   :  { %961 = vmax.xlane.f32.xlu2 %v960_v17  ;;  %v3785_v36 = vpop.permute.xlu1 %3784 }
 0x1f4   :  { %3676 = vmatpush.xpose.msk.msra.mxu0 %vm763_vm0, %v5115_v19  ;;  %v3786_v14 = vunpack.i.l.bf16 %v3785_v36  ;;  %v3787_v63 = vunpack.i.h.bf16 %v3785_v36  ;;  %v6727_v36 = vld [vmem:[#allocation16_spill] sm:$0xff] }
 0x1f6   :  { %1861 = vmatpush.msra.mxu3 %v3786_v14 }
 0x1f7   :  { %3629 = vmatmul.msk.f32.vlgmr.msrb.gmra.mxu0 %vm763_vm0, %v6723_v15 }
 0x1f8   :  { %1862 = vmatpush.msra.mxu3 %v3787_v63  ;;  %v1478_v2 = vpop.permute.xlu2 %1477  ;;  %v6729_v63 = vld [vmem:[#allocation28_spill] sm:$0xff] }
 0x1f9   :  { %v5362_v19 = vpop.f32.mrf.mxu2 }
 0x1fa   :  { %1863 = vmatpush.msra.mxu3 %v3781_v48  ;;  %v963_v49 = vsel %vm763_vm0, %v5362_v19, -inf  ;;  %v6731_v48 = vld [vmem:[#allocation25_spill] sm:$0xff] }
 0x1fb   :  { %964 = vmax.xlane.f32.xlu1 %v963_v49  ;;  %v1476_v11 = vpop.permute.xlu1 %1475 }
 0x1fc   :  { %1864 = vmatpush.msra.mxu3 %v3782_v42  ;;  %v5425_v42 = vpop.permute.xlu0 %3799 }
 0x1fe   :  { %1865 = vmatpush.msra.mxu3 %v3776_v58 }
 0x1ff   :  { %3630 = vmatmul.msk.f32.gmra.mxu0 %vm763_vm0, %v6724_v20  ;;  %v6733_v20 = vld [vmem:[#allocation26_spill] sm:$0xff] }
 0x200   :  { %1866 = vmatpush.msra.mxu3 %v3777_v56  ;;  %v2767_v15 = vpop.permute.xlu2 %2766 }
 0x201   :  { %v5370_v35 = vpop.f32.mrf.mxu3 }
 0x202   :  { %v966_v26 = vsel %vm763_vm0, %v5370_v35, -inf }
 0x203   :  { %v1480_v55 = vpop.permute.xlu1 %1479  ;;  %967 = vmax.xlane.f32.xlu0 %v966_v26 }
 0x204   :  { %3589 = vmatpush.xpose.msk.msra.mxu1 %vm763_vm0, %v1480_v55 }
 0x207   :  { %3631 = vmatmul.msk.f32.gmra.mxu0 %vm763_vm0, %v6725_v62 }
 0x208   :  { %3590 = vmatpush.xpose.msk.msra.mxu1 %vm763_vm0, %v1478_v2  ;;  %v6734_v2 = vld [vmem:[#allocation36_spill] sm:$0xff] }
 0x209   :  { %v5378_v52 = vpop.f32.mrf.mxu3 }
 0x20a   :  { %v969_v41 = vsel %vm763_vm0, %v5378_v52, -inf }
 0x20b   :  { %970 = vmax.xlane.f32.xlu0 %v969_v41 }
 0x20c   :  { %3591 = vmatpush.xpose.msk.msra.mxu1 %vm763_vm0, %v1476_v11 }
 0x20f   :  { %3632 = vmatmul.msk.f32.gmra.mxu0 %vm763_vm0, %v6726_v30 }
 0x210   :  { %3592 = vmatpush.xpose.msk.msra.mxu1 %vm763_vm0, %v1474_v38 }
 0x211   :  { %v5386_v53 = vpop.f32.mrf.mxu3 }
 0x212   :  { %v972_v17 = vsel %vm763_vm0, %v5386_v53, -inf }
 0x213   :  { %973 = vmax.xlane.f32.xlu1 %v972_v17  ;;  %v6735_v17 = vld [vmem:[#allocation31_spill] sm:$0xff] }
 0x214   :  { %3593 = vmatpush.xpose.msk.msra.mxu1 %vm763_vm0, %v5280_v47 }
 0x217   :  { %3633 = vmatmul.msk.f32.gmra.mxu0 %vm763_vm0, %v6727_v36 }
 0x218   :  { %3594 = vmatpush.xpose.msk.msra.mxu1 %vm763_vm0, %v5302_v50 }
 0x219   :  { %v5396_v14 = vpop.f32.mrf.mxu3 }
 0x21a   :  { %v975_v38 = vsel %vm763_vm0, %v5396_v14, -inf }
 0x21b   :  { %976 = vmax.xlane.f32.xlu0 %v975_v38 }
 0x21c   :  { %3595 = vmatpush.xpose.msk.msra.mxu1 %vm763_vm0, %v5288_v12  ;;  %v6730_v12 = vld [vmem:[#allocation24_spill] sm:$0xff] }
 0x21f   :  { %3634 = vmatmul.msk.f32.gmra.mxu0 %vm763_vm0, %v6728_v43 }
 0x220   :  { %3596 = vmatpush.xpose.msk.msra.mxu1 %vm763_vm0, %v1466_v21 }
 0x221   :  { %v5405_v47 = vpop.f32.mrf.mxu3 }
 0x222   :  { %v978_v50 = vsel %vm763_vm0, %v5405_v47, -inf }
 0x223   :  { %979 = vmax.xlane.f32.xlu1 %v978_v50  ;;  %3597 = vmatmul.msk.f32.vlgmr.msra.gmra.mxu1 %vm763_vm0, %v6729_v63 }
 0x224   :  { %3637 = vmatpush.xpose.msk.msrb.mxu1 %vm763_vm0, %v5242_v3 }
 0x227   :  { %3635 = vmatmul.msk.f32.gmra.mxu0 %vm763_vm0, %v6730_v12 }
 0x228   :  { %3638 = vmatpush.xpose.msk.msrb.mxu1 %vm763_vm0, %v5215_v7  ;;  %v6732_v7 = vld [vmem:[#allocation19_spill] sm:$0xff] }
 0x229   :  { %v5417_v21 = vpop.f32.mrf.mxu3 }
 0x22a   :  { %v981_v3 = vsel %vm763_vm0, %v5417_v21, -inf }
 0x22b   :  { %3598 = vmatmul.msk.f32.gmra.mxu1 %vm763_vm0, %v6731_v48  ;;  %982 = vmax.xlane.f32.xlu0 %v981_v3  ;;  %v6738_v48 = vld [vmem:[#allocation44_spill] sm:$0xff] }
 0x22c   :  { %3639 = vmatpush.xpose.msk.msrb.mxu1 %vm763_vm0, %v5105_v22  ;;  %v5435_v22 = vpop.permute.xlu2 %3794 }
 0x22f   :  { %3636 = vmatmul.msk.f32.gmra.mxu0 %vm763_vm0, %v6732_v7 }
 0x230   :  { %3640 = vmatpush.xpose.msk.msrb.mxu1 %vm763_vm0, %v5180_v25 }
 0x231   :  { %v5431_v49 = vpop.f32.mrf.mxu3 }
 0x232   :  { %v984_v62 = vsel %vm763_vm0, %v5431_v49, -inf }
 0x233   :  { %3599 = vmatmul.msk.f32.gmra.mxu1 %vm763_vm0, %v4998_v34 }
 0x234   :  { %3641 = vmatpush.xpose.msk.msrb.mxu1 %vm763_vm0, %v5152_v27  ;;  %v5439_v11 = vpop.f32.mrf.mxu0 }
 0x235   :  { %v1554_v25 = vsel %vm763_vm0, %v5439_v11, -inf }
 0x236   :  { %v944_v58 = vpop.xlane.xlu0 %943  ;;  %1555 = vmax.xlane.f32.xlu2 %v1554_v25 }
 0x237   :  { %v990_v56 = vsub.f32 %v5282_v44, %v944_v58  ;;  %3677 = vmatmul.msk.f32.vlgmr.msra.gmra.mxu0 %vm763_vm0, %v6733_v20  ;;  %v2769_v44 = vpop.permute.xlu2 %2768  ;;  %v6739_v58 = vld [vmem:[#allocation41_spill] sm:$0xff] }
 0x238   :  { %3642 = vmatpush.xpose.msk.msrb.mxu1 %vm763_vm0, %v5130_v9  ;;  %v5454_v9 = vpop.f32.mrf.mxu1 }
 0x239   :  { %v1006_v27 = vmul.f32 1.442695, %v990_v56  ;;  %v5448_v26 = vpop.f32.mrf.mxu3 }
 0x23a   :  { %v987_v34 = vsel %vm763_vm0, %v5448_v26, -inf }
 0x23b   :  { %3834 = vpow2.f32 %v1006_v27  ;;  %3600 = vmatmul.msk.f32.gmra.mxu1 %vm763_vm0, %v5073_v24  ;;  %988 = vmax.xlane.f32.xlu0 %v987_v34  ;;  %v6740_v34 = vld [vmem:[#allocation35_spill] sm:$0xff] }
 0x23c   :  { %3643 = vmatpush.xpose.msk.msrb.mxu1 %vm763_vm0, %v5014_v16  ;;  %v5458_v55 = vpop.f32.mrf.mxu0  ;;  %v5464_v16 = vpop.permute.xlu1 %2744 }
 0x23d   :  { %v1557_v43 = vsel %vm763_vm0, %v5458_v55, -inf }
 0x23e   :  { %v947_v41 = vpop.xlane.xlu0 %946  ;;  %985 = vmax.xlane.f32.xlu2 %v984_v62 }
 0x23f   :  { %v991_v30 = vsub.f32 %v5296_v46, %v947_v41  ;;  %3678 = vmatmul.msk.f32.gmra.mxu0 %vm763_vm0, %v6735_v17 }
 0x240   :  { %3644 = vmatpush.xpose.msk.msrb.mxu1 %vm763_vm0, %v6734_v2  ;;  %v5480_v46 = vpop.f32.mrf.mxu1 }
 0x241   :  { %v5470_v24 = vpop.eup %3834  ;;  %v1008_v36 = vmul.f32 1.442695, %v991_v30 }
 0x242   :  { %3557 = vmatmul.msk.f32.vlgmr.msrb.gmra.mxu2 %vm763_vm0, %v5470_v24 }
 0x243   :  { %3836 = vpow2.f32 %v1008_v36  ;;  %2407 = vmatpush.msrb.mxu2 %v5226_v51  ;;  %3601 = vmatmul.msk.f32.gmra.mxu1 %vm763_vm0, %v5109_v60  ;;  %v6736_v60 = vld [vmem:[#allocation37_spill] sm:$0xff] }
 0x244   :  { %3685 = vmatpush.xpose.msk.msra.mxu1 %vm763_vm0, %v2769_v44  ;;  %v5478_v38 = vpop.f32.mrf.mxu0 }
 0x245   :  { %2408 = vmatpush.msrb.mxu2 %v5211_v13  ;;  %v1560_v50 = vsel %vm763_vm0, %v5478_v38, -inf }
 0x246   :  { %v950_v63 = vpop.xlane.xlu1 %949  ;;  %1558 = vmax.xlane.f32.xlu2 %v1557_v43  ;;  %1561 = vmax.xlane.f32.xlu0 %v1560_v50  ;;  %v6744_v43 = vld [vmem:[#allocation10_spill] sm:$0xff] }
 0x247   :  { %v992_v51 = vsub.f32 %v5308_v39, %v950_v63  ;;  %2409 = vmatpush.msrb.mxu2 %v5187_v61  ;;  %3679 = vmatmul.msk.f32.gmra.mxu0 %vm763_vm0, %v6736_v60  ;;  %v6745_v60 = vld [vmem:[#allocation43_spill] sm:$0xff] }
 0x248   :  { %3686 = vmatpush.xpose.msk.msra.mxu1 %vm763_vm0, %v2767_v15  ;;  %v5510_v39 = vpop.f32.mrf.mxu1  ;;  %v6737_v15 = vld [vmem:[#allocation40_spill] sm:$0xff] }
 0x249   :  { %v5493_v13 = vpop.eup %3836  ;;  %v1010_v12 = vmul.f32 1.442695, %v992_v51  ;;  %2410 = vmatpush.msrb.mxu2 %v5173_v40 }
 0x24a   :  { %3558 = vmatmul.msk.f32.gmra.mxu2 %vm763_vm0, %v5493_v13 }
 0x24b   :  { %3838 = vpow2.f32 %v1010_v12  ;;  %2411 = vmatpush.msrb.mxu2 %v5158_v59  ;;  %3602 = vmatmul.msk.f32.gmra.mxu1 %vm763_vm0, %v5147_v57 }
 0x24c   :  { %3687 = vmatpush.xpose.msk.msra.mxu1 %vm763_vm0, %v5294_v23  ;;  %v5503_v61 = vpop.f32.mrf.mxu0 }
 0x24d   :  { %2412 = vmatpush.msrb.mxu2 %v5141_v4  ;;  %v1563_v23 = vsel %vm763_vm0, %v5503_v61, -inf }
 0x24e   :  { %v953_v40 = vpop.xlane.xlu1 %952  ;;  %1564 = vmax.xlane.f32.xlu2 %v1563_v23 }
 0x24f   :  { %2413 = vmatpush.msrb.mxu2 %v5119_v6  ;;  %3680 = vmatmul.msk.f32.gmra.mxu0 %vm763_vm0, %v6737_v15 }
 0x250   :  { %3688 = vmatpush.xpose.msk.msra.mxu1 %vm763_vm0, %v5348_v28  ;;  %v993_v28 = vsub.f32 %v5321_v54, %v953_v40  ;;  %v6747_v40 = vld [vmem:[#allocation12_spill] sm:$0xff] }
 0x251   :  { %v5516_v57 = vpop.eup %3838  ;;  %2414 = vmatpush.msrb.mxu2 %v6738_v48 }
 0x252   :  { %v1012_v3 = vmul.f32 1.442695, %v993_v28  ;;  %3559 = vmatmul.msk.f32.gmra.mxu2 %vm763_vm0, %v5516_v57 }
 0x253   :  { %3603 = vmatmul.msk.f32.gmra.mxu1 %vm763_vm0, %v5125_v31 }
 0x254   :  { %3689 = vmatpush.xpose.msk.msra.mxu1 %vm763_vm0, %v5327_v0  ;;  %3840 = vpow2.f32 %v1012_v3  ;;  %v5525_v54 = vpop.f32.mrf.mxu0 }
 0x255   :  { %v1566_v0 = vsel %vm763_vm0, %v5525_v54, -inf }
 0x256   :  { %v956_v7 = vpop.xlane.xlu2 %955  ;;  %1567 = vmax.xlane.f32.xlu0 %v1566_v0 }
 0x257   :  { %v994_v25 = vsub.f32 %v5332_v32, %v956_v7  ;;  %3681 = vmatmul.msk.f32.gmra.mxu0 %vm763_vm0, %v6739_v58  ;;  %v6749_v58 = vld [vmem:[#allocation17_spill] sm:$0xff] }
 0x258   :  { %3690 = vmatpush.xpose.msk.msra.mxu1 %vm763_vm0, %v5315_v18  ;;  %v5534_v18 = vpop.f32.mrf.mxu1 }
 0x259   :  { %v1014_v31 = vmul.f32 1.442695, %v994_v25 }
 0x25a   :  { %v5536_v56 = vpop.eup %3840 }
 0x25b   :  { %3560 = vmatmul.msk.f32.gmra.mxu2 %vm763_vm0, %v5536_v56  ;;  %3842 = vpow2.f32 %v1014_v31  ;;  %3604 = vmatmul.msk.f32.gmra.mxu1 %vm763_vm0, %v5196_v33  ;;  %v6742_v33 = vld [vmem:[#allocation9_spill] sm:$0xff] }
 0x25c   :  { %3691 = vmatpush.xpose.msk.msra.mxu1 %vm763_vm0, %v5272_v45  ;;  %v5544_v45 = vpop.f32.mrf.mxu0 }
 0x25d   :  { %v1569_v32 = vsel %vm763_vm0, %v5544_v45, -inf }
 0x25e   :  { %v959_v20 = vpop.xlane.xlu0 %958  ;;  %1570 = vmax.xlane.f32.xlu0 %v1569_v32 }
 0x25f   :  { %v995_v27 = vsub.f32 %v5342_v29, %v959_v20  ;;  %3682 = vmatmul.msk.f32.gmra.mxu0 %vm763_vm0, %v6740_v34 }
 0x260   :  { %3692 = vmatpush.xpose.msk.msra.mxu1 %vm763_vm0, %v5350_v5  ;;  %v5555_v5 = vpop.f32.mrf.mxu1 }
 0x261   :  { %v5551_v44 = vpop.eup %3842  ;;  %v1016_v2 = vmul.f32 1.442695, %v995_v27 }
 0x262   :  { %6741 = vst [vmem:[#allocation29_spill] sm:$0xff] %v5551_v44 }
 0x263   :  { %3561 = vmatmul.msk.f32.gmra.mxu2 %vm763_vm0, %v5551_v44  ;;  %3844 = vpow2.f32 %v1016_v2  ;;  %3645 = vmatmul.msk.f32.vlgmr.msrb.gmra.mxu1 %vm763_vm0, %v6742_v33  ;;  %v6751_v33 = vld [vmem:[#allocation14_spill] sm:$0xff] }
 0x264   :  { %v5559_v62 = vpop.f32.mrf.mxu0 }
 0x265   :  { %v1572_v29 = vsel %vm763_vm0, %v5559_v62, -inf }
 0x266   :  { %v962_v41 = vpop.xlane.xlu2 %961  ;;  %1573 = vmax.xlane.f32.xlu1 %v1572_v29 }
 0x267   :  { %v996_v30 = vsub.f32 %v5356_v8, %v962_v41  ;;  %3683 = vmatmul.msk.f32.gmra.mxu0 %vm763_vm0, %v5177_v1 }
 0x268   :  { %v5574_v63 = vpop.f32.mrf.mxu1 }
 0x269   :  { %v5566_v17 = vpop.eup %3844  ;;  %v1018_v36 = vmul.f32 1.442695, %v996_v30 }
 0x26a   :  { %6743 = vst [vmem:[#allocation27_spill] sm:$0xff] %v5566_v17 }
 0x26b   :  { %3562 = vmatmul.msk.f32.gmra.mxu2 %vm763_vm0, %v5566_v17  ;;  %3846 = vpow2.f32 %v1018_v36  ;;  %3646 = vmatmul.msk.f32.gmra.mxu1 %vm763_vm0, %v6744_v43 }
 0x26c   :  { %v5572_v50 = vpop.f32.mrf.mxu0 }
 0x26d   :  { %v1575_v8 = vsel %vm763_vm0, %v5572_v50, -inf }
 0x26e   :  { %v965_v51 = vpop.xlane.xlu1 %964  ;;  %1576 = vmax.xlane.f32.xlu1 %v1575_v8  ;;  %v6753_v8 = vld [vmem:[#allocation21_spill] sm:$0xff] }
 0x26f   :  { %v997_v1 = vsub.f32 %v5362_v19, %v965_v51  ;;  %3684 = vmatmul.msk.f32.gmra.mxu0 %vm763_vm0, %v6745_v60 }
 0x270   :  { %v5591_v19 = vpop.f32.mrf.mxu1 }
 0x271   :  { %v5581_v12 = vpop.eup %3846  ;;  %v1020_v23 = vmul.f32 1.442695, %v997_v1 }
 0x272   :  { %6746 = vst [vmem:[#allocation34_spill] sm:$0xff] %v5581_v12 }
 0x273   :  { %3563 = vmatmul.msk.f32.gmra.mxu2 %vm763_vm0, %v5581_v12  ;;  %3848 = vpow2.f32 %v1020_v23  ;;  %3647 = vmatmul.msk.f32.gmra.mxu1 %vm763_vm0, %v6747_v40  ;;  %v6755_v40 = vld [vmem:[#allocation18_spill] sm:$0xff] }
 0x274   :  { %v5587_v28 = vpop.f32.mrf.mxu0 }
 0x275   :  { %v2231_v15 = vsel %vm763_vm0, %v5587_v28, -inf }
 0x276   :  { %v968_v3 = vpop.xlane.xlu0 %967  ;;  %2232 = vmax.xlane.f32.xlu0 %v2231_v15 }
 0x277   :  { %v998_v0 = vsub.f32 %v5370_v35, %v968_v3 }
 0x278   :  { %v5605_v35 = vpop.f32.mrf.mxu1 }
 0x279   :  { %v5594_v7 = vpop.eup %3848  ;;  %v1022_v25 = vmul.f32 1.442695, %v998_v0 }
 0x27a   :  { %6748 = vst [vmem:[#allocation23_spill] sm:$0xff] %v5594_v7 }
 0x27b   :  { %3564 = vmatmul.msk.f32.gmra.mxu2 %vm763_vm0, %v5594_v7  ;;  %3850 = vpow2.f32 %v1022_v25  ;;  %3648 = vmatmul.msk.f32.gmra.mxu1 %vm763_vm0, %v6749_v58 }
 0x27c   :  { %v5600_v31 = vpop.f32.mrf.mxu0 }
 0x27d   :  { %v2234_v32 = vsel %vm763_vm0, %v5600_v31, -inf }
 0x27e   :  { %v971_v20 = vpop.xlane.xlu0 %970  ;;  %2235 = vmax.xlane.f32.xlu0 %v2234_v32 }
 0x27f   :  { %v999_v27 = vsub.f32 %v5378_v52, %v971_v20 }
 0x281   :  { %v5607_v34 = vpop.eup %3850  ;;  %v1024_v2 = vmul.f32 1.442695, %v999_v27 }
 0x282   :  { %6750 = vst [vmem:[#allocation20_spill] sm:$0xff] %v5607_v34  ;;  %3565 = vmatmul.msk.f32.vlgmr.msrb.gmra.mxu3 %vm763_vm0, %v5607_v34 }
 0x283   :  { %3852 = vpow2.f32 %v1024_v2  ;;  %3649 = vmatmul.msk.f32.gmra.mxu1 %vm763_vm0, %v6751_v33  ;;  %2472 = vmatpush.msrb.mxu3 %v5605_v35 }
 0x284   :  { %v5614_v29 = vpop.f32.mrf.mxu0 }
 0x285   :  { %v2237_v41 = vsel %vm763_vm0, %v5614_v29, -inf  ;;  %2473 = vmatpush.msrb.mxu3 %v5591_v19 }
 0x286   :  { %v974_v52 = vpop.xlane.xlu1 %973  ;;  %2238 = vmax.xlane.f32.xlu0 %v2237_v41 }
 0x287   :  { %v1000_v30 = vsub.f32 %v5386_v53, %v974_v52  ;;  %2474 = vmatpush.msrb.mxu3 %v5574_v63 }
 0x289   :  { %v5621_v36 = vpop.eup %3852  ;;  %v1026_v43 = vmul.f32 1.442695, %v1000_v30  ;;  %2475 = vmatpush.msrb.mxu3 %v5555_v5 }
 0x28a   :  { %6752 = vst [vmem:[#allocation22_spill] sm:$0xff] %v5621_v36  ;;  %3566 = vmatmul.msk.f32.gmra.mxu3 %vm763_vm0, %v5621_v36 }
 0x28b   :  { %3854 = vpow2.f32 %v1026_v43  ;;  %3650 = vmatmul.msk.f32.gmra.mxu1 %vm763_vm0, %v6753_v8  ;;  %2476 = vmatpush.msrb.mxu3 %v5534_v18 }
 0x28c   :  { %v5629_v51 = vpop.f32.mrf.mxu0 }
 0x28d   :  { %2477 = vmatpush.msrb.mxu3 %v5510_v39 }
 0x28e   :  { %v977_v53 = vpop.xlane.xlu0 %976 }
 0x28f   :  { %v1001_v1 = vsub.f32 %v5396_v14, %v977_v53  ;;  %2478 = vmatpush.msrb.mxu3 %v5480_v46 }
 0x291   :  { %v5634_v60 = vpop.eup %3854  ;;  %v1028_v23 = vmul.f32 1.442695, %v1001_v1  ;;  %2479 = vmatpush.msrb.mxu3 %v5454_v9 }
 0x292   :  { %6754 = vst [vmem:[#allocation7_spill] sm:$0xff] %v5634_v60  ;;  %3567 = vmatmul.msk.f32.gmra.mxu3 %vm763_vm0, %v5634_v60 }
 0x293   :  { %3856 = vpow2.f32 %v1028_v23  ;;  %3651 = vmatmul.msk.f32.gmra.mxu1 %vm763_vm0, %v6755_v40  ;;  %v6760_v40 = vld [vmem:[#allocation30_spill] sm:$0xff] }
 0x294   :  { %v5641_v15 = vpop.f32.mrf.mxu0 }
 0x295   :  { %v2243_v3 = vsel %vm763_vm0, %v5641_v15, -inf }
 0x296   :  { %v980_v14 = vpop.xlane.xlu1 %979  ;;  %2244 = vmax.xlane.f32.xlu0 %v2243_v3 }
 0x297   :  { %v1002_v0 = vsub.f32 %v5405_v47, %v980_v14 }
 0x299   :  { %v5646_v25 = vpop.eup %3856  ;;  %v1030_v58 = vmul.f32 1.442695, %v1002_v0 }
 0x29a   :  { %6756 = vst [vmem:[#allocation8_spill] sm:$0xff] %v5646_v25  ;;  %3568 = vmatmul.msk.f32.gmra.mxu3 %vm763_vm0, %v5646_v25 }
 0x29b   :  { %3858 = vpow2.f32 %v1030_v58  ;;  %3652 = vmatmul.msk.f32.gmra.mxu1 %vm763_vm0, %v5239_v10  ;;  %v6758_v10 = vld [vmem:[#allocation32_spill] sm:$0xff] }
 0x29c   :  { %v5652_v32 = vpop.f32.mrf.mxu0 }
 0x29d   :  { %v2246_v20 = vsel %vm763_vm0, %v5652_v32, -inf }
 0x29e   :  { %v983_v27 = vpop.xlane.xlu0 %982  ;;  %2247 = vmax.xlane.f32.xlu0 %v2246_v20 }
 0x29f   :  { %v1003_v2 = vsub.f32 %v5417_v21, %v983_v27 }
 0x2a0   :  { %v5657_v47 = vpop.f32.mrf.mxu1 }
 0x2a1   :  { %v5659_v33 = vpop.eup %3858  ;;  %v1032_v41 = vmul.f32 1.442695, %v1003_v2  ;;  %v1578_v52 = vsel %vm763_vm0, %v5657_v47, -inf }
 0x2a2   :  { %6757 = vst [vmem:[#allocation11_spill] sm:$0xff] %v5659_v33  ;;  %1579 = vmax.xlane.f32.xlu2 %v1578_v52  ;;  %3569 = vmatmul.msk.f32.gmra.mxu3 %vm763_vm0, %v5659_v33 }
 0x2a3   :  { %3860 = vpow2.f32 %v1032_v41  ;;  %3693 = vmatmul.msk.f32.vlgmr.msra.gmra.mxu1 %vm763_vm0, %v6758_v10  ;;  %v6761_v41 = vld [vmem:[#allocation38_spill] sm:$0xff]  ;;  %v3796_v10 = vunpack.i.l.bf16 %v5435_v22 }
 0x2a4   :  { %v5667_v30 = vpop.f32.mrf.mxu0 }
 0x2a5   :  { %v2249_v21 = vsel %vm763_vm0, %v5667_v30, -inf }
 0x2a6   :  { %2250 = vmax.xlane.f32.xlu0 %v2249_v21 }
 0x2a8   :  { %v5671_v43 = vpop.f32.mrf.mxu1 }
 0x2a9   :  { %v5673_v8 = vpop.eup %3860  ;;  %v1556_v53 = vpop.xlane.xlu2 %1555  ;;  %v1581_v1 = vsel %vm763_vm0, %v5671_v43, -inf }
 0x2aa   :  { %6759 = vst [vmem:[#allocation13_spill] sm:$0xff] %v5673_v8  ;;  %v1602_v23 = vsub.f32 %v5439_v11, %v1556_v53  ;;  %1582 = vmax.xlane.f32.xlu1 %v1581_v1  ;;  %3570 = vmatmul.msk.f32.gmra.mxu3 %vm763_vm0, %v5673_v8  ;;  %v3797_v1 = vunpack.i.h.bf16 %v5435_v22  ;;  %v3802_v22 = vunpack.i.h.bf16 %v5425_v42 }
 0x2ab   :  { %3694 = vmatmul.msk.f32.gmra.mxu1 %vm763_vm0, %v6760_v40 }
 0x2ac   :  { %v1618_v3 = vmul.f32 1.442695, %v1602_v23  ;;  %v5682_v14 = vpop.f32.mrf.mxu0 }
 0x2ad   :  { %v2252_v0 = vsel %vm763_vm0, %v5682_v14, -inf }
 0x2ae   :  { %3862 = vpow2.f32 %v1618_v3  ;;  %2253 = vmax.xlane.f32.xlu0 %v2252_v0  ;;  %v989_v27 = vpop.xlane.xlu0 %988  ;;  %v2240_v0 = vsel %vm763_vm0, %v5629_v51, -inf }
 0x2af   :  { %v1005_v53 = vsub.f32 %v5448_v26, %v989_v27  ;;  %v6762_v27 = vld [vmem:[#allocation42_spill] sm:$0xff] }
 0x2b0   :  { %v5686_v58 = vpop.f32.mrf.mxu1 }
 0x2b1   :  { %v986_v20 = vpop.xlane.xlu2 %985  ;;  %v1584_v11 = vsel %vm763_vm0, %v5686_v58, -inf  ;;  %v1036_v40 = vmul.f32 1.442695, %v1005_v53 }
 0x2b2   :  { %v1004_v2 = vsub.f32 %v5431_v49, %v986_v20  ;;  %1585 = vmax.xlane.f32.xlu2 %v1584_v11  ;;  %v3801_v49 = vunpack.i.l.bf16 %v5425_v42 }
 0x2b3   :  { %3695 = vmatmul.msk.f32.gmra.mxu1 %vm763_vm0, %v6761_v41 }
 0x2b4   :  { %v5693_v52 = vpop.eup %3862  ;;  %v1034_v21 = vmul.f32 1.442695, %v1004_v2 }
 0x2b5   :  { %3605 = vmatmul.msk.f32.vlgmr.msra.gmra.mxu2 %vm763_vm0, %v5693_v52 }
 0x2b6   :  { %3864 = vpow2.f32 %v1034_v21  ;;  %3051 = vmatpush.msra.mxu2 %v3796_v10 }
 0x2b7   :  { %3866 = vpow2.f32 %v1036_v40 }
 0x2b8   :  { %v5700_v23 = vpop.f32.mrf.mxu1  ;;  %3052 = vmatpush.msra.mxu2 %v3797_v1 }
 0x2b9   :  { %v1559_v3 = vpop.xlane.xlu2 %1558  ;;  %v1587_v26 = vsel %vm763_vm0, %v5700_v23, -inf  ;;  %v1562_v11 = vpop.xlane.xlu0 %1561 }
 0x2ba   :  { %v1603_v20 = vsub.f32 %v5458_v55, %v1559_v3  ;;  %2241 = vmax.xlane.f32.xlu2 %v2240_v0  ;;  %1588 = vmax.xlane.f32.xlu1 %v1587_v26  ;;  %v1604_v55 = vsub.f32 %v5478_v38, %v1562_v11 }
 0x2bb   :  { %3696 = vmatmul.msk.f32.gmra.mxu1 %vm763_vm0, %v6762_v27  ;;  %3053 = vmatpush.msra.mxu2 %v3801_v49  ;;  %v6765_v49 = vld [vmem:[#allocation33_spill] sm:$0xff] }
 0x2bc   :  { %v5711_v2 = vpop.eup %3864  ;;  %v1620_v41 = vmul.f32 1.442695, %v1603_v20  ;;  %v1622_v21 = vmul.f32 1.442695, %v1604_v55 }
 0x2bd   :  { %6763 = vst [vmem:[#allocation16_spill] sm:$0xff] %v5711_v2  ;;  %3571 = vmatmul.msk.f32.gmra.mxu3 %vm763_vm0, %v5711_v2  ;;  %3054 = vmatpush.msra.mxu2 %v3802_v22  ;;  %v5720_v53 = vpop.eup %3866 }
 0x2be   :  { %3868 = vpow2.f32 %v1620_v41  ;;  %6764 = vst [vmem:[#allocation15_spill] sm:$0xff] %v5720_v53  ;;  %v3803_v41 = vpack.i.bf16 %v5141_v4, %v5158_v59 }
 0x2bf   :  { %3870 = vpow2.f32 %v1622_v21  ;;  %v6766_v21 = vld [vmem:[#allocation39_spill] sm:$0xff] }
 0x2c0   :  { %v5716_v10 = vpop.f32.mrf.mxu1 }
 0x2c1   :  { %v1590_v42 = vsel %vm763_vm0, %v5716_v10, -inf  ;;  %v1565_v1 = vpop.xlane.xlu2 %1564 }
 0x2c2   :  { %1591 = vmax.xlane.f32.xlu2 %v1590_v42  ;;  %v1605_v38 = vsub.f32 %v5503_v61, %v1565_v1  ;;  %v5742_v61 = vpop.f32.mrf.mxu0 }
 0x2c3   :  { %3697 = vmatmul.msk.f32.gmra.mxu1 %vm763_vm0, %v6765_v49 }
 0x2c4   :  { %v5724_v40 = vpop.eup %3868  ;;  %v1624_v20 = vmul.f32 1.442695, %v1605_v38 }
 0x2c5   :  { %3572 = vmatmul.msk.f32.gmra.mxu3 %vm763_vm0, %v5720_v53  ;;  %3606 = vmatmul.msk.f32.gmra.mxu2 %vm763_vm0, %v5724_v40  ;;  %v5737_v22 = vpop.eup %3870 }
 0x2c6   :  { %3872 = vpow2.f32 %v1624_v20 }
 0x2c8   :  { %v5731_v3 = vpop.f32.mrf.mxu1 }
 0x2c9   :  { %v1568_v0 = vpop.xlane.xlu0 %1567  ;;  %v1593_v26 = vsel %vm763_vm0, %v5731_v3, -inf }
 0x2ca   :  { %1594 = vmax.xlane.f32.xlu2 %v1593_v26  ;;  %v1606_v11 = vsub.f32 %v5525_v54, %v1568_v0  ;;  %v5762_v38 = vpop.f32.mrf.mxu0 }
 0x2cb   :  { %3698 = vmatmul.msk.f32.gmra.mxu1 %vm763_vm0, %v5165_v37 }
 0x2cc   :  { %v1626_v42 = vmul.f32 1.442695, %v1606_v11  ;;  %v5753_v1 = vpop.eup %3872 }
 0x2cd   :  { %3607 = vmatmul.msk.f32.gmra.mxu2 %vm763_vm0, %v5737_v22 }
 0x2ce   :  { %3874 = vpow2.f32 %v1626_v42 }
 0x2d0   :  { %v5744_v27 = vpop.f32.mrf.mxu1 }
 0x2d1   :  { %v1596_v55 = vsel %vm763_vm0, %v5744_v27, -inf  ;;  %v1571_v37 = vpop.xlane.xlu0 %1570 }
 0x2d2   :  { %1597 = vmax.xlane.f32.xlu2 %v1596_v55  ;;  %v1607_v54 = vsub.f32 %v5544_v45, %v1571_v37  ;;  %v5777_v37 = vpop.f32.mrf.mxu0 }
 0x2d3   :  { %3699 = vmatmul.msk.f32.gmra.mxu1 %vm763_vm0, %v6766_v21  ;;  %3804 = vrot.lane.b32.xlu1 %v3803_v41, %s4116_s13 }
 0x2d4   :  { %v1628_v0 = vmul.f32 1.442695, %v1607_v54  ;;  %v5766_v26 = vpop.eup %3874 }
 0x2d5   :  { %3608 = vmatmul.msk.f32.gmra.mxu2 %vm763_vm0, %v5753_v1 }
 0x2d6   :  { %3876 = vpow2.f32 %v1628_v0 }
 0x2d8   :  { %v5758_v4 = vpop.f32.mrf.mxu1 }
 0x2d9   :  { %v1574_v59 = vpop.xlane.xlu1 %1573  ;;  %v1599_v49 = vsel %vm763_vm0, %v5758_v4, -inf }
 0x2da   :  { %1600 = vmax.xlane.f32.xlu2 %v1599_v49  ;;  %v1608_v45 = vsub.f32 %v5559_v62, %v1574_v59  ;;  %v2846_v59 = vsel %vm763_vm0, %v5762_v38, -inf }
 0x2db   :  { %3700 = vmatmul.msk.f32.gmra.mxu1 %vm763_vm0, %v5464_v16 }
 0x2dc   :  { %v1630_v41 = vmul.f32 1.442695, %v1608_v45  ;;  %v5775_v42 = vpop.eup %3876  ;;  %v5792_v45 = vpop.f32.mrf.mxu0 }
 0x2dd   :  { %3609 = vmatmul.msk.f32.gmra.mxu2 %vm763_vm0, %v5766_v26 }
 0x2de   :  { %3878 = vpow2.f32 %v1630_v41 }
 0x2e0   :  { %v5771_v20 = vpop.f32.mrf.mxu1 }
 0x2e1   :  { %v2255_v11 = vsel %vm763_vm0, %v5771_v20, -inf  ;;  %v1577_v55 = vpop.xlane.xlu1 %1576 }
 0x2e2   :  { %2256 = vmax.xlane.f32.xlu0 %v2255_v11  ;;  %v1609_v16 = vsub.f32 %v5572_v50, %v1577_v55  ;;  %v2849_v55 = vsel %vm763_vm0, %v5777_v37, -inf }
 0x2e4   :  { %v1632_v49 = vmul.f32 1.442695, %v1609_v16  ;;  %v5788_v0 = vpop.eup %3878 }
 0x2e5   :  { %3610 = vmatmul.msk.f32.gmra.mxu2 %vm763_vm0, %v5775_v42 }
 0x2e6   :  { %3880 = vpow2.f32 %v1632_v49 }
 0x2e8   :  { %v5782_v21 = vpop.f32.mrf.mxu1 }
 0x2e9   :  { %v2233_v62 = vpop.xlane.xlu0 %2232  ;;  %v2258_v54 = vsel %vm763_vm0, %v5782_v21, -inf }
 0x2ea   :  { %2259 = vmax.xlane.f32.xlu2 %v2258_v54  ;;  %2847 = vmax.xlane.f32.xlu0 %v2846_v59  ;;  %v2279_v50 = vsub.f32 %v5587_v28, %v2233_v62  ;;  %v5804_v59 = vpop.f32.mrf.mxu0  ;;  %v2852_v28 = vsel %vm763_vm0, %v5792_v45, -inf }
 0x2ec   :  { %v2295_v53 = vmul.f32 1.442695, %v2279_v50  ;;  %v5799_v16 = vpop.eup %3880 }
 0x2ed   :  { %3611 = vmatmul.msk.f32.gmra.mxu2 %vm763_vm0, %v5788_v0 }
 0x2ee   :  { %3882 = vpow2.f32 %v2295_v53  ;;  %v2843_v53 = vsel %vm763_vm0, %v5742_v61, -inf }
 0x2f0   :  { %v5795_v11 = vpop.f32.mrf.mxu1 }
 0x2f1   :  { %v2236_v41 = vpop.xlane.xlu0 %2235 }
 0x2f2   :  { %2850 = vmax.xlane.f32.xlu2 %v2849_v55  ;;  %v2280_v54 = vsub.f32 %v5600_v31, %v2236_v41 }
 0x2f4   :  { %v2297_v50 = vmul.f32 1.442695, %v2280_v54  ;;  %v5812_v2 = vpop.eup %3882  ;;  %v2855_v54 = vsel %vm763_vm0, %v5804_v59, -inf }
 0x2f5   :  { %3612 = vmatmul.msk.f32.gmra.mxu2 %vm763_vm0, %v5799_v16 }
 0x2f6   :  { %3884 = vpow2.f32 %v2297_v50 }
 0x2f8   :  { %v5806_v49 = vpop.f32.mrf.mxu1 }
 0x2f9   :  { %v2264_v62 = vsel %vm763_vm0, %v5806_v49, -inf  ;;  %v2239_v55 = vpop.xlane.xlu0 %2238 }
 0x2fa   :  { %2853 = vmax.xlane.f32.xlu2 %v2852_v28  ;;  %2265 = vmax.xlane.f32.xlu0 %v2264_v62  ;;  %v2281_v31 = vsub.f32 %v5614_v29, %v2239_v55  ;;  %v5825_v62 = vpop.f32.mrf.mxu0 }
 0x2fb   :  { %v2858_v50 = vsel %vm763_vm0, %v5825_v62, -inf }
 0x2fc   :  { %v2299_v8 = vmul.f32 1.442695, %v2281_v31 }
 0x2fd   :  { %2844 = vmax.xlane.f32.xlu1 %v2843_v53  ;;  %3653 = vmatmul.msk.f32.vlgmr.msrb.gmra.mxu2 %vm763_vm0, %v5812_v2  ;;  %v5827_v53 = vpop.eup %3884 }
 0x2fe   :  { %3886 = vpow2.f32 %v2299_v8  ;;  %v3808_v8 = vpack.i.bf16 %v6738_v48, %v5119_v6 }
 0x300   :  { %v5819_v41 = vpop.f32.mrf.mxu1 }
 0x301   :  { %v2267_v28 = vsel %vm763_vm0, %v5819_v41, -inf }
 0x302   :  { %2856 = vmax.xlane.f32.xlu2 %v2855_v54  ;;  %2268 = vmax.xlane.f32.xlu0 %v2267_v28  ;;  %v5837_v25 = vpop.f32.mrf.mxu0 }
 0x304   :  { %v5835_v55 = vpop.eup %3886 }
 0x305   :  { %3654 = vmatmul.msk.f32.gmra.mxu2 %vm763_vm0, %v5827_v53 }
 0x308   :  { %v5831_v29 = vpop.f32.mrf.mxu1 }
 0x30a   :  { %2859 = vmax.xlane.f32.xlu0 %v2858_v50  ;;  %v5847_v33 = vpop.f32.mrf.mxu0 }
 0x30b   :  { %v2864_v34 = vsel %vm763_vm0, %v5847_v33, -inf }
 0x30d   :  { %3655 = vmatmul.msk.f32.gmra.mxu2 %vm763_vm0, %v5835_v55 }
 0x310   :  { %v5841_v31 = vpop.f32.mrf.mxu1 }
 0x311   :  { %v2273_v54 = vsel %vm763_vm0, %v5841_v31, -inf }
 0x312   :  { %2274 = vmax.xlane.f32.xlu2 %v2273_v54 }
 0x315   :  { %v1580_v28 = vpop.xlane.xlu2 %1579 }
 0x316   :  { %v1610_v50 = vsub.f32 %v5657_v47, %v1580_v28  ;;  %3809 = vrot.lane.b32.xlu1 %v3808_v8, %s4116_s13 }
 0x318   :  { %v1634_v60 = vmul.f32 1.442695, %v1610_v50  ;;  %v5851_v36 = vpop.f32.mrf.mxu1 }
 0x319   :  { %v2276_v12 = vsel %vm763_vm0, %v5851_v36, -inf }
 0x31a   :  { %3888 = vpow2.f32 %v1634_v60  ;;  %2865 = vmax.xlane.f32.xlu2 %v2864_v34  ;;  %2277 = vmax.xlane.f32.xlu0 %v2276_v12  ;;  %v2245_v60 = vpop.xlane.xlu0 %2244 }
 0x31d   :  { %v1583_v6 = vpop.xlane.xlu1 %1582 }
 0x31e   :  { %v1611_v48 = vsub.f32 %v5671_v43, %v1583_v6 }
 0x320   :  { %v5858_v54 = vpop.eup %3888  ;;  %v1636_v47 = vmul.f32 1.442695, %v1611_v48  ;;  %v5860_v28 = vpop.f32.mrf.mxu1 }
 0x321   :  { %3613 = vmatmul.msk.f32.vlgmr.msra.gmra.mxu3 %vm763_vm0, %v5858_v54  ;;  %v2867_v8 = vsel %vm763_vm0, %v5860_v28, -inf }
 0x322   :  { %3890 = vpow2.f32 %v1636_v47  ;;  %2868 = vmax.xlane.f32.xlu0 %v2867_v8  ;;  %v5875_v8 = vpop.f32.mrf.mxu2 }
 0x325   :  { %v1586_v50 = vpop.xlane.xlu2 %1585 }
 0x326   :  { %v1612_v34 = vsub.f32 %v5686_v58, %v1586_v50  ;;  %v3818_v58 = vpack.i.bf16 %v5555_v5, %v5574_v63  ;;  %v3828_v63 = vpack.i.bf16 %v5454_v9, %v5480_v46 }
 0x328   :  { %v5867_v12 = vpop.eup %3890  ;;  %v1638_v43 = vmul.f32 1.442695, %v1612_v34  ;;  %v5871_v6 = vpop.f32.mrf.mxu1 }
 0x329   :  { %6767 = vst [vmem:[#allocation28_spill] sm:$0xff] %v5867_v12  ;;  %3614 = vmatmul.msk.f32.gmra.mxu3 %vm763_vm0, %v5867_v12  ;;  %v2283_v12 = vsub.f32 %v5641_v15, %v2245_v60 }
 0x32a   :  { %3892 = vpow2.f32 %v1638_v43  ;;  %v2248_v43 = vpop.xlane.xlu0 %2247 }
 0x32d   :  { %v2242_v48 = vpop.xlane.xlu2 %2241  ;;  %v1589_v7 = vpop.xlane.xlu1 %1588 }
 0x32e   :  { %v2282_v17 = vsub.f32 %v5629_v51, %v2242_v48  ;;  %v1613_v47 = vsub.f32 %v5700_v23, %v1589_v7  ;;  %v3823_v7 = vpack.i.bf16 %v5510_v39, %v5534_v18  ;;  %v2303_v51 = vmul.f32 1.442695, %v2283_v12 }
 0x32f   :  { %v2284_v39 = vsub.f32 %v5652_v32, %v2248_v43  ;;  %v2261_v32 = vsel %vm763_vm0, %v5795_v11, -inf }
 0x330   :  { %v5877_v44 = vpop.eup %3892  ;;  %v2301_v50 = vmul.f32 1.442695, %v2282_v17  ;;  %v1640_v34 = vmul.f32 1.442695, %v1613_v47  ;;  %v5887_v23 = vpop.f32.mrf.mxu1 }
 0x331   :  { %3615 = vmatmul.msk.f32.gmra.mxu3 %vm763_vm0, %v5877_v44  ;;  %v5897_v47 = vpop.f32.mrf.mxu2 }
 0x332   :  { %3894 = vpow2.f32 %v2301_v50  ;;  %3819 = vrot.lane.b32.xlu2 %v3818_v58, %s4116_s13  ;;  %v2251_v18 = vpop.xlane.xlu0 %2250 }
 0x333   :  { %3896 = vpow2.f32 %v1640_v34  ;;  %v2285_v43 = vsub.f32 %v5667_v30, %v2251_v18  ;;  %v2270_v30 = vsel %vm763_vm0, %v5831_v29, -inf }
 0x334   :  { %3898 = vpow2.f32 %v2303_v51 }
 0x335   :  { %v1592_v48 = vpop.xlane.xlu2 %1591 }
 0x336   :  { %v1614_v5 = vsub.f32 %v5716_v10, %v1592_v48  ;;  %3824 = vrot.lane.b32.xlu0 %v3823_v7, %s4116_s13  ;;  %v2305_v10 = vmul.f32 1.442695, %v2284_v39  ;;  %v2307_v7 = vmul.f32 1.442695, %v2285_v43 }
 0x338   :  { %v5891_v17 = vpop.eup %3894  ;;  %v1642_v15 = vmul.f32 1.442695, %v1614_v5  ;;  %v5908_v58 = vpop.f32.mrf.mxu1 }
 0x339   :  { %v5895_v60 = vpop.eup %3896  ;;  %3656 = vmatmul.msk.f32.gmra.mxu2 %vm763_vm0, %v5891_v17 }
 0x33a   :  { %3900 = vpow2.f32 %v1642_v15  ;;  %3616 = vmatmul.msk.f32.gmra.mxu3 %vm763_vm0, %v5895_v60  ;;  %3829 = vrot.lane.b32.xlu2 %v3828_v63, %s4116_s13  ;;  %v5906_v12 = vpop.eup %3898  ;;  %v2254_v5 = vpop.xlane.xlu0 %2253 }
 0x33b   :  { %3902 = vpow2.f32 %v2305_v10 }
 0x33d   :  { %v1595_v9 = vpop.xlane.xlu2 %1594 }
 0x33e   :  { %v1615_v46 = vsub.f32 %v5731_v3, %v1595_v9  ;;  %v5919_v3 = vpop.f32.mrf.mxu2 }
 0x340   :  { %v5912_v50 = vpop.eup %3900  ;;  %v1644_v34 = vmul.f32 1.442695, %v1615_v46  ;;  %2262 = vmax.xlane.f32.xlu1 %v2261_v32  ;;  %v2286_v46 = vsub.f32 %v5682_v14, %v2254_v5  ;;  %v5929_v32 = vpop.f32.mrf.mxu1  ;;  %v2861_v14 = vsel %vm763_vm0, %v5837_v25, -inf }
 0x341   :  { %3657 = vmatmul.msk.f32.gmra.mxu2 %vm763_vm0, %v5906_v12  ;;  %v5922_v39 = vpop.eup %3902 }
 0x342   :  { %3904 = vpow2.f32 %v1644_v34  ;;  %3617 = vmatmul.msk.f32.gmra.mxu3 %vm763_vm0, %v5912_v50  ;;  %v2309_v34 = vmul.f32 1.442695, %v2286_v46 }
 0x343   :  { %3906 = vpow2.f32 %v2307_v7 }
 0x345   :  { %v1598_v51 = vpop.xlane.xlu2 %1597  ;;  %v3805_v48 = vpop.permute.xlu1 %3804 }
 0x346   :  { %v1616_v63 = vsub.f32 %v5744_v27, %v1598_v51  ;;  %v3806_v15 = vunpack.i.l.bf16 %v3805_v48  ;;  %v3807_v9 = vunpack.i.h.bf16 %v3805_v48  ;;  %v5935_v27 = vpop.f32.mrf.mxu2 }
 0x348   :  { %v5926_v18 = vpop.eup %3904  ;;  %v1646_v10 = vmul.f32 1.442695, %v1616_v63  ;;  %2271 = vmax.xlane.f32.xlu1 %v2270_v30  ;;  %3055 = vmatpush.msra.mxu2 %v3806_v15  ;;  %v5948_v63 = vpop.f32.mrf.mxu1 }
 0x349   :  { %6768 = vst [vmem:[#allocation24_spill] sm:$0xff] %v5926_v18  ;;  %3658 = vmatmul.msk.f32.gmra.mxu2 %vm763_vm0, %v5922_v39  ;;  %v5938_v48 = vpop.eup %3906 }
 0x34a   :  { %3908 = vpow2.f32 %v1646_v10  ;;  %3618 = vmatmul.msk.f32.gmra.mxu3 %vm763_vm0, %v5926_v18  ;;  %3056 = vmatpush.msra.mxu2 %v3807_v9 }
 0x34b   :  { %3910 = vpow2.f32 %v2309_v34 }
 0x34d   :  { %v1601_v43 = vpop.xlane.xlu2 %1600 }
 0x34e   :  { %v1617_v51 = vsub.f32 %v5758_v4, %v1601_v43  ;;  %v5953_v10 = vpop.f32.mrf.mxu2 }
 0x350   :  { %v5942_v7 = vpop.eup %3908  ;;  %v1648_v5 = vmul.f32 1.442695, %v1617_v51  ;;  %2862 = vmax.xlane.f32.xlu1 %v2861_v14  ;;  %v5961_v34 = vpop.f32.mrf.mxu1 }
 0x351   :  { %6769 = vst [vmem:[#allocation25_spill] sm:$0xff] %v5942_v7  ;;  %3659 = vmatmul.msk.f32.gmra.mxu2 %vm763_vm0, %v5938_v48  ;;  %v5951_v30 = vpop.eup %3910 }
 0x352   :  { %3912 = vpow2.f32 %v1648_v5  ;;  %3619 = vmatmul.msk.f32.gmra.mxu3 %vm763_vm0, %v5942_v7 }
 0x355   :  { %v2257_v4 = vpop.xlane.xlu0 %2256 }
 0x356   :  { %v2287_v15 = vsub.f32 %v5771_v20, %v2257_v4  ;;  %v2873_v20 = vsel %vm763_vm0, %v5887_v23, -inf  ;;  %v5968_v4 = vpop.f32.mrf.mxu2 }
 0x358   :  { %v5955_v9 = vpop.eup %3912  ;;  %v2311_v46 = vmul.f32 1.442695, %v2287_v15  ;;  %v2876_v15 = vsel %vm763_vm0, %v5908_v58, -inf  ;;  %v5977_v7 = vpop.f32.mrf.mxu1 }
 0x359   :  { %6770 = vst [vmem:[#allocation19_spill] sm:$0xff] %v5955_v9  ;;  %3660 = vmatmul.msk.f32.gmra.mxu2 %vm763_vm0, %v5951_v30 }
 0x35a   :  { %3914 = vpow2.f32 %v2311_v46  ;;  %3620 = vmatmul.msk.f32.gmra.mxu3 %vm763_vm0, %v5955_v9  ;;  %v3813_v9 = vpack.i.bf16 %v5591_v19, %v5605_v35 }
 0x35d   :  { %v2260_v43 = vpop.xlane.xlu2 %2259  ;;  %v2848_v46 = vpop.xlane.xlu0 %2847 }
 0x35e   :  { %v2288_v51 = vsub.f32 %v5782_v21, %v2260_v43  ;;  %v2892_v21 = vsub.f32 %v5762_v38, %v2848_v46  ;;  %v2888_v38 = vsel %vm763_vm0, %v5977_v7, -inf  ;;  %v5989_v19 = vpop.f32.mrf.mxu2 }
 0x35f   :  { %6772 = vst [vmem:[#allocation36_spill] sm:$0xff] %v5989_v19 }
 0x360   :  { %v5966_v14 = vpop.eup %3914  ;;  %v2313_v5 = vmul.f32 1.442695, %v2288_v51  ;;  %2874 = vmax.xlane.f32.xlu0 %v2873_v20  ;;  %v2882_v51 = vsel %vm763_vm0, %v5948_v63, -inf  ;;  %v2909_v18 = vmul.f32 1.442695, %v2892_v21 }
 0x362   :  { %3916 = vpow2.f32 %v2313_v5  ;;  %3661 = vmatmul.msk.f32.vlgmr.msrb.gmra.mxu3 %vm763_vm0, %v5966_v14 }
 0x363   :  { %2877 = vmax.xlane.f32.xlu2 %v2876_v15  ;;  %3918 = vpow2.f32 %v2909_v18  ;;  %v1650_v15 = vsel %vm763_vm0, %v5693_v52, 0.0 }
 0x365   :  { %v2851_v43 = vpop.xlane.xlu2 %2850 }
 0x366   :  { %v2893_v5 = vsub.f32 %v5777_v37, %v2851_v43  ;;  %v5995_v21 = vpop.f32.mrf.mxu2 }
 0x368   :  { %v5981_v20 = vpop.eup %3916  ;;  %2883 = vmax.xlane.f32.xlu0 %v2882_v51  ;;  %v2911_v35 = vmul.f32 1.442695, %v2893_v5 }
 0x369   :  { %6771 = vst [vmem:[#allocation26_spill] sm:$0xff] %v5981_v20  ;;  %3814 = vrot.lane.b32.xlu1 %v3813_v9, %s4116_s13  ;;  %v1653_v9 = vsel %vm763_vm0, %v5724_v40, 0.0  ;;  %v3919_v46 = vpop.eup %3918  ;;  %v1659_v40 = vsel %vm763_vm0, %v5753_v1, 0.0  ;;  %v1665_v1 = vsel %vm763_vm0, %v5775_v42, 0.0  ;;  %v2870_v42 = vsel %vm763_vm0, %v5871_v6, -inf }
 0x36a   :  { %3662 = vmatmul.msk.f32.gmra.mxu3 %vm763_vm0, %v5981_v20  ;;  %3920 = vpow2.f32 %v2911_v35  ;;  %v2942_v51 = vsel %vm763_vm0, %v3919_v46, 0.0  ;;  %v1662_v20 = vsel %vm763_vm0, %v5766_v26, 0.0 }
 0x36b   :  { %2889 = vmax.xlane.f32.xlu2 %v2888_v38 }
 0x36d   :  { %v2854_v37 = vpop.xlane.xlu2 %2853 }
 0x36e   :  { %v5999_v52 = vpop.f32.mrf.mxu2 }
 0x370   :  { %1651 = vadd.xlane.f32.xlu0 %v1650_v15  ;;  %v3921_v43 = vpop.eup %3920  ;;  %v2845_v38 = vpop.xlane.xlu1 %2844 }
 0x371   :  { %v2945_v5 = vsel %vm763_vm0, %v3921_v43, 0.0  ;;  %v2891_v15 = vsub.f32 %v5742_v61, %v2845_v38 }
 0x373   :  { %1654 = vadd.xlane.f32.xlu2 %v1653_v9 }
 0x375   :  { %v2857_v18 = vpop.xlane.xlu2 %2856 }
 0x376   :  { %v2895_v35 = vsub.f32 %v5804_v59, %v2857_v18  ;;  %v6007_v19 = vpop.f32.mrf.mxu2 }
 0x378   :  { %2943 = vadd.xlane.f32.xlu0 %v2942_v51  ;;  %v2915_v9 = vmul.f32 1.442695, %v2895_v35  ;;  %v2907_v51 = vmul.f32 1.442695, %v2891_v15  ;;  %v2266_v15 = vpop.xlane.xlu0 %2265 }
 0x37a   :  { %3922 = vpow2.f32 %v2915_v9  ;;  %v1668_v9 = vsel %vm763_vm0, %v5788_v0, 0.0 }
 0x37b   :  { %2946 = vadd.xlane.f32.xlu2 %v2945_v5  ;;  %3924 = vpow2.f32 %v2907_v51  ;;  %v2327_v5 = vsel %vm763_vm0, %v5812_v2, 0.0  ;;  %v1041_v2 = vsel %vm763_vm0, %v5493_v13, 0.0 }
 0x380   :  { %1660 = vadd.xlane.f32.xlu0 %v1659_v40  ;;  %v3923_v38 = vpop.eup %3922  ;;  %v2894_v40 = vsub.f32 %v5792_v45, %v2854_v37 }
 0x381   :  { %v3925_v26 = vpop.eup %3924  ;;  %v2951_v35 = vsel %vm763_vm0, %v3923_v38, 0.0 }
 0x382   :  { %v2913_v13 = vmul.f32 1.442695, %v2894_v40 }
 0x383   :  { %1663 = vadd.xlane.f32.xlu2 %v1662_v20  ;;  %v6014_v20 = vpop.f32.mrf.mxu2 }
 0x384   :  { %3926 = vpow2.f32 %v2913_v13 }
 0x388   :  { %2328 = vadd.xlane.f32.xlu0 %v2327_v5  ;;  %v3810_v59 = vpop.permute.xlu1 %3809  ;;  %v2269_v5 = vpop.xlane.xlu0 %2268 }
 0x389   :  { %v3811_v61 = vunpack.i.l.bf16 %v3810_v59  ;;  %v3812_v18 = vunpack.i.h.bf16 %v3810_v59  ;;  %v2879_v59 = vsel %vm763_vm0, %v5929_v32, -inf }
 0x38a   :  { %v3927_v0 = vpop.eup %3926 }
 0x38b   :  { %1666 = vadd.xlane.f32.xlu2 %v1665_v1  ;;  %3057 = vmatpush.msra.mxu2 %v3811_v61  ;;  %v6025_v51 = vpop.f32.mrf.mxu2  ;;  %v2939_v1 = vsel %vm763_vm0, %v3925_v26, 0.0 }
 0x38d   :  { %3058 = vmatpush.msra.mxu2 %v3812_v18 }
 0x38e   :  { %3701 = vmatmul.msk.f32.vlgmr.msra.gmra.mxu2 %vm763_vm0, %v3925_v26  ;;  %v2290_v26 = vsub.f32 %v5806_v49, %v2266_v15  ;;  %v1038_v49 = vsel %vm763_vm0, %v5470_v24, 0.0 }
 0x390   :  { %2952 = vadd.xlane.f32.xlu0 %v2951_v35  ;;  %v2860_v45 = vpop.xlane.xlu0 %2859 }
 0x391   :  { %v2896_v37 = vsub.f32 %v5825_v62, %v2860_v45 }
 0x393   :  { %1042 = vadd.xlane.f32.xlu2 %v1041_v2  ;;  %2871 = vmax.xlane.f32.xlu1 %v2870_v42  ;;  %v6032_v61 = vpop.f32.mrf.mxu2  ;;  %v2917_v18 = vmul.f32 1.442695, %v2896_v37  ;;  %v1656_v2 = vsel %vm763_vm0, %v5737_v22, 0.0  ;;  %v2317_v22 = vmul.f32 1.442695, %v2290_v26 }
 0x395   :  { %3928 = vpow2.f32 %v2917_v18 }
 0x396   :  { %3702 = vmatmul.msk.f32.gmra.mxu2 %vm763_vm0, %v3919_v46  ;;  %v2885_v46 = vsel %vm763_vm0, %v5961_v34, -inf }
 0x398   :  { %1669 = vadd.xlane.f32.xlu0 %v1668_v9  ;;  %v2278_v13 = vpop.xlane.xlu0 %2277 }
 0x39b   :  { %2880 = vmax.xlane.f32.xlu1 %v2879_v59  ;;  %v6037_v35 = vpop.f32.mrf.mxu2  ;;  %v3929_v9 = vpop.eup %3928 }
 0x39c   :  { %v2954_v24 = vsel %vm763_vm0, %v3929_v9, 0.0 }
 0x39e   :  { %3703 = vmatmul.msk.f32.gmra.mxu2 %vm763_vm0, %v3921_v43  ;;  %v2275_v43 = vpop.xlane.xlu2 %2274 }
 0x3a0   :  { %v2869_v18 = vpop.xlane.xlu0 %2868 }
 0x3a3   :  { %2886 = vmax.xlane.f32.xlu1 %v2885_v46  ;;  %v6044_v62 = vpop.f32.mrf.mxu2  ;;  %v2948_v46 = vsel %vm763_vm0, %v3927_v0, 0.0 }
 0x3a6   :  { %3704 = vmatmul.msk.f32.gmra.mxu2 %vm763_vm0, %v3927_v0 }
 0x3ab   :  { %2940 = vadd.xlane.f32.xlu1 %v2939_v1  ;;  %v6053_v1 = vpop.f32.mrf.mxu2 }
 0x3ae   :  { %3705 = vmatmul.msk.f32.gmra.mxu2 %vm763_vm0, %v3923_v38  ;;  %v2866_v38 = vpop.xlane.xlu2 %2865 }
 0x3b3   :  { %1657 = vadd.xlane.f32.xlu1 %v1656_v2  ;;  %v2263_v42 = vpop.xlane.xlu1 %2262  ;;  %v6067_v26 = vpop.f32.mrf.mxu2 }
 0x3b4   :  { %v2289_v40 = vsub.f32 %v5795_v11, %v2263_v42  ;;  %v2291_v11 = vsub.f32 %v5819_v41, %v2269_v5  ;;  %v2898_v5 = vsub.f32 %v5847_v33, %v2866_v38 }
 0x3b6   :  { %v2315_v59 = vmul.f32 1.442695, %v2289_v40  ;;  %3706 = vmatmul.msk.f32.gmra.mxu2 %vm763_vm0, %v3929_v9  ;;  %v2319_v15 = vmul.f32 1.442695, %v2291_v11  ;;  %v6057_v2 = vpop.permute.xlu2 %3819  ;;  %v2330_v9 = vsel %vm763_vm0, %v5827_v53, 0.0  ;;  %v2294_v53 = vsub.f32 %v5851_v36, %v2278_v13 }
 0x3b7   :  { %v1671_v36 = vsel %vm763_vm0, %v5799_v16, 0.0  ;;  %v3822_v13 = vunpack.i.h.bf16 %v6057_v2 }
 0x3b8   :  { %3930 = vpow2.f32 %v2315_v59 }
 0x3b9   :  { %3932 = vpow2.f32 %v2317_v22  ;;  %v6069_v22 = vpop.permute.xlu0 %3824 }
 0x3ba   :  { %3934 = vpow2.f32 %v2319_v15  ;;  %v3827_v16 = vunpack.i.h.bf16 %v6069_v22 }
 0x3bb   :  { %2949 = vadd.xlane.f32.xlu1 %v2948_v46  ;;  %v2272_v45 = vpop.xlane.xlu1 %2271  ;;  %v2921_v46 = vmul.f32 1.442695, %v2898_v5 }
 0x3bc   :  { %v2292_v59 = vsub.f32 %v5831_v29, %v2272_v45  ;;  %v2293_v29 = vsub.f32 %v5841_v31, %v2275_v43  ;;  %v1044_v31 = vsel %vm763_vm0, %v5516_v57, 0.0  ;;  %v2899_v43 = vsub.f32 %v5860_v28, %v2869_v18 }
 0x3bd   :  { %v3821_v28 = vunpack.i.l.bf16 %v6057_v2  ;;  %v2336_v18 = vsel %vm763_vm0, %v5891_v17, 0.0 }
 0x3be   :  { %v6048_v37 = vpop.eup %3930  ;;  %v6073_v15 = vpop.permute.xlu2 %3829  ;;  %v2323_v45 = vmul.f32 1.442695, %v2293_v29 }
 0x3bf   :  { %3663 = vmatmul.msk.f32.gmra.mxu3 %vm763_vm0, %v6048_v37  ;;  %v6060_v40 = vpop.eup %3932  ;;  %v3831_v17 = vunpack.i.l.bf16 %v6073_v15 }
 0x3c0   :  { %v6071_v11 = vpop.eup %3934 }
 0x3c3   :  { %1039 = vadd.xlane.f32.xlu1 %v1038_v49  ;;  %v2863_v0 = vpop.xlane.xlu1 %2862 }
 0x3c4   :  { %v2897_v42 = vsub.f32 %v5837_v25, %v2863_v0  ;;  %v2321_v25 = vmul.f32 1.442695, %v2292_v59 }
 0x3c6   :  { %v2919_v41 = vmul.f32 1.442695, %v2897_v42  ;;  %v6084_v42 = vpop.f32.mrf.mxu2 }
 0x3c7   :  { %3664 = vmatmul.msk.f32.gmra.mxu3 %vm763_vm0, %v6060_v40 }
 0x3c8   :  { %3936 = vpow2.f32 %v2919_v41 }
 0x3c9   :  { %3938 = vpow2.f32 %v2921_v46 }
 0x3ca   :  { %3940 = vpow2.f32 %v2321_v25  ;;  %v2325_v25 = vmul.f32 1.442695, %v2294_v53 }
 0x3cb   :  { %2955 = vadd.xlane.f32.xlu1 %v2954_v24  ;;  %3942 = vpow2.f32 %v2323_v45 }
 0x3cc   :  { %3944 = vpow2.f32 %v2325_v25 }
 0x3ce   :  { %v3937_v49 = vpop.eup %3936  ;;  %v6104_v57 = vpop.f32.mrf.mxu2 }
 0x3cf   :  { %3665 = vmatmul.msk.f32.gmra.mxu3 %vm763_vm0, %v6071_v11  ;;  %3707 = vmatmul.msk.f32.gmra.mxu2 %vm763_vm0, %v3937_v49  ;;  %v2957_v33 = vsel %vm763_vm0, %v3937_v49, 0.0  ;;  %v3939_v0 = vpop.eup %3938 }
 0x3d0   :  { %2958 = vadd.xlane.f32.xlu0 %v2957_v33  ;;  %v6086_v41 = vpop.eup %3940  ;;  %v2960_v59 = vsel %vm763_vm0, %v3939_v0, 0.0  ;;  %v2923_v33 = vmul.f32 1.442695, %v2899_v43 }
 0x3d1   :  { %6773 = vst [vmem:[#allocation31_spill] sm:$0xff] %v6086_v41  ;;  %v6100_v29 = vpop.eup %3942 }
 0x3d2   :  { %3946 = vpow2.f32 %v2923_v33 }
 0x3d3   :  { %v6082_v38 = vpop.xlane.xlu0 %2874  ;;  %2331 = vadd.xlane.f32.xlu1 %v2330_v9 }
 0x3d6   :  { %v6088_v5 = vpop.xlane.xlu2 %2877 }
 0x3d7   :  { %3666 = vmatmul.msk.f32.gmra.mxu3 %vm763_vm0, %v6086_v41  ;;  %3708 = vmatmul.msk.f32.gmra.mxu2 %vm763_vm0, %v3939_v0  ;;  %v3826_v0 = vunpack.i.l.bf16 %v6069_v22 }
 0x3d8   :  { %1045 = vadd.xlane.f32.xlu0 %v1044_v31  ;;  %v6115_v31 = vpop.eup %3944 }
 0x3d9   :  { %v3947_v43 = vpop.eup %3946 }
 0x3da   :  { %v2963_v25 = vsel %vm763_vm0, %v3947_v43, 0.0 }
 0x3db   :  { %v6098_v24 = vpop.xlane.xlu0 %2883  ;;  %2961 = vadd.xlane.f32.xlu1 %v2960_v59  ;;  %v3815_v46 = vpop.permute.xlu1 %3814 }
 0x3dc   :  { %v3816_v49 = vunpack.i.l.bf16 %v3815_v46  ;;  %v3817_v9 = vunpack.i.h.bf16 %v3815_v46  ;;  %v6118_v59 = vpop.f32.mrf.mxu2  ;;  %v3832_v46 = vunpack.i.h.bf16 %v6073_v15 }
 0x3de   :  { %v6102_v41 = vpop.xlane.xlu2 %2889  ;;  %3148 = vmatpush.msra.mxu3 %v3816_v49 }
 0x3df   :  { %3667 = vmatmul.msk.f32.gmra.mxu3 %vm763_vm0, %v6100_v29 }
 0x3e0   :  { %1672 = vadd.xlane.f32.xlu0 %v1671_v36  ;;  %3149 = vmatpush.msra.mxu3 %v3817_v9  ;;  %v6131_v36 = vpop.f32.mrf.mxu3 }
 0x3e2   :  { %3150 = vmatpush.msra.mxu3 %v3821_v28 }
 0x3e3   :  { %v1652_v45 = vpop.xlane.xlu0 %1651  ;;  %2337 = vadd.xlane.f32.xlu1 %v2336_v18 }
 0x3e4   :  { %3948 = vrcp.f32 %v1652_v45  ;;  %3151 = vmatpush.msra.mxu3 %v3822_v13  ;;  %v6134_v28 = vpop.f32.mrf.mxu2 }
 0x3e6   :  { %v1655_v53 = vpop.xlane.xlu2 %1654  ;;  %3152 = vmatpush.msra.mxu3 %v3826_v0 }
 0x3e7   :  { %3668 = vmatmul.msk.f32.gmra.mxu3 %vm763_vm0, %v6115_v31  ;;  %3950 = vrcp.f32 %v1655_v53 }
 0x3e8   :  { %3153 = vmatpush.msra.mxu3 %v3827_v16 }
 0x3ea   :  { %v3949_v2 = vpop.eup %3948  ;;  %3154 = vmatpush.msra.mxu3 %v3831_v17 }
 0x3eb   :  { %v6125_v49 = vpop.xlane.xlu0 %2943  ;;  %2964 = vadd.xlane.f32.xlu1 %v2963_v25  ;;  %v1908_v22 = vmul.f32 %v3949_v2, %v5999_v52 }
 0x3ec   :  { %3155 = vmatpush.msra.mxu3 %v3832_v46  ;;  %v6142_v52 = vpop.f32.mrf.mxu2  ;;  %v6151_v46 = vpop.f32.mrf.mxu3 }
 0x3ed   :  { %1940 = vrot.lane.b32.xlu2 %v1908_v22, %s4116_s13  ;;  %v3951_v9 = vpop.eup %3950  ;;  %v2901_v22 = vsub.f32 %v5887_v23, %v6082_v38  ;;  %v3339_v23 = vld [vmem:[%s6636_s3 + $0x70] sm:$0xff]  ;;  %v3338_v38 = vld [vmem:[%s6636_s3 + $0x68] sm:$0xff] }
 0x3ee   :  { %v6129_v33 = vpop.xlane.xlu2 %2946  ;;  %v1909_v15 = vmul.f32 %v3951_v9, %v6007_v19 }
 0x3ef   :  { %3709 = vmatmul.msk.f32.vlgmr.msra.gmra.mxu3 %vm763_vm0, %v3947_v43 }
 0x3f3   :  { %v6137_v13 = vpop.xlane.xlu0 %1660 }
 0x3f4   :  { %1942 = vrot.lane.b32.xlu0 %v1909_v15, %s4116_s13  ;;  %v6147_v43 = vpop.f32.mrf.mxu2 }
 0x3f6   :  { %v6140_v18 = vpop.xlane.xlu2 %1663 }
 0x3fb   :  { %v2329_v45 = vpop.xlane.xlu0 %2328 }
 0x3fc   :  { %3952 = vrcp.f32 %v2329_v45  ;;  %v2927_v45 = vmul.f32 1.442695, %v2901_v22 }
 0x3fe   :  { %v6144_v0 = vpop.xlane.xlu2 %1666 }
 0x402   :  { %v3953_v16 = vpop.eup %3952 }
 0x403   :  { %v2521_v53 = vmul.f32 %v3953_v16, %v6067_v26  ;;  %v6156_v16 = vpop.f32.mrf.mxu2 }
 0x405   :  { %2537 = vst.msk [vmem:[#allocation3 + $0x8] sm:$0xff] %vm763_vm0, %v2521_v53 }
 0x406   :  { %v1043_v19 = vpop.xlane.xlu2 %1042  ;;  %v2872_v17 = vpop.xlane.xlu1 %2871 }
 0x407   :  { %3954 = vrcp.f32 %v1043_v19  ;;  %v2900_v2 = vsub.f32 %v5871_v6, %v2872_v17  ;;  %v6161_v19 = vpop.f32.mrf.mxu3  ;;  %v3340_v6 = vld [vmem:[%s6636_s3 + $0x78] sm:$0xff]  ;;  %v2333_v17 = vsel %vm763_vm0, %v5835_v55, 0.0  ;;  %v3335_v55 = vld [vmem:[%s6636_s3 + $0x50] sm:$0xff] }
 0x408   :  { %3361 = vmatpush.msrb.mxu0 %v3340_v6  ;;  %v3334_v6 = vld [vmem:[%s6636_s3 + $0x48] sm:$0xff] }
 0x409   :  { %v2925_v25 = vmul.f32 1.442695, %v2900_v2 }
 0x40a   :  { %3362 = vmatpush.msrb.mxu0 %v3339_v23  ;;  %v1674_v23 = vsel %vm763_vm0, %v5858_v54, 0.0 }
 0x40b   :  { %3956 = vpow2.f32 %v2925_v25 }
 0x40c   :  { %3958 = vpow2.f32 %v2927_v45  ;;  %3363 = vmatpush.msrb.mxu0 %v3338_v38 }
 0x40d   :  { %v3955_v9 = vpop.eup %3954 }
 0x40e   :  { %v2881_v15 = vpop.xlane.xlu1 %2880  ;;  %v1233_v26 = vmul.f32 %v3955_v9, %v5897_v47  ;;  %v2902_v47 = vsub.f32 %v5908_v58, %v6088_v5  ;;  %v3337_v9 = vld [vmem:[%s6636_s3 + $0x60] sm:$0xff]  ;;  %v3336_v58 = vld [vmem:[%s6636_s3 + $0x58] sm:$0xff] }
 0x40f   :  { %3364 = vmatpush.msrb.mxu0 %v3337_v9  ;;  %v2903_v5 = vsub.f32 %v5929_v32, %v2881_v15  ;;  %v6192_v45 = vpop.f32.mrf.mxu3  ;;  %v3333_v32 = vld [vmem:[%s6636_s3 + $0x40] sm:$0xff]  ;;  %v3332_v15 = vld [vmem:[%s6636_s3 + $0x38] sm:$0xff]  ;;  %v3331_v9 = vld [vmem:[%s6636_s3 + $0x30] sm:$0xff] }
 0x410   :  { %1249 = vst.msk [vmem:[#allocation3 + $0x10] sm:$0xff] %vm763_vm0, %v1233_v26  ;;  %v2929_v25 = vmul.f32 1.442695, %v2902_v47  ;;  %v1047_v47 = vsel %vm763_vm0, %v5536_v56, 0.0  ;;  %v2904_v56 = vsub.f32 %v5948_v63, %v6098_v24 }
 0x411   :  { %v6159_v53 = vpop.eup %3956  ;;  %v3060_v22 = vpop.f32.mrf.mxu2  ;;  %3365 = vmatpush.msrb.mxu0 %v3336_v58  ;;  %v3330_v58 = vld [vmem:[%s6636_s3 + $0x28] sm:$0xff] }
 0x412   :  { %3710 = vmatmul.msk.f32.gmra.mxu3 %vm763_vm0, %v6159_v53  ;;  %v6181_v26 = vpop.eup %3958  ;;  %3960 = vpow2.f32 %v2929_v25  ;;  %v2933_v63 = vmul.f32 1.442695, %v2904_v56  ;;  %v3326_v56 = vld [vmem:[%s6636_s3 + $0x8] sm:$0xff] }
 0x413   :  { %3366 = vmatpush.msrb.mxu0 %v3335_v55 }
 0x415   :  { %3367 = vmatpush.msrb.mxu0 %v3334_v6 }
 0x416   :  { %2334 = vadd.xlane.f32.xlu2 %v2333_v17  ;;  %v2887_v2 = vpop.xlane.xlu1 %2886  ;;  %v2931_v17 = vmul.f32 1.442695, %v2903_v5  ;;  %v6774_v5 = vld [vmem:[#allocation28_spill] sm:$0xff] }
 0x417   :  { %3368 = vmatpush.msrb.mxu0 %v3333_v32  ;;  %v1677_v6 = vsel %vm763_vm0, %v6774_v5, 0.0 }
 0x418   :  { %v6207_v25 = vpop.eup %3960 }
 0x419   :  { %v3063_v54 = vpop.f32.mrf.mxu2  ;;  %3369 = vmatpush.msrb.mxu0 %v3332_v15 }
 0x41a   :  { %3711 = vmatmul.msk.f32.gmra.mxu3 %vm763_vm0, %v6181_v26 }
 0x41b   :  { %3370 = vmatpush.msrb.mxu0 %v3331_v9 }
 0x41d   :  { %3371 = vmatpush.msrb.mxu0 %v3330_v58 }
 0x41e   :  { %1675 = vadd.xlane.f32.xlu2 %v1674_v23  ;;  %1048 = vadd.xlane.f32.xlu0 %v1047_v47  ;;  %v2941_v38 = vpop.xlane.xlu1 %2940  ;;  %v6221_v23 = vpop.f32.mrf.mxu3 }
 0x41f   :  { %3962 = vrcp.f32 %v2941_v38  ;;  %v3329_v38 = vld [vmem:[%s6636_s3 + $0x20] sm:$0xff] }
 0x420   :  { %3964 = vpow2.f32 %v2931_v17  ;;  %v3328_v17 = vld [vmem:[%s6636_s3 + $0x18] sm:$0xff]  ;;  %3372 = vmatpush.msrb.mxu0 %v3329_v38 }
 0x421   :  { %3966 = vrcp.f32 %v6129_v33  ;;  %v3327_v33 = vld [vmem:[%s6636_s3 + $0x10] sm:$0xff]  ;;  %v3066_v15 = vpop.f32.mrf.mxu2 }
 0x422   :  { %3712 = vmatmul.msk.f32.gmra.mxu3 %vm763_vm0, %v6207_v25  ;;  %3968 = vpow2.f32 %v2933_v63  ;;  %3373 = vmatpush.msrb.mxu0 %v3328_v17 }
 0x424   :  { %3374 = vmatpush.msrb.mxu0 %v3327_v33 }
 0x425   :  { %v3963_v55 = vpop.eup %3962 }
 0x426   :  { %1678 = vadd.xlane.f32.xlu0 %v1677_v6  ;;  %v1658_v24 = vpop.xlane.xlu1 %1657  ;;  %v3197_v47 = vmul.f32 %v3963_v55, %v3060_v22  ;;  %v6231_v32 = vpop.eup %3964  ;;  %v2905_v22 = vsub.f32 %v5961_v34, %v2887_v2  ;;  %3375 = vmatpush.msrb.mxu0 %v3326_v56  ;;  %v3325_v6 = vld [vmem:[%s6636_s3] sm:$0xff] }
 0x427   :  { %3970 = vrcp.f32 %v1658_v24  ;;  %v3967_v9 = vpop.eup %3966  ;;  %v6249_v34 = vpop.f32.mrf.mxu3 }
 0x428   :  { %3229 = vrot.lane.b32.xlu1 %v3197_v47, %s4116_s13  ;;  %v3199_v58 = vmul.f32 %v3967_v9, %v3066_v15  ;;  %v2935_v5 = vmul.f32 1.442695, %v2905_v22  ;;  %v6247_v63 = vpop.eup %3968  ;;  %3972 = vrcp.f32 %v6125_v49  ;;  %v6253_v24 = vpop.xlane.xlu0 %2952  ;;  %3376 = vmatpush.msrb.mxu0 %v3325_v6  ;;  %v2906_v47 = vsub.f32 %v5977_v7, %v6102_v41 }
 0x42a   :  { %3713 = vmatmul.msk.f32.gmra.mxu3 %vm763_vm0, %v6231_v32  ;;  %3974 = vpow2.f32 %v2935_v5  ;;  %v2937_v22 = vmul.f32 1.442695, %v2906_v47 }
 0x42d   :  { %v3971_v2 = vpop.eup %3970 }
 0x42e   :  { %v6242_v55 = vpop.xlane.xlu1 %2949  ;;  %v1910_v38 = vmul.f32 %v3971_v2, %v6014_v20  ;;  %v3973_v33 = vpop.eup %3972 }
 0x42f   :  { %v6261_v15 = vpop.f32.mrf.mxu3  ;;  %v3198_v49 = vmul.f32 %v3973_v33, %v3063_v54 }
 0x430   :  { %3233 = vrot.lane.b32.xlu1 %v3199_v58, %s4116_s13  ;;  %v6263_v56 = vpop.eup %3974  ;;  %v6268_v7 = vpop.xlane.xlu0 %1669 }
 0x432   :  { %3714 = vmatmul.msk.f32.gmra.mxu3 %vm763_vm0, %v6247_v63 }
 0x436   :  { %1944 = vrot.lane.b32.xlu2 %v1910_v38, %s4116_s13  ;;  %v1040_v17 = vpop.xlane.xlu1 %1039 }
 0x437   :  { %3976 = vrcp.f32 %v1040_v17  ;;  %v6276_v54 = vpop.f32.mrf.mxu3 }
 0x438   :  { %3978 = vpow2.f32 %v2937_v22 }
 0x43a   :  { %3231 = vrot.lane.b32.xlu0 %v3198_v49, %s4116_s13  ;;  %3715 = vmatmul.msk.f32.gmra.mxu3 %vm763_vm0, %v6263_v56 }
 0x43d   :  { %v3977_v20 = vpop.eup %3976 }
 0x43e   :  { %v6270_v41 = vpop.xlane.xlu1 %2955  ;;  %v1232_v9 = vmul.f32 %v3977_v20, %v5875_v8  ;;  %v6274_v58 = vpop.eup %3978 }
 0x440   :  { %1248 = vst.msk [vmem:[#allocation3] sm:$0xff] %vm763_vm0, %v1232_v9  ;;  %v2966_v9 = vsel %vm763_vm0, %v6159_v53, 0.0  ;;  %v2969_v53 = vsel %vm763_vm0, %v6181_v26, 0.0  ;;  %v3353_v26 = vld [vmem:[%s6636_s3 + $0xe0] sm:$0xff] }
 0x442   :  { %3716 = vmatmul.msk.f32.gmra.mxu3 %vm763_vm0, %v6274_v58 }
 0x443   :  { %v6280_v5 = vpop.xlane.xlu0 %2958 }
 0x446   :  { %v2332_v6 = vpop.xlane.xlu1 %2331 }
 0x447   :  { %3980 = vrcp.f32 %v2332_v6  ;;  %v1941_v2 = vpop.permute.xlu2 %1940 }
 0x448   :  { %1989 = vst.msk [vmem:[#allocation3] sm:$0xff] %vm1988_vm1, %v1941_v2 }
 0x44b   :  { %v1046_v47 = vpop.xlane.xlu0 %1045 }
 0x44c   :  { %3982 = vrcp.f32 %v1046_v47  ;;  %v6775_v47 = vld [vmem:[#allocation29_spill] sm:$0xff] }
 0x44d   :  { %v3981_v8 = vpop.eup %3980 }
 0x44e   :  { %v6283_v38 = vpop.xlane.xlu1 %2961  ;;  %v2522_v17 = vmul.f32 %v3981_v8, %v6084_v42  ;;  %v1050_v42 = vsel %vm763_vm0, %v6775_v47, 0.0  ;;  %v2342_v47 = vsel %vm763_vm0, %v5922_v39, 0.0  ;;  %v3348_v39 = vld [vmem:[%s6636_s3 + $0xb8] sm:$0xff] }
 0x44f   :  { %v3293_v33 = vld [vmem:[#allocation3] sm:$0xff] }
 0x450   :  { %3377 = vmatmul.f32.vlgmr.msrb.gmra.mxu0 %v3293_v33  ;;  %2538 = vst.msk [vmem:[#allocation3 + $0x18] sm:$0xff] %vm763_vm0, %v2522_v17  ;;  %v3355_v17 = vld [vmem:[%s6636_s3 + $0xf0] sm:$0xff]  ;;  %v2339_v33 = vsel %vm763_vm0, %v5906_v12, 0.0  ;;  %v3352_v12 = vld [vmem:[%s6636_s3 + $0xd8] sm:$0xff] }
 0x452   :  { %v3983_v22 = vpop.eup %3982 }
 0x453   :  { %v1234_v49 = vmul.f32 %v3983_v22, %v5919_v3  ;;  %v6291_v2 = vpop.xlane.xlu0 %1672  ;;  %v3356_v3 = vld [vmem:[%s6636_s3 + $0xf8] sm:$0xff]  ;;  %v6776_v22 = vld [vmem:[#allocation27_spill] sm:$0xff] }
 0x454   :  { %3426 = vmatpush.msrb.mxu1 %v3356_v3  ;;  %v3349_v3 = vld [vmem:[%s6636_s3 + $0xc0] sm:$0xff] }
 0x455   :  { %1250 = vst.msk [vmem:[#allocation3 + $0x20] sm:$0xff] %vm763_vm0, %v1234_v49  ;;  %v1053_v49 = vsel %vm763_vm0, %v6776_v22, 0.0 }
 0x456   :  { %v2338_v20 = vpop.xlane.xlu1 %2337  ;;  %3427 = vmatpush.msrb.mxu1 %v3355_v17  ;;  %v3347_v17 = vld [vmem:[%s6636_s3 + $0xb0] sm:$0xff] }
 0x457   :  { %3984 = vrcp.f32 %v2338_v20  ;;  %v3354_v20 = vld [vmem:[%s6636_s3 + $0xe8] sm:$0xff] }
 0x458   :  { %3428 = vmatpush.msrb.mxu1 %v3354_v20  ;;  %3986 = vrcp.f32 %v6137_v13  ;;  %v3343_v20 = vld [vmem:[%s6636_s3 + $0x90] sm:$0xff] }
 0x459   :  { %3988 = vrcp.f32 %v6253_v24 }
 0x45a   :  { %2967 = vadd.xlane.f32.xlu1 %v2966_v9  ;;  %3429 = vmatpush.msrb.mxu1 %v3353_v26  ;;  %v3069_v9 = vpop.f32.mrf.mxu2  ;;  %3990 = vrcp.f32 %v6242_v55  ;;  %v3345_v55 = vld [vmem:[%s6636_s3 + $0xa0] sm:$0xff] }
 0x45b   :  { %3992 = vrcp.f32 %v6140_v18  ;;  %v3341_v18 = vld [vmem:[%s6636_s3 + $0x80] sm:$0xff] }
 0x45c   :  { %3430 = vmatpush.msrb.mxu1 %v3352_v12  ;;  %v3342_v12 = vld [vmem:[%s6636_s3 + $0x88] sm:$0xff] }
 0x45d   :  { %v3985_v6 = vpop.eup %3984 }
 0x45e   :  { %v2524_v8 = vmul.f32 %v3985_v6, %v6118_v59  ;;  %v3351_v6 = vld [vmem:[%s6636_s3 + $0xd0] sm:$0xff]  ;;  %v3987_v13 = vpop.eup %3986 }
 0x45f   :  { %1051 = vadd.xlane.f32.xlu2 %v1050_v42  ;;  %3431 = vmatpush.msrb.mxu1 %v3351_v6  ;;  %v1911_v24 = vmul.f32 %v3987_v13, %v6025_v51  ;;  %v3344_v51 = vld [vmem:[%s6636_s3 + $0x98] sm:$0xff] }
 0x460   :  { %2540 = vst.msk [vmem:[#allocation3 + $0x38] sm:$0xff] %vm763_vm0, %v2524_v8  ;;  %v3350_v8 = vld [vmem:[%s6636_s3 + $0xc8] sm:$0xff] }
 0x461   :  { %3432 = vmatpush.msrb.mxu1 %v3350_v8 }
 0x462   :  { %2970 = vadd.xlane.f32.xlu1 %v2969_v53  ;;  %v3072_v53 = vpop.f32.mrf.mxu2 }
 0x463   :  { %3433 = vmatpush.msrb.mxu1 %v3349_v3 }
 0x464   :  { %2340 = vadd.xlane.f32.xlu0 %v2339_v33  ;;  %v3346_v33 = vld [vmem:[%s6636_s3 + $0xa8] sm:$0xff] }
 0x465   :  { %3434 = vmatpush.msrb.mxu1 %v3348_v39  ;;  %v6365_v39 = vpop.xlane.xlu1 %2964 }
 0x466   :  { %v1943_v59 = vpop.permute.xlu0 %1942 }
 0x467   :  { %1990 = vst.msk [vmem:[#allocation3 + $0x10] sm:$0xff] %vm1988_vm1, %v1943_v59  ;;  %1054 = vadd.xlane.f32.xlu2 %v1053_v49  ;;  %v3989_v59 = vpop.eup %3988  ;;  %3435 = vmatpush.msrb.mxu1 %v3347_v17 }
 0x468   :  { %v3201_v22 = vmul.f32 %v3989_v59, %v3072_v53  ;;  %v3991_v49 = vpop.eup %3990  ;;  %v1868_v53 = vpop.f32.mrf.mxu3 }
 0x469   :  { %3436 = vmatpush.msrb.mxu1 %v3346_v33  ;;  %v3200_v26 = vmul.f32 %v3991_v49, %v3069_v9  ;;  %v3993_v6 = vpop.eup %3992 }
 0x46b   :  { %3437 = vmatpush.msrb.mxu1 %v3345_v55 }
 0x46d   :  { %3438 = vmatpush.msrb.mxu1 %v3344_v51 }
 0x46e   :  { %v3295_v42 = vld [vmem:[#allocation3 + $0x10] sm:$0xff] }
 0x46f   :  { %2343 = vadd.xlane.f32.xlu2 %v2342_v47  ;;  %3380 = vmatmul.f32.gmra.mxu0 %v3295_v42  ;;  %v1912_v47 = vmul.f32 %v3993_v6, %v6032_v61 }
 0x470   :  { %3439 = vmatpush.msrb.mxu1 %v3343_v20  ;;  %v2345_v20 = vsel %vm763_vm0, %v5938_v48, 0.0 }
 0x472   :  { %3440 = vmatpush.msrb.mxu1 %v3342_v12  ;;  %v6777_v12 = vld [vmem:[#allocation23_spill] sm:$0xff] }
 0x473   :  { %v1059_v6 = vsel %vm763_vm0, %v6777_v12, 0.0 }
 0x474   :  { %3441 = vmatpush.msrb.mxu1 %v3341_v18  ;;  %v6778_v18 = vld [vmem:[#allocation34_spill] sm:$0xff] }
 0x478   :  { %1946 = vrot.lane.b32.xlu0 %v1911_v24, %s4116_s13 }
 0x47b   :  { %3237 = vrot.lane.b32.xlu1 %v3201_v22, %s4116_s13 }
 0x480   :  { %3235 = vrot.lane.b32.xlu0 %v3200_v26, %s4116_s13 }
 0x487   :  { %1948 = vrot.lane.b32.xlu2 %v1912_v47, %s4116_s13  ;;  %v1056_v47 = vsel %vm763_vm0, %v6778_v18, 0.0 }
 0x489   :  { %v2335_v9 = vpop.xlane.xlu2 %2334 }
 0x48a   :  { %3994 = vrcp.f32 %v2335_v9  ;;  %v1683_v9 = vsel %vm763_vm0, %v5895_v60, 0.0 }
 0x490   :  { %v3995_v42 = vpop.eup %3994 }
 0x491   :  { %v1676_v8 = vpop.xlane.xlu2 %1675  ;;  %v1049_v13 = vpop.xlane.xlu0 %1048  ;;  %v2523_v3 = vmul.f32 %v3995_v42, %v6104_v57 }
 0x492   :  { %3996 = vrcp.f32 %v1676_v8 }
 0x493   :  { %3998 = vrcp.f32 %v1049_v13  ;;  %2539 = vst.msk [vmem:[#allocation3 + $0x28] sm:$0xff] %vm763_vm0, %v2523_v3  ;;  %v6392_v13 = vpop.f32.mrf.mxu3 }
 0x494   :  { %4000 = vrcp.f32 %v6144_v0 }
 0x495   :  { %4002 = vrcp.f32 %v6270_v41 }
 0x496   :  { %4004 = vrcp.f32 %v6268_v7 }
 0x498   :  { %v3997_v17 = vpop.eup %3996 }
 0x499   :  { %v3999_v24 = vpop.eup %3998  ;;  %v1945_v33 = vpop.permute.xlu2 %1944  ;;  %v6368_v61 = vmul.f32 %v3997_v17, %v1868_v53 }
 0x49a   :  { %1991 = vst.msk [vmem:[#allocation3 + $0x20] sm:$0xff] %vm1988_vm1, %v1945_v33  ;;  %v3230_v59 = vpop.permute.xlu1 %3229  ;;  %v1235_v22 = vmul.f32 %v3999_v24, %v5935_v27  ;;  %v6375_v51 = vpop.xlane.xlu0 %1678  ;;  %v1680_v27 = vsel %vm763_vm0, %v5877_v44, 0.0  ;;  %v1686_v44 = vsel %vm763_vm0, %v5912_v50, 0.0 }
 0x49b   :  { %3277 = vst.msk [vmem:[#allocation3 + $0x8] sm:$0xff] %vm1988_vm1, %v3230_v59  ;;  %v4001_v8 = vpop.eup %4000  ;;  %v3075_v17 = vpop.f32.mrf.mxu2 }
 0x49c   :  { %1251 = vst.msk [vmem:[#allocation3 + $0x30] sm:$0xff] %vm763_vm0, %v1235_v22  ;;  %v4003_v3 = vpop.eup %4002  ;;  %v1913_v60 = vmul.f32 %v4001_v8, %v6037_v35  ;;  %v6398_v0 = vpop.f32.mrf.mxu3  ;;  %v2975_v8 = vsel %vm763_vm0, %v6231_v32, 0.0 }
 0x49d   :  { %v3202_v50 = vmul.f32 %v4003_v3, %v3075_v17  ;;  %v4005_v53 = vpop.eup %4004  ;;  %v6779_v3 = vld [vmem:[#allocation20_spill] sm:$0xff] }
 0x49e   :  { %v1914_v41 = vmul.f32 %v4005_v53, %v6044_v62  ;;  %v2978_v53 = vsel %vm763_vm0, %v6247_v63, 0.0 }
 0x4a1   :  { %v3297_v57 = vld [vmem:[#allocation3 + $0x20] sm:$0xff] }
 0x4a2   :  { %3383 = vmatmul.f32.gmra.mxu0 %v3297_v57  ;;  %v3234_v55 = vpop.permute.xlu1 %3233  ;;  %v3294_v49 = vld [vmem:[#allocation3 + $0x8] sm:$0xff] }
 0x4a3   :  { %3279 = vst.msk [vmem:[#allocation3 + $0x28] sm:$0xff] %vm1988_vm1, %v3234_v55  ;;  %3442 = vmatmul.f32.vlgmr.msrb.gmra.mxu1 %v3294_v49 }
 0x4a4   :  { %v6402_v33 = vpop.f32.mrf.mxu3 }
 0x4a5   :  { %2346 = vadd.xlane.f32.xlu1 %v2345_v20 }
 0x4aa   :  { %1681 = vadd.xlane.f32.xlu0 %v1680_v27  ;;  %v3298_v42 = vld [vmem:[#allocation3 + $0x28] sm:$0xff] }
 0x4ac   :  { %v3232_v26 = vpop.permute.xlu0 %3231  ;;  %v6408_v49 = vpop.f32.mrf.mxu3 }
 0x4ad   :  { %3278 = vst.msk [vmem:[#allocation3 + $0x18] sm:$0xff] %vm1988_vm1, %v3232_v26  ;;  %1060 = vadd.xlane.f32.xlu1 %v1059_v6 }
 0x4b0   :  { %1057 = vadd.xlane.f32.xlu2 %v1056_v47 }
 0x4b2   :  { %1684 = vadd.xlane.f32.xlu0 %v1683_v9 }
 0x4b4   :  { %v3296_v48 = vld [vmem:[#allocation3 + $0x18] sm:$0xff]  ;;  %v6416_v6 = vpop.f32.mrf.mxu3 }
 0x4b5   :  { %3445 = vmatmul.f32.gmra.mxu1 %v3296_v48  ;;  %1687 = vadd.xlane.f32.xlu1 %v1686_v44  ;;  %v2348_v48 = vsel %vm763_vm0, %v5951_v30, 0.0 }
 0x4bd   :  { %3448 = vmatmul.f32.gmra.mxu1 %v3298_v42  ;;  %v6427_v42 = vpop.f32.mrf.mxu3 }
 0x4c6   :  { %1950 = vrot.lane.b32.xlu0 %v1913_v60, %s4116_s13  ;;  %v1062_v60 = vsel %vm763_vm0, %v6779_v3, 0.0 }
 0x4c8   :  { %3239 = vrot.lane.b32.xlu2 %v3202_v50, %s4116_s13  ;;  %v6436_v50 = vpop.f32.mrf.mxu3 }
 0x4cd   :  { %v6405_v57 = vpop.xlane.xlu1 %2967 }
 0x4ce   :  { %1952 = vrot.lane.b32.xlu1 %v1914_v41, %s4116_s13 }
 0x4d0   :  { %v6442_v41 = vpop.f32.mrf.mxu3 }
 0x4d2   :  { %v1052_v24 = vpop.xlane.xlu2 %1051 }
 0x4d3   :  { %4006 = vrcp.f32 %v1052_v24  ;;  %v6780_v24 = vld [vmem:[#allocation22_spill] sm:$0xff] }
 0x4d7   :  { %v2341_v7 = vpop.xlane.xlu0 %2340 }
 0x4d8   :  { %4008 = vrcp.f32 %v2341_v7  ;;  %v1065_v7 = vsel %vm763_vm0, %v6780_v24, 0.0  ;;  %v6782_v24 = vld [vmem:[#allocation24_spill] sm:$0xff] }
 0x4d9   :  { %v4007_v35 = vpop.eup %4006 }
 0x4da   :  { %v1055_v59 = vpop.xlane.xlu2 %1054  ;;  %v1236_v22 = vmul.f32 %v4007_v35, %v5953_v10  ;;  %v6414_v10 = vpop.xlane.xlu1 %2970 }
 0x4db   :  { %4010 = vrcp.f32 %v1055_v59 }
 0x4dc   :  { %1252 = vst.msk [vmem:[#allocation3 + $0x40] sm:$0xff] %vm763_vm0, %v1236_v22 }
 0x4de   :  { %v4009_v55 = vpop.eup %4008 }
 0x4df   :  { %v2525_v62 = vmul.f32 %v4009_v55, %v6134_v28 }
 0x4e1   :  { %v4011_v20 = vpop.eup %4010  ;;  %2541 = vst.msk [vmem:[#allocation3 + $0x48] sm:$0xff] %vm763_vm0, %v2525_v62 }
 0x4e2   :  { %v2344_v27 = vpop.xlane.xlu2 %2343  ;;  %v1237_v26 = vmul.f32 %v4011_v20, %v5968_v4  ;;  %v2972_v4 = vsel %vm763_vm0, %v6207_v25, 0.0  ;;  %v2351_v25 = vsel %vm763_vm0, %v5966_v14, 0.0  ;;  %v3078_v14 = vpop.f32.mrf.mxu2 }
 0x4e3   :  { %4012 = vrcp.f32 %v2344_v27 }
 0x4e4   :  { %1253 = vst.msk [vmem:[#allocation3 + $0x50] sm:$0xff] %vm763_vm0, %v1237_v26  ;;  %4014 = vrcp.f32 %v6280_v5  ;;  %v6449_v5 = vpop.f32.mrf.mxu3  ;;  %v6458_v26 = vld [vmem:[%s6637_s4] ss:$0 sm:$0xff]  ;;  %s4117_s4 = smov [#allocation4]  }
 0x4e5   :  { %4016 = vrcp.f32 %v6291_v2 }
 0x4e6   :  { %4018 = vrcp.f32 %v6283_v38 }
 0x4e9   :  { %v4013_v12 = vpop.eup %4012 }
 0x4ea   :  { %v1949_v18 = vpop.permute.xlu2 %1948  ;;  %v1947_v47 = vpop.permute.xlu0 %1946  ;;  %v2526_v9 = vmul.f32 %v4013_v12, %v6142_v52 }
 0x4eb   :  { %1993 = vst.msk [vmem:[#allocation3 + $0x40] sm:$0xff] %vm1988_vm1, %v1949_v18  ;;  %v4015_v35 = vpop.eup %4014  ;;  %v3081_v2 = vpop.f32.mrf.mxu2 }
 0x4ec   :  { %1992 = vst.msk [vmem:[#allocation3 + $0x30] sm:$0xff] %vm1988_vm1, %v1947_v47  ;;  %v3203_v59 = vmul.f32 %v4015_v35, %v3078_v14  ;;  %v4017_v22 = vpop.eup %4016  ;;  %v6452_v27 = vpop.f32.mrf.mxu3 }
 0x4ed   :  { %v3238_v28 = vpop.permute.xlu1 %3237  ;;  %2542 = vst.msk [vmem:[#allocation3 + $0x58] sm:$0xff] %vm763_vm0, %v2526_v9  ;;  %v1915_v63 = vmul.f32 %v4017_v22, %v6053_v1  ;;  %v4019_v55 = vpop.eup %4018 }
 0x4ee   :  { %3281 = vst.msk [vmem:[#allocation3 + $0x48] sm:$0xff] %vm1988_vm1, %v3238_v28  ;;  %v3204_v62 = vmul.f32 %v4019_v55, %v3081_v2  ;;  %v3378_v1 = vpop.f32.mrf.mxu0 }
 0x4ef   :  { %v3379_v12 = vadd.f32 %v6458_v26, %v3378_v1 }
 0x4f0   :  { %2973 = vadd.xlane.f32.xlu0 %v2972_v4 }
 0x4f1   :  { %2349 = vadd.xlane.f32.xlu2 %v2348_v48 }
 0x4f2   :  { %v3236_v44 = vpop.permute.xlu0 %3235  ;;  %v3301_v17 = vld [vmem:[#allocation3 + $0x40] sm:$0xff] }
 0x4f3   :  { %3280 = vst.msk [vmem:[#allocation3 + $0x38] sm:$0xff] %vm1988_vm1, %v3236_v44  ;;  %v3299_v52 = vld [vmem:[#allocation3 + $0x30] sm:$0xff] }
 0x4f4   :  { %3386 = vmatmul.f32.gmra.mxu0 %v3299_v52  ;;  %v6465_v4 = vpop.f32.mrf.mxu3 }
 0x4f5   :  { %v3302_v32 = vld [vmem:[#allocation3 + $0x48] sm:$0xff] }
 0x4f8   :  { %2976 = vadd.xlane.f32.xlu0 %v2975_v8  ;;  %1063 = vadd.xlane.f32.xlu1 %v1062_v60  ;;  %v6781_v60 = vld [vmem:[#allocation36_spill] sm:$0xff] }
 0x4f9   :  { %2352 = vadd.xlane.f32.xlu2 %v2351_v25 }
 0x4fa   :  { %v3300_v30 = vld [vmem:[#allocation3 + $0x38] sm:$0xff] }
 0x4fb   :  { %3451 = vmatmul.f32.gmra.mxu1 %v3300_v30  ;;  %v3381_v30 = vpop.f32.mrf.mxu0 }
 0x4fc   :  { %3389 = vmatmul.f32.gmra.mxu0 %v3301_v17 }
 0x500   :  { %2979 = vadd.xlane.f32.xlu1 %v2978_v53  ;;  %v3382_v53 = vadd.f32 %v6458_v26, %v3381_v30 }
 0x503   :  { %3454 = vmatmul.f32.gmra.mxu1 %v3302_v32 }
 0x508   :  { %1066 = vadd.xlane.f32.xlu1 %v1065_v7  ;;  %v1689_v7 = vsel %vm763_vm0, %v6782_v24, 0.0 }
 0x50c   :  { %3241 = vrot.lane.b32.xlu0 %v3203_v59, %s4116_s13 }
 0x511   :  { %1954 = vrot.lane.b32.xlu2 %v1915_v63, %s4116_s13 }
 0x518   :  { %v2347_v20 = vpop.xlane.xlu1 %2346 }
 0x519   :  { %4020 = vrcp.f32 %v2347_v20  ;;  %3243 = vrot.lane.b32.xlu2 %v3204_v62, %s4116_s13  ;;  %v6783_v20 = vld [vmem:[#allocation25_spill] sm:$0xff] }
 0x51a   :  { %v1692_v1 = vsel %vm763_vm0, %v6783_v20, 0.0 }
 0x51d   :  { %v6467_v44 = vpop.xlane.xlu0 %1681 }
 0x51f   :  { %v4021_v38 = vpop.eup %4020  ;;  %v3384_v35 = vpop.f32.mrf.mxu0 }
 0x520   :  { %v3443_v18 = vpop.f32.mrf.mxu1  ;;  %v1061_v47 = vpop.xlane.xlu1 %1060  ;;  %v2527_v9 = vmul.f32 %v4021_v38, %v6147_v43  ;;  %v3385_v2 = vadd.f32 %v6458_v26, %v3384_v35 }
 0x521   :  { %v3444_v28 = vadd.f32 %v3443_v18, %v3379_v12  ;;  %4022 = vrcp.f32 %v1061_v47  ;;  %1956 = vrot.lane.b32.xlu1 %v6368_v61, %s4116_s13  ;;  %v6473_v61 = vpop.f32.mrf.mxu3  ;;  %v6784_v47 = vld [vmem:[#allocation26_spill] sm:$0xff] }
 0x522   :  { %2543 = vst.msk [vmem:[#allocation3 + $0x68] sm:$0xff] %vm763_vm0, %v2527_v9  ;;  %v2354_v9 = vsel %vm763_vm0, %v6784_v47, 0.0 }
 0x523   :  { %3491 = vst [vmem:[#allocation4] sm:$0xff] %v3444_v28  ;;  %v1058_v48 = vpop.xlane.xlu2 %1057  ;;  %v2981_v28 = vsel %vm763_vm0, %v6263_v56, 0.0 }
 0x524   :  { %4024 = vrcp.f32 %v1058_v48 }
 0x525   :  { %v6476_v17 = vpop.xlane.xlu0 %1684  ;;  %4026 = vrcp.f32 %v6365_v39 }
 0x526   :  { %4028 = vrcp.f32 %v6375_v51 }
 0x527   :  { %v4023_v52 = vpop.eup %4022  ;;  %4030 = vrcp.f32 %v6405_v57 }
 0x528   :  { %v1239_v8 = vmul.f32 %v4023_v52, %v5995_v21  ;;  %v6483_v22 = vpop.xlane.xlu1 %1687  ;;  %v2357_v52 = vsel %vm763_vm0, %v6048_v37, 0.0  ;;  %v2360_v37 = vsel %vm763_vm0, %v6060_v40, 0.0 }
 0x529   :  { %v6481_v59 = vpop.f32.mrf.mxu3 }
 0x52a   :  { %v4025_v3 = vpop.eup %4024  ;;  %1255 = vst.msk [vmem:[#allocation3 + $0x70] sm:$0xff] %vm763_vm0, %v1239_v8  ;;  %v6785_v8 = vld [vmem:[#allocation7_spill] sm:$0xff] }
 0x52b   :  { %v3240_v43 = vpop.permute.xlu2 %3239  ;;  %v1238_v25 = vmul.f32 %v4025_v3, %v6781_v60  ;;  %v1068_v3 = vsel %vm763_vm0, %v6785_v8, 0.0  ;;  %v2984_v60 = vsel %vm763_vm0, %v6274_v58, 0.0  ;;  %v6786_v58 = vld [vmem:[#allocation11_spill] sm:$0xff] }
 0x52c   :  { %3282 = vst.msk [vmem:[#allocation3 + $0x58] sm:$0xff] %vm1988_vm1, %v3240_v43 }
 0x52d   :  { %1254 = vst.msk [vmem:[#allocation3 + $0x60] sm:$0xff] %vm763_vm0, %v1238_v25  ;;  %v4027_v25 = vpop.eup %4026 }
 0x531   :  { %v6489_v18 = vpop.f32.mrf.mxu3 }
 0x532   :  { %v3446_v32 = vpop.f32.mrf.mxu1 }
 0x533   :  { %v3447_v14 = vadd.f32 %v3446_v32, %v3382_v53  ;;  %v3304_v21 = vld [vmem:[#allocation3 + $0x58] sm:$0xff]  ;;  %v4029_v53 = vpop.eup %4028  ;;  %v1074_v32 = vsel %vm763_vm0, %v6786_v58, 0.0 }
 0x534   :  { %3457 = vmatmul.f32.gmra.mxu1 %v3304_v21  ;;  %v1917_v39 = vmul.f32 %v4029_v53, %v6392_v13  ;;  %v4031_v51 = vpop.eup %4030 }
 0x535   :  { %3492 = vst [vmem:[#allocation4 + $0x8] sm:$0xff] %v3447_v14 }
 0x536   :  { %1690 = vadd.xlane.f32.xlu0 %v1689_v7 }
 0x538   :  { %v1951_v63 = vpop.permute.xlu0 %1950 }
 0x539   :  { %1994 = vst.msk [vmem:[#allocation3 + $0x50] sm:$0xff] %vm1988_vm1, %v1951_v63  ;;  %v6500_v43 = vpop.f32.mrf.mxu3 }
 0x53a   :  { %v3449_v55 = vpop.f32.mrf.mxu1 }
 0x53b   :  { %v3450_v62 = vadd.f32 %v3449_v55, %v3385_v2 }
 0x53d   :  { %3493 = vst [vmem:[#allocation4 + $0x10] sm:$0xff] %v3450_v62 }
 0x53e   :  { %1693 = vadd.xlane.f32.xlu0 %v1692_v1 }
 0x540   :  { %v1953_v38 = vpop.permute.xlu1 %1952  ;;  %v3303_v12 = vld [vmem:[#allocation3 + $0x50] sm:$0xff] }
 0x541   :  { %1995 = vst.msk [vmem:[#allocation3 + $0x60] sm:$0xff] %vm1988_vm1, %v1953_v38  ;;  %3392 = vmatmul.f32.gmra.mxu0 %v3303_v12  ;;  %v3157_v56 = vpop.f32.mrf.mxu3 }
 0x542   :  { %2355 = vadd.xlane.f32.xlu2 %v2354_v9  ;;  %v3205_v30 = vmul.f32 %v4027_v25, %v3157_v56 }
 0x546   :  { %2982 = vadd.xlane.f32.xlu0 %v2981_v28 }
 0x548   :  { %v3305_v48 = vld [vmem:[#allocation3 + $0x60] sm:$0xff] }
 0x549   :  { %3395 = vmatmul.f32.gmra.mxu0 %v3305_v48  ;;  %v3160_v21 = vpop.f32.mrf.mxu3 }
 0x54a   :  { %2358 = vadd.xlane.f32.xlu2 %v2357_v52  ;;  %v3206_v24 = vmul.f32 %v4031_v51, %v3160_v21  ;;  %v2363_v51 = vsel %vm763_vm0, %v6071_v11, 0.0 }
 0x54b   :  { %1069 = vadd.xlane.f32.xlu1 %v1068_v3 }
 0x551   :  { %v3163_v21 = vpop.f32.mrf.mxu3 }
 0x553   :  { %2985 = vadd.xlane.f32.xlu1 %v2984_v60 }
 0x55a   :  { %3245 = vrot.lane.b32.xlu0 %v3205_v30, %s4116_s13 }
 0x55b   :  { %2361 = vadd.xlane.f32.xlu1 %v2360_v37 }
 0x562   :  { %1958 = vrot.lane.b32.xlu2 %v1917_v39, %s4116_s13  ;;  %v6788_v39 = vld [vmem:[#allocation8_spill] sm:$0xff] }
 0x563   :  { %1075 = vadd.xlane.f32.xlu1 %v1074_v32  ;;  %v2974_v57 = vpop.xlane.xlu0 %2973  ;;  %v1071_v58 = vsel %vm763_vm0, %v6788_v39, 0.0 }
 0x564   :  { %v2350_v14 = vpop.xlane.xlu2 %2349 }
 0x565   :  { %4032 = vrcp.f32 %v2350_v14 }
 0x566   :  { %4034 = vrcp.f32 %v6467_v44 }
 0x56a   :  { %3247 = vrot.lane.b32.xlu2 %v3206_v24, %s4116_s13 }
 0x56b   :  { %v4033_v40 = vpop.eup %4032  ;;  %v1064_v7 = vpop.xlane.xlu1 %1063 }
 0x56c   :  { %v2353_v35 = vpop.xlane.xlu2 %2352  ;;  %v2528_v13 = vmul.f32 %v4033_v40, %v6156_v16  ;;  %v4035_v63 = vpop.eup %4034  ;;  %4036 = vrcp.f32 %v1064_v7 }
 0x56d   :  { %4038 = vrcp.f32 %v2353_v35  ;;  %v1918_v2 = vmul.f32 %v4035_v63, %v6398_v0  ;;  %v2977_v12 = vpop.xlane.xlu0 %2976  ;;  %v3166_v35 = vpop.f32.mrf.mxu3 }
 0x56e   :  { %2544 = vst.msk [vmem:[#allocation3 + $0x78] sm:$0xff] %vm763_vm0, %v2528_v13  ;;  %4040 = vrcp.f32 %v6476_v17  ;;  %v6789_v13 = vld [vmem:[#allocation31_spill] sm:$0xff] }
 0x56f   :  { %v2366_v63 = vsel %vm763_vm0, %v6789_v13, 0.0 }
 0x571   :  { %v3387_v55 = vpop.f32.mrf.mxu0 }
 0x572   :  { %1960 = vrot.lane.b32.xlu2 %v1918_v2, %s4116_s13  ;;  %v4037_v44 = vpop.eup %4036  ;;  %v3388_v17 = vadd.f32 %v6458_v26, %v3387_v55 }
 0x573   :  { %v6521_v62 = vpop.xlane.xlu1 %2979  ;;  %v4039_v20 = vpop.eup %4038  ;;  %v1240_v38 = vmul.f32 %v4037_v44, %v6131_v36 }
 0x574   :  { %v1955_v1 = vpop.permute.xlu2 %1954  ;;  %v2529_v16 = vmul.f32 %v4039_v20, %v6442_v41  ;;  %v4041_v0 = vpop.eup %4040 }
 0x575   :  { %1996 = vst.msk [vmem:[#allocation3 + $0x70] sm:$0xff] %vm1988_vm1, %v1955_v1  ;;  %v1919_v28 = vmul.f32 %v4041_v0, %v6402_v33  ;;  %v6787_v33 = vld [vmem:[#allocation19_spill] sm:$0xff]  ;;  %v3169_v55 = vpop.f32.mrf.mxu3 }
 0x576   :  { %1256 = vst.msk [vmem:[#allocation3 + $0x80] sm:$0xff] %vm763_vm0, %v1240_v38  ;;  %v1695_v30 = vsel %vm763_vm0, %v6787_v33, 0.0 }
 0x577   :  { %2545 = vst.msk [vmem:[#allocation3 + $0x88] sm:$0xff] %vm763_vm0, %v2529_v16 }
 0x578   :  { %v3452_v47 = vpop.f32.mrf.mxu1 }
 0x579   :  { %v3453_v9 = vadd.f32 %v3452_v47, %v3388_v17  ;;  %v3390_v52 = vpop.f32.mrf.mxu0 }
 0x57a   :  { %v3391_v3 = vadd.f32 %v6458_v26, %v3390_v52 }
 0x57b   :  { %3494 = vst [vmem:[#allocation4 + $0x18] sm:$0xff] %v3453_v9  ;;  %v1067_v48 = vpop.xlane.xlu1 %1066 }
 0x57c   :  { %4042 = vrcp.f32 %v1067_v48  ;;  %v3244_v36 = vpop.permute.xlu2 %3243  ;;  %1962 = vrot.lane.b32.xlu1 %v1919_v28, %s4116_s13  ;;  %v3307_v41 = vld [vmem:[#allocation3 + $0x70] sm:$0xff] }
 0x57d   :  { %3284 = vst.msk [vmem:[#allocation3 + $0x78] sm:$0xff] %vm1988_vm1, %v3244_v36  ;;  %3398 = vmatmul.f32.gmra.mxu0 %v3307_v41  ;;  %4044 = vrcp.f32 %v6414_v10  ;;  %v3172_v0 = vpop.f32.mrf.mxu3 }
 0x57e   :  { %v3242_v8 = vpop.permute.xlu0 %3241  ;;  %4046 = vrcp.f32 %v2974_v57 }
 0x57f   :  { %3283 = vst.msk [vmem:[#allocation3 + $0x68] sm:$0xff] %vm1988_vm1, %v3242_v8  ;;  %4048 = vrcp.f32 %v6483_v22 }
 0x580   :  { %v3455_v60 = vpop.f32.mrf.mxu1  ;;  %4050 = vrcp.f32 %v2977_v12 }
 0x581   :  { %v3456_v56 = vadd.f32 %v3455_v60, %v3391_v3  ;;  %4052 = vrcp.f32 %v6521_v62 }
 0x582   :  { %v4043_v25 = vpop.eup %4042 }
 0x583   :  { %3495 = vst [vmem:[#allocation4 + $0x20] sm:$0xff] %v3456_v56  ;;  %v1241_v37 = vmul.f32 %v4043_v25, %v6151_v46  ;;  %v4045_v46 = vpop.eup %4044 }
 0x584   :  { %1696 = vadd.xlane.f32.xlu0 %v1695_v30  ;;  %v3308_v32 = vld [vmem:[#allocation3 + $0x78] sm:$0xff]  ;;  %v3207_v40 = vmul.f32 %v4045_v46, %v3163_v21  ;;  %v4047_v7 = vpop.eup %4046 }
 0x585   :  { %1257 = vst.msk [vmem:[#allocation3 + $0x90] sm:$0xff] %vm763_vm0, %v1241_v37  ;;  %v3208_v2 = vmul.f32 %v4047_v7, %v3166_v35  ;;  %v4049_v11 = vpop.eup %4048  ;;  %v2372_v7 = vsel %vm763_vm0, %v6115_v31, 0.0 }
 0x586   :  { %v3306_v53 = vld [vmem:[#allocation3 + $0x68] sm:$0xff]  ;;  %v1920_v57 = vmul.f32 %v4049_v11, %v6408_v49  ;;  %v4051_v20 = vpop.eup %4050 }
 0x587   :  { %3460 = vmatmul.f32.gmra.mxu1 %v3306_v53  ;;  %v3209_v1 = vmul.f32 %v4051_v20, %v3169_v55  ;;  %v4053_v38 = vpop.eup %4052 }
 0x588   :  { %v3210_v17 = vmul.f32 %v4053_v38, %v3172_v0 }
 0x58c   :  { %1072 = vadd.xlane.f32.xlu0 %v1071_v58 }
 0x58f   :  { %3463 = vmatmul.f32.gmra.mxu1 %v3308_v32 }
 0x593   :  { %v1957_v14 = vpop.permute.xlu1 %1956 }
 0x594   :  { %1997 = vst.msk [vmem:[#allocation3 + $0x80] sm:$0xff] %vm1988_vm1, %v1957_v14  ;;  %v6791_v14 = vld [vmem:[#allocation16_spill] sm:$0xff] }
 0x59b   :  { %2364 = vadd.xlane.f32.xlu2 %v2363_v51  ;;  %v3309_v24 = vld [vmem:[#allocation3 + $0x80] sm:$0xff]  ;;  %v1080_v51 = vsel %vm763_vm0, %v6791_v14, 0.0 }
 0x59c   :  { %3401 = vmatmul.f32.gmra.mxu0 %v3309_v24 }
 0x5a0   :  { %3249 = vrot.lane.b32.xlu0 %v3207_v40, %s4116_s13 }
 0x5a6   :  { %2367 = vadd.xlane.f32.xlu1 %v2366_v63  ;;  %v3175_v63 = vpop.f32.mrf.mxu3 }
 0x5a8   :  { %3251 = vrot.lane.b32.xlu0 %v3208_v2, %s4116_s13 }
 0x5a9   :  { %v6549_v10 = vpop.xlane.xlu0 %1690 }
 0x5b1   :  { %v1694_v16 = vpop.xlane.xlu0 %1693  ;;  %v3458_v62 = vpop.f32.mrf.mxu1 }
 0x5b3   :  { %1964 = vrot.lane.b32.xlu2 %v1920_v57, %s4116_s13  ;;  %v3178_v57 = vpop.f32.mrf.mxu3 }
 0x5b5   :  { %v2356_v44 = vpop.xlane.xlu2 %2355 }
 0x5b6   :  { %4054 = vrcp.f32 %v2356_v44 }
 0x5b9   :  { %v6559_v36 = vpop.xlane.xlu0 %2982 }
 0x5bb   :  { %3253 = vrot.lane.b32.xlu2 %v3209_v1, %s4116_s13 }
 0x5bc   :  { %v4055_v22 = vpop.eup %4054 }
 0x5bd   :  { %v2359_v12 = vpop.xlane.xlu2 %2358  ;;  %v2530_v47 = vmul.f32 %v4055_v22, %v6449_v5 }
 0x5be   :  { %4056 = vrcp.f32 %v2359_v12  ;;  %v3393_v49 = vpop.f32.mrf.mxu0  ;;  %v1070_v9 = vpop.xlane.xlu1 %1069 }
 0x5bf   :  { %v3394_v28 = vadd.f32 %v6458_v26, %v3393_v49  ;;  %4058 = vrcp.f32 %v1070_v9  ;;  %3255 = vrot.lane.b32.xlu1 %v3210_v17, %s4116_s13  ;;  %2546 = vst.msk [vmem:[#allocation3 + $0x98] sm:$0xff] %vm763_vm0, %v2530_v47 }
 0x5c1   :  { %v3459_v48 = vadd.f32 %v3458_v62, %v3394_v28 }
 0x5c3   :  { %3496 = vst [vmem:[#allocation4 + $0x28] sm:$0xff] %v3459_v48  ;;  %v6792_v48 = vld [vmem:[#allocation15_spill] sm:$0xff] }
 0x5c4   :  { %v4057_v52 = vpop.eup %4056 }
 0x5c5   :  { %v4059_v41 = vpop.eup %4058  ;;  %v1959_v8 = vpop.permute.xlu2 %1958  ;;  %v2531_v5 = vmul.f32 %v4057_v52, %v6452_v27  ;;  %v6790_v27 = vld [vmem:[#allocation13_spill] sm:$0xff]  ;;  %v1083_v52 = vsel %vm763_vm0, %v6792_v48, 0.0 }
 0x5c6   :  { %1998 = vst.msk [vmem:[#allocation3 + $0x90] sm:$0xff] %vm1988_vm1, %v1959_v8  ;;  %v2986_v3 = vpop.xlane.xlu1 %2985  ;;  %v1242_v60 = vmul.f32 %v4059_v41, %v6161_v19  ;;  %v1077_v37 = vsel %vm763_vm0, %v6790_v27, 0.0  ;;  %v3396_v55 = vpop.f32.mrf.mxu0 }
 0x5c7   :  { %2547 = vst.msk [vmem:[#allocation3 + $0xa8] sm:$0xff] %vm763_vm0, %v2531_v5  ;;  %v3397_v20 = vadd.f32 %v6458_v26, %v3396_v55 }
 0x5c8   :  { %1258 = vst.msk [vmem:[#allocation3 + $0xa0] sm:$0xff] %vm763_vm0, %v1242_v60 }
 0x5cc   :  { %v3246_v56 = vpop.permute.xlu0 %3245 }
 0x5cd   :  { %3285 = vst.msk [vmem:[#allocation3 + $0x88] sm:$0xff] %vm1988_vm1, %v3246_v56  ;;  %v3248_v25 = vpop.permute.xlu2 %3247  ;;  %v3311_v33 = vld [vmem:[#allocation3 + $0x90] sm:$0xff] }
 0x5ce   :  { %3286 = vst.msk [vmem:[#allocation3 + $0x98] sm:$0xff] %vm1988_vm1, %v3248_v25  ;;  %v2362_v30 = vpop.xlane.xlu1 %2361  ;;  %3404 = vmatmul.f32.gmra.mxu0 %v3311_v33 }
 0x5cf   :  { %4060 = vrcp.f32 %v2362_v30 }
 0x5d2   :  { %1078 = vadd.xlane.f32.xlu0 %v1077_v37 }
 0x5d4   :  { %v3310_v53 = vld [vmem:[#allocation3 + $0x88] sm:$0xff] }
 0x5d5   :  { %v4061_v19 = vpop.eup %4060  ;;  %3466 = vmatmul.f32.gmra.mxu1 %v3310_v53  ;;  %v1961_v39 = vpop.permute.xlu2 %1960  ;;  %v3312_v46 = vld [vmem:[#allocation3 + $0x98] sm:$0xff] }
 0x5d6   :  { %1999 = vst.msk [vmem:[#allocation3 + $0xa0] sm:$0xff] %vm1988_vm1, %v1961_v39  ;;  %v1076_v58 = vpop.xlane.xlu1 %1075  ;;  %v2532_v32 = vmul.f32 %v4061_v19, %v6465_v4  ;;  %v2369_v4 = vsel %vm763_vm0, %v6100_v29, 0.0 }
 0x5d7   :  { %4062 = vrcp.f32 %v1076_v58 }
 0x5d8   :  { %2548 = vst.msk [vmem:[#allocation3 + $0xb8] sm:$0xff] %vm763_vm0, %v2532_v32  ;;  %4064 = vrcp.f32 %v6549_v10 }
 0x5d9   :  { %4066 = vrcp.f32 %v1694_v16 }
 0x5da   :  { %1081 = vadd.xlane.f32.xlu0 %v1080_v51  ;;  %4068 = vrcp.f32 %v2986_v3 }
 0x5dd   :  { %v4063_v21 = vpop.eup %4062  ;;  %3469 = vmatmul.f32.gmra.mxu1 %v3312_v46  ;;  %v3313_v24 = vld [vmem:[#allocation3 + $0xa0] sm:$0xff] }
 0x5de   :  { %3407 = vmatmul.f32.gmra.mxu0 %v3313_v24  ;;  %v1244_v40 = vmul.f32 %v4063_v21, %v6221_v23  ;;  %v4065_v35 = vpop.eup %4064 }
 0x5df   :  { %v1921_v13 = vmul.f32 %v4065_v35, %v6416_v6  ;;  %v4067_v23 = vpop.eup %4066 }
 0x5e0   :  { %1260 = vst.msk [vmem:[#allocation3 + $0xc0] sm:$0xff] %vm763_vm0, %v1244_v40  ;;  %v1922_v11 = vmul.f32 %v4067_v23, %v6427_v42  ;;  %v4069_v29 = vpop.eup %4068 }
 0x5e1   :  { %v3212_v44 = vmul.f32 %v4069_v29, %v3178_v57 }
 0x5e4   :  { %2370 = vadd.xlane.f32.xlu2 %v2369_v4 }
 0x5e9   :  { %2373 = vadd.xlane.f32.xlu1 %v2372_v7 }
 0x5ee   :  { %1966 = vrot.lane.b32.xlu0 %v1921_v13, %s4116_s13  ;;  %v1963_v0 = vpop.permute.xlu1 %1962 }
 0x5f7   :  { %v1697_v2 = vpop.xlane.xlu0 %1696 }
 0x5f8   :  { %4070 = vrcp.f32 %v1697_v2 }
 0x5fa   :  { %v3399_v22 = vpop.f32.mrf.mxu0 }
 0x5fb   :  { %v3400_v12 = vadd.f32 %v6458_v26, %v3399_v22 }
 0x5fc   :  { %1968 = vrot.lane.b32.xlu2 %v1922_v11, %s4116_s13 }
 0x5fe   :  { %v4071_v10 = vpop.eup %4070 }
 0x5ff   :  { %v1073_v31 = vpop.xlane.xlu0 %1072  ;;  %v1923_v6 = vmul.f32 %v4071_v10, %v6436_v50 }
 0x600   :  { %4072 = vrcp.f32 %v1073_v31 }
 0x602   :  { %3259 = vrot.lane.b32.xlu1 %v3212_v44, %s4116_s13 }
 0x604   :  { %v3461_v1 = vpop.f32.mrf.mxu1  ;;  %1970 = vrot.lane.b32.xlu2 %v1923_v6, %s4116_s13 }
 0x605   :  { %v3462_v38 = vadd.f32 %v3461_v1, %v3397_v20 }
 0x606   :  { %v4073_v42 = vpop.eup %4072 }
 0x607   :  { %v1243_v16 = vmul.f32 %v4073_v42, %v6192_v45  ;;  %3497 = vst [vmem:[#allocation4 + $0x30] sm:$0xff] %v3462_v38 }
 0x609   :  { %1259 = vst.msk [vmem:[#allocation3 + $0xb0] sm:$0xff] %vm763_vm0, %v1243_v16 }
 0x60a   :  { %2000 = vst.msk [vmem:[#allocation3 + $0xb0] sm:$0xff] %vm1988_vm1, %v1963_v0 }
 0x60c   :  { %v3464_v17 = vpop.f32.mrf.mxu1 }
 0x60d   :  { %v3465_v50 = vadd.f32 %v3464_v17, %v3400_v12 }
 0x60e   :  { %v2365_v47 = vpop.xlane.xlu2 %2364 }
 0x60f   :  { %3498 = vst [vmem:[#allocation4 + $0x38] sm:$0xff] %v3465_v50  ;;  %4074 = vrcp.f32 %v2365_v47 }
 0x611   :  { %v3315_v49 = vld [vmem:[#allocation3 + $0xb0] sm:$0xff] }
 0x612   :  { %3410 = vmatmul.f32.gmra.mxu0 %v3315_v49  ;;  %v3250_v9 = vpop.permute.xlu0 %3249 }
 0x613   :  { %3287 = vst.msk [vmem:[#allocation3 + $0xa8] sm:$0xff] %vm1988_vm1, %v3250_v9 }
 0x615   :  { %v4075_v45 = vpop.eup %4074 }
 0x616   :  { %v1965_v28 = vpop.permute.xlu2 %1964  ;;  %v2533_v62 = vmul.f32 %v4075_v45, %v6473_v61 }
 0x617   :  { %2001 = vst.msk [vmem:[#allocation3 + $0xc0] sm:$0xff] %vm1988_vm1, %v1965_v28 }
 0x618   :  { %1084 = vadd.xlane.f32.xlu0 %v1083_v52  ;;  %2549 = vst.msk [vmem:[#allocation3 + $0xc8] sm:$0xff] %vm763_vm0, %v2533_v62 }
 0x619   :  { %v2368_v41 = vpop.xlane.xlu1 %2367  ;;  %v3402_v58 = vpop.f32.mrf.mxu0 }
 0x61a   :  { %4076 = vrcp.f32 %v2368_v41  ;;  %v3252_v8 = vpop.permute.xlu0 %3251  ;;  %v3314_v5 = vld [vmem:[#allocation3 + $0xa8] sm:$0xff]  ;;  %v3403_v32 = vadd.f32 %v6458_v26, %v3402_v58 }
 0x61b   :  { %3288 = vst.msk [vmem:[#allocation3 + $0xb8] sm:$0xff] %vm1988_vm1, %v3252_v8  ;;  %3472 = vmatmul.f32.gmra.mxu1 %v3314_v5  ;;  %4078 = vrcp.f32 %v6559_v36 }
 0x61e   :  { %v3254_v3 = vpop.permute.xlu2 %3253  ;;  %v3317_v60 = vld [vmem:[#allocation3 + $0xc0] sm:$0xff] }
 0x61f   :  { %3289 = vst.msk [vmem:[#allocation3 + $0xc8] sm:$0xff] %vm1988_vm1, %v3254_v3  ;;  %3413 = vmatmul.f32.gmra.mxu0 %v3317_v60 }
 0x620   :  { %v4077_v61 = vpop.eup %4076 }
 0x621   :  { %v2534_v56 = vmul.f32 %v4077_v61, %v6481_v59  ;;  %v4079_v33 = vpop.eup %4078 }
 0x622   :  { %v3316_v25 = vld [vmem:[#allocation3 + $0xb8] sm:$0xff]  ;;  %v3211_v27 = vmul.f32 %v4079_v33, %v3175_v63 }
 0x623   :  { %3475 = vmatmul.f32.gmra.mxu1 %v3316_v25  ;;  %2550 = vst.msk [vmem:[#allocation3 + $0xd8] sm:$0xff] %vm763_vm0, %v2534_v56 }
 0x626   :  { %v3318_v30 = vld [vmem:[#allocation3 + $0xc8] sm:$0xff] }
 0x62b   :  { %3478 = vmatmul.f32.gmra.mxu1 %v3318_v30 }
 0x62c   :  { %3257 = vrot.lane.b32.xlu0 %v3211_v27, %s4116_s13  ;;  %s3511_s13 = sshll.u32 %s4117_s4, 4  ;;  %s3512_s13 = int_to_ptr.vmem [resolvable:$true] %s3511_s13 }
 0x631   :  { %v3256_v37 = vpop.permute.xlu1 %3255 }
 0x632   :  { %3290 = vst.msk [vmem:[#allocation3 + $0xd8] sm:$0xff] %vm1988_vm1, %v3256_v37 }
 0x639   :  { %v3320_v53 = vld [vmem:[#allocation3 + $0xd8] sm:$0xff] }
 0x63a   :  { %3481 = vmatmul.f32.gmra.mxu1 %v3320_v53 }
 0x645   :  { %v1079_v19 = vpop.xlane.xlu0 %1078 }
 0x646   :  { %4080 = vrcp.f32 %v1079_v19 }
 0x64b   :  { %v3405_v24 = vpop.f32.mrf.mxu0 }
 0x64c   :  { %v4081_v36 = vpop.eup %4080  ;;  %v3406_v4 = vadd.f32 %v6458_v26, %v3405_v24 }
 0x64d   :  { %v1082_v39 = vpop.xlane.xlu0 %1081  ;;  %v1245_v59 = vmul.f32 %v4081_v36, %v6249_v34 }
 0x64e   :  { %4082 = vrcp.f32 %v1082_v39 }
 0x64f   :  { %1261 = vst.msk [vmem:[#allocation3 + $0xd0] sm:$0xff] %vm763_vm0, %v1245_v59 }
 0x652   :  { %v3467_v14 = vpop.f32.mrf.mxu1 }
 0x653   :  { %v3468_v51 = vadd.f32 %v3467_v14, %v3403_v32 }
 0x654   :  { %v4083_v46 = vpop.eup %4082 }
 0x655   :  { %3499 = vst [vmem:[#allocation4 + $0x40] sm:$0xff] %v3468_v51  ;;  %v1246_v21 = vmul.f32 %v4083_v46, %v6261_v15 }
 0x657   :  { %v2371_v40 = vpop.xlane.xlu2 %2370  ;;  %1262 = vst.msk [vmem:[#allocation3 + $0xe0] sm:$0xff] %vm763_vm0, %v1246_v21 }
 0x658   :  { %4084 = vrcp.f32 %v2371_v40 }
 0x65a   :  { %v3470_v34 = vpop.f32.mrf.mxu1 }
 0x65b   :  { %v3471_v7 = vadd.f32 %v3470_v34, %v3406_v4  ;;  %v3408_v44 = vpop.f32.mrf.mxu0 }
 0x65c   :  { %v2374_v35 = vpop.xlane.xlu1 %2373 }
 0x65d   :  { %3500 = vst [vmem:[#allocation4 + $0x48] sm:$0xff] %v3471_v7  ;;  %4086 = vrcp.f32 %v2374_v35 }
 0x65e   :  { %v4085_v13 = vpop.eup %4084 }
 0x65f   :  { %v1969_v63 = vpop.permute.xlu2 %1968  ;;  %v2535_v23 = vmul.f32 %v4085_v13, %v6489_v18 }
 0x660   :  { %2003 = vst.msk [vmem:[#allocation3 + $0xe0] sm:$0xff] %vm1988_vm1, %v1969_v63  ;;  %v1967_v2 = vpop.permute.xlu0 %1966 }
 0x661   :  { %2002 = vst.msk [vmem:[#allocation3 + $0xd0] sm:$0xff] %vm1988_vm1, %v1967_v2 }
 0x662   :  { %2551 = vst.msk [vmem:[#allocation3 + $0xe8] sm:$0xff] %vm763_vm0, %v2535_v23 }
 0x663   :  { %v4087_v15 = vpop.eup %4086 }
 0x664   :  { %v2536_v11 = vmul.f32 %v4087_v15, %v6500_v43  ;;  %v3409_v43 = vadd.f32 %v6458_v26, %v3408_v44 }
 0x666   :  { %2552 = vst.msk [vmem:[#allocation3 + $0xf8] sm:$0xff] %vm763_vm0, %v2536_v11 }
 0x667   :  { %v3321_v10 = vld [vmem:[#allocation3 + $0xe0] sm:$0xff]  ;;  %v1971_v6 = vpop.permute.xlu2 %1970 }
 0x668   :  { %v3319_v29 = vld [vmem:[#allocation3 + $0xd0] sm:$0xff] }
 0x669   :  { %3416 = vmatmul.f32.gmra.mxu0 %v3319_v29 }
 0x671   :  { %3419 = vmatmul.f32.gmra.mxu0 %v3321_v10 }
 0x674   :  { %v3260_v57 = vpop.permute.xlu1 %3259 }
 0x675   :  { %3292 = vst.msk [vmem:[#allocation3 + $0xf8] sm:$0xff] %vm1988_vm1, %v3260_v57 }
 0x67c   :  { %v3324_v9 = vld [vmem:[#allocation3 + $0xf8] sm:$0xff] }
 0x68b   :  { %v1085_v18 = vpop.xlane.xlu0 %1084 }
 0x68c   :  { %4088 = vrcp.f32 %v1085_v18 }
 0x68f   :  { %v3411_v38 = vpop.f32.mrf.mxu0 }
 0x690   :  { %v3412_v22 = vadd.f32 %v6458_v26, %v3411_v38 }
 0x692   :  { %v4089_v31 = vpop.eup %4088 }
 0x693   :  { %v1247_v55 = vmul.f32 %v4089_v31, %v6276_v54 }
 0x695   :  { %1263 = vst.msk [vmem:[#allocation3 + $0xf0] sm:$0xff] %vm763_vm0, %v1247_v55 }
 0x696   :  { %2004 = vst.msk [vmem:[#allocation3 + $0xf0] sm:$0xff] %vm1988_vm1, %v1971_v6 }
 0x698   :  { %v3473_v20 = vpop.f32.mrf.mxu1 }
 0x699   :  { %v3474_v1 = vadd.f32 %v3473_v20, %v3409_v43 }
 0x69b   :  { %3501 = vst [vmem:[#allocation4 + $0x50] sm:$0xff] %v3474_v1 }
 0x69c   :  { %v3414_v12 = vpop.f32.mrf.mxu0 }
 0x69d   :  { %v3323_v42 = vld [vmem:[#allocation3 + $0xf0] sm:$0xff]  ;;  %v3415_v50 = vadd.f32 %v6458_v26, %v3414_v12 }
 0x69e   :  { %3422 = vmatmul.f32.gmra.mxu0 %v3323_v42  ;;  %v3258_v16 = vpop.permute.xlu0 %3257 }
 0x69f   :  { %3291 = vst.msk [vmem:[#allocation3 + $0xe8] sm:$0xff] %vm1988_vm1, %v3258_v16 }
 0x6a0   :  { %v3476_v54 = vpop.f32.mrf.mxu1 }
 0x6a1   :  { %v3477_v0 = vadd.f32 %v3476_v54, %v3412_v22 }
 0x6a3   :  { %3502 = vst [vmem:[#allocation4 + $0x58] sm:$0xff] %v3477_v0 }
 0x6a6   :  { %v3322_v17 = vld [vmem:[#allocation3 + $0xe8] sm:$0xff] }
 0x6a7   :  { %3484 = vmatmul.f32.gmra.mxu1 %v3322_v17 }
 0x6a8   :  { %v3479_v47 = vpop.f32.mrf.mxu1 }
 0x6a9   :  { %v3480_v49 = vadd.f32 %v3479_v47, %v3415_v50 }
 0x6ab   :  { %3503 = vst [vmem:[#allocation4 + $0x60] sm:$0xff] %v3480_v49 }
 0x6af   :  { %3487 = vmatmul.f32.gmra.mxu1 %v3324_v9 }
 0x6b7   :  { %v3482_v62 = vpop.f32.mrf.mxu1 }
 0x6e6   :  { %v3417_v45 = vpop.f32.mrf.mxu0 }
 0x6e7   :  { %v3418_v28 = vadd.f32 %v6458_v26, %v3417_v45 }
 0x6e9   :  { %v3483_v48 = vadd.f32 %v3482_v62, %v3418_v28 }
 0x6eb   :  { %3504 = vst [vmem:[#allocation4 + $0x68] sm:$0xff] %v3483_v48 }
 0x6ee   :  { %v3420_v52 = vpop.f32.mrf.mxu0 }
 0x6ef   :  { %v3421_v41 = vadd.f32 %v6458_v26, %v3420_v52 }
 0x71b   :  { %v3423_v3 = vpop.f32.mrf.mxu0 }
 0x71c   :  { %v3424_v60 = vadd.f32 %v6458_v26, %v3423_v3 }
 0x724   :  { %v3485_v8 = vpop.f32.mrf.mxu1 }
 0x725   :  { %v3486_v5 = vadd.f32 %v3485_v8, %v3421_v41 }
 0x727   :  { %3505 = vst [vmem:[#allocation4 + $0x70] sm:$0xff] %v3486_v5 }
 0x72c   :  { %v3488_v61 = vpop.f32.mrf.mxu1 }
 0x72d   :  { %v3489_v56 = vadd.f32 %v3488_v61, %v3424_v60 }
 0x72f   :  { %3506 = vst [vmem:[#allocation4 + $0x78] sm:$0xff] %v3489_v56 }
 0x730   :  { %3519 = dma.vmem_to_hbm [thread:$0]  %s3512_s13, 2048, %s3514_s15, [#allocation5], %s4118_s16, %s4118_s16, %s4119_s17  }
 0x731   :  { %4114 = dma.done.wait [#allocation5], 2048  }
 0x732   :  { %4115 = vsyncadd [#allocation5], 4294965248 }
 0x733   :  { %3524 = vsyncpa [#allocation5], 1 }

</bundles_post_ra>
